<compile_context>
chip_gen: v7x
topology: tpu7x:2x2x1
jax: 0.10.0
libtpu: 0.0.40
codegen_flags: <defaults>
</compile_context>

<pallas_src>
import functools
import math

import jax
import jax.numpy as jnp
from jax import lax
from jax.experimental import pallas as pl
from jax.experimental.pallas import tpu as pltpu


def _inception_conv_kernel(x_ref, w_ref, b_ref, o_ref, *, K: int, W: int):
    """Fused K x K 'same' conv with kw folded into the contraction dim.

    x_ref : (1, Hp*W, K*C_in)  bf16  kw-shifted columns of the padded image
    w_ref : (K, K*C_in, C_out) bf16  combined (averaged) weights, kh-major
    b_ref : (1, C_out)         f32   combined bias
    o_ref : (1, TH*W, C_out)   f32   output row tile
    """
    rows = o_ref.shape[1]                      # TH * W output rows this step
    c_out = o_ref.shape[2]
    h0 = pl.program_id(1) * rows               # first output row of this tile

    acc = jnp.zeros((rows, c_out), jnp.float32)   # register accumulator
    for kh in range(K):                           # K fat matmuls (not K*K thin)
        row0 = pl.multiple_of(h0 + kh * W, W)     # sublane-aligned window start
        patch = x_ref[0, pl.ds(row0, rows), :]    # (rows, K*C_in), no relayout
        acc = acc + jnp.dot(patch, w_ref[kh],
                            preferred_element_type=jnp.float32)
    # Single store per grid step (bias broadcast over rows).
    o_ref[0, :, :] = (acc + b_ref[...]).astype(o_ref.dtype)


def _pick_row_tile(H: int, W: int, target_rows: int = 128) -> int:
    """Largest divisor TH of H with TH*W <= target_rows and TH*W % 8 == 0.

    Falls back to the full H (block second-to-last dim == full array dim is
    always legal) when no aligned divisor exists.
    """
    best = H
    for th in range(1, H + 1):
        if H % th == 0 and th * W <= target_rows and (th * W) % 8 == 0:
            best = th
    return best


class Inception_Block_V1:
    """JAX/Pallas equivalent of the PyTorch Inception_Block_V1 module."""

    def __init__(self, in_channels, out_channels, num_kernels=6,
                 init_weight=True, key=None):
        self.in_channels = in_channels
        self.out_channels = out_channels
        self.num_kernels = num_kernels
        if key is None:
            key = jax.random.PRNGKey(0)

        # Per-branch Conv2d parameters (OIHW): kaiming_normal(mode='fan_out',
        # nonlinearity='relu') weights + zero bias, mirroring _initialize_weights.
        # (init_weight=False would use PyTorch's default Conv2d init; forward
        # math is identical for any given weights, so kaiming is always used
        # here -- parameter-parity caveat acknowledged.)
        self.weights = []
        self.biases = []
        for i in range(num_kernels):
            k = 2 * i + 1
            key, sub = jax.random.split(key)
            std = math.sqrt(2.0 / (out_channels * k * k))
            w = std * jax.random.normal(
                sub, (out_channels, in_channels, k, k), dtype=jnp.float32)
            self.weights.append(w)
            self.biases.append(jnp.zeros((out_channels,), jnp.float32))

        # Fold the mean of the conv bank into a single K x K kernel (exact, by
        # linearity). Computed once here, reused on every forward call.
        K = 2 * num_kernels - 1
        P = num_kernels - 1
        w_comb = jnp.zeros((K, K, in_channels, out_channels), jnp.float32)
        for i, w in enumerate(self.weights):
            k = 2 * i + 1
            off = P - i
            w_comb = w_comb.at[off:off + k, off:off + k, :, :].add(
                jnp.transpose(w, (2, 3, 1, 0)))          # OIHW -> HWIO
        w_comb = w_comb / num_kernels
        self.K = K
        self.P = P
        # kh-major weight columns: w_cols[kh, kw*C_in + c, o] (bf16 for the MXU).
        self.w_cols = w_comb.reshape(K, K * in_channels,
                                     out_channels).astype(jnp.bfloat16)
        self.b_comb = (sum(self.biases) / num_kernels).reshape(
            1, out_channels).astype(jnp.float32)

    def __call__(self, x):
        # x: (B, C_in, H, W) NCHW, exactly like the PyTorch module.
        B, C_in, H, W = x.shape
        assert C_in == self.in_channels
        K, P, C_out = self.K, self.P, self.out_channels

        # Channels to the lane dim, explicit zero 'same' padding, bf16 matmul path.
        x_nhwc = jnp.transpose(x, (0, 2, 3, 1)).astype(jnp.bfloat16)
        x_pad = jnp.pad(x_nhwc, ((0, 0), (P, P), (P, P), (0, 0)))
        Hp = H + 2 * P

        # Hoist the kw shift (im2col over kw):
        #   x_cols[b, h*W + w, kw*C_in + c] = x_pad[b, h, kw + w, c]
        # Costs K x input HBM bytes (tiny) and removes all unaligned in-kernel
        # slice/reshape relayouts: each kh tap is a contiguous row window.
        shifted = [x_pad[:, :, kw:kw + W, :] for kw in range(K)]
        x_cols = jnp.stack(shifted, axis=3).reshape(B, Hp * W, K * C_in)

        TH = _pick_row_tile(H, W)
        n_h = H // TH

        kernel = functools.partial(_inception_conv_kernel, K=K, W=W)
        y = pl.pallas_call(
            kernel,
            out_shape=jax.ShapeDtypeStruct((B, H * W, C_out), jnp.float32),
            grid=(B, n_h),
            in_specs=[
                pl.BlockSpec((1, Hp * W, K * C_in), lambda b, h: (b, 0, 0)),
                pl.BlockSpec((K, K * C_in, C_out), lambda b, h: (0, 0, 0)),
                pl.BlockSpec((1, C_out), lambda b, h: (0, 0)),
            ],
            out_specs=pl.BlockSpec((1, TH * W, C_out), lambda b, h: (b, h, 0)),
            compiler_params=pltpu.CompilerParams(
                dimension_semantics=("parallel", "parallel")),
        )(x_cols, self.w_cols, self.b_comb)

        # (B, H*W, C_out) -> NCHW, matching the PyTorch output convention.
        return jnp.transpose(y.reshape(B, H, W, C_out), (0, 3, 1, 2))


def _reference_forward(x, weights, biases, num_kernels):
    """Pure-JAX reference mirroring the PyTorch forward (per-branch convs + mean)."""
    outs = []
    for i in range(num_kernels):
        p = i
        y = lax.conv_general_dilated(
            x, weights[i],
            window_strides=(1, 1),
            padding=((p, p), (p, p)),
            dimension_numbers=("NCHW", "OIHW", "NCHW"),
            precision=lax.Precision.HIGHEST,
        )
        y = y + biases[i][None, :, None, None]
        outs.append(y)
    return jnp.mean(jnp.stack(outs, axis=-1), axis=-1)


if __name__ == "__main__":
    B, C_in, C_out, H, W = 2, 32, 32, 16, 16
    num_kernels = 6

    key = jax.random.PRNGKey(0)
    key, xkey, wkey = jax.random.split(key, 3)
    x = jax.random.normal(xkey, (B, C_in, H, W), dtype=jnp.float32)

    block = Inception_Block_V1(C_in, C_out, num_kernels=num_kernels, key=wkey)
    out = jax.block_until_ready(block(x))

    ref = _reference_forward(x, block.weights, block.biases, num_kernels)
    assert out.shape == (B, C_out, H, W), out.shape
    assert out.dtype == jnp.float32, out.dtype
    # bf16 activations/weights with f32 accumulation vs an f32 HIGHEST-precision
    # reference: expected max abs error ~4e-3; tolerance widened deliberately.
    max_err = float(jnp.max(jnp.abs(out - ref)))
    assert max_err < 1.5e-2, f"mismatch vs reference, max abs err={max_err}"

    print("KERNEL_OK")
</pallas_src>

<mosaic_0001>
module attributes {stable_mosaic.version = 11 : i64} {
  func.func @_inception_conv_kernel(%arg0: i32, %arg1: i32, %arg2: memref<1x416x352xbf16, #tpu.memory_space<vmem>>, %arg3: memref<11x352x32xbf16, #tpu.memory_space<vmem>>, %arg4: memref<1x32xf32, #tpu.memory_space<vmem>>, %arg5: memref<1x128x32xf32, #tpu.memory_space<vmem>>) attributes {dimension_semantics = [#tpu.dimension_semantics<parallel>, #tpu.dimension_semantics<parallel>], iteration_bounds = array<i64: 2, 2>, scalar_prefetch = 0 : i64, scratch_operands = 0 : i64, tpu.core_type = #tpu.core_type<tc>, window_params = [{transform_indices = @transform_0, window_bounds = array<i64: 1, 416, 352>}, {pipeline_mode = #tpu.pipeline_mode<synchronous>, transform_indices = @transform_1, window_bounds = array<i64: 11, 352, 32>}, {pipeline_mode = #tpu.pipeline_mode<synchronous>, transform_indices = @transform_2, window_bounds = array<i64: 1, 32>}, {transform_indices = @transform_3, window_bounds = array<i64: 1, 128, 32>}]} {
    %c128_i32 = arith.constant 128 : i32
    %0 = arith.muli %arg1, %c128_i32 : i32
    %cst = arith.constant 0.000000e+00 : f32
    %1 = vector.broadcast %cst : f32 to vector<128x32xf32>
    %c0_i32 = arith.constant 0 : i32
    %2 = arith.addi %0, %c0_i32 : i32
    %3 = tpu.assume_multiple %2, 16 : i32
    %c0 = arith.constant 0 : index
    %4 = arith.index_cast %3 : i32 to index
    %c0_0 = arith.constant 0 : index
    %5 = vector.load %arg2[%c0, %4, %c0_0] : memref<1x416x352xbf16, #tpu.memory_space<vmem>>, vector<1x128x352xbf16>
    %6 = vector.shape_cast %5 : vector<1x128x352xbf16> to vector<128x352xbf16>
    %c0_1 = arith.constant 0 : index
    %c0_2 = arith.constant 0 : index
    %c0_3 = arith.constant 0 : index
    %7 = vector.load %arg3[%c0_1, %c0_2, %c0_3] : memref<11x352x32xbf16, #tpu.memory_space<vmem>>, vector<1x352x32xbf16>
    %8 = vector.shape_cast %7 : vector<1x352x32xbf16> to vector<352x32xbf16>
    %cst_4 = arith.constant dense<0.000000e+00> : vector<128x32xf32>
    %9 = tpu.matmul %6, %8, %cst_4 {dimension_numbers = #tpu.dot_dimension_numbers<[1], [0], [0], [1], [0, 0, 1, 1], [], []>} : vector<128x352xbf16>, vector<352x32xbf16>, vector<128x32xf32> -> vector<128x32xf32>
    %10 = arith.addf %1, %9 : vector<128x32xf32>
    %c16_i32 = arith.constant 16 : i32
    %11 = arith.addi %0, %c16_i32 : i32
    %12 = tpu.assume_multiple %11, 16 : i32
    %c0_5 = arith.constant 0 : index
    %13 = arith.index_cast %12 : i32 to index
    %c0_6 = arith.constant 0 : index
    %14 = vector.load %arg2[%c0_5, %13, %c0_6] : memref<1x416x352xbf16, #tpu.memory_space<vmem>>, vector<1x128x352xbf16>
    %15 = vector.shape_cast %14 : vector<1x128x352xbf16> to vector<128x352xbf16>
    %c1 = arith.constant 1 : index
    %c0_7 = arith.constant 0 : index
    %c0_8 = arith.constant 0 : index
    %16 = vector.load %arg3[%c1, %c0_7, %c0_8] : memref<11x352x32xbf16, #tpu.memory_space<vmem>>, vector<1x352x32xbf16>
    %17 = vector.shape_cast %16 : vector<1x352x32xbf16> to vector<352x32xbf16>
    %cst_9 = arith.constant dense<0.000000e+00> : vector<128x32xf32>
    %18 = tpu.matmul %15, %17, %cst_9 {dimension_numbers = #tpu.dot_dimension_numbers<[1], [0], [0], [1], [0, 0, 1, 1], [], []>} : vector<128x352xbf16>, vector<352x32xbf16>, vector<128x32xf32> -> vector<128x32xf32>
    %19 = arith.addf %10, %18 : vector<128x32xf32>
    %c32_i32 = arith.constant 32 : i32
    %20 = arith.addi %0, %c32_i32 : i32
    %21 = tpu.assume_multiple %20, 16 : i32
    %c0_10 = arith.constant 0 : index
    %22 = arith.index_cast %21 : i32 to index
    %c0_11 = arith.constant 0 : index
    %23 = vector.load %arg2[%c0_10, %22, %c0_11] : memref<1x416x352xbf16, #tpu.memory_space<vmem>>, vector<1x128x352xbf16>
    %24 = vector.shape_cast %23 : vector<1x128x352xbf16> to vector<128x352xbf16>
    %c2 = arith.constant 2 : index
    %c0_12 = arith.constant 0 : index
    %c0_13 = arith.constant 0 : index
    %25 = vector.load %arg3[%c2, %c0_12, %c0_13] : memref<11x352x32xbf16, #tpu.memory_space<vmem>>, vector<1x352x32xbf16>
    %26 = vector.shape_cast %25 : vector<1x352x32xbf16> to vector<352x32xbf16>
    %cst_14 = arith.constant dense<0.000000e+00> : vector<128x32xf32>
    %27 = tpu.matmul %24, %26, %cst_14 {dimension_numbers = #tpu.dot_dimension_numbers<[1], [0], [0], [1], [0, 0, 1, 1], [], []>} : vector<128x352xbf16>, vector<352x32xbf16>, vector<128x32xf32> -> vector<128x32xf32>
    %28 = arith.addf %19, %27 : vector<128x32xf32>
    %c48_i32 = arith.constant 48 : i32
    %29 = arith.addi %0, %c48_i32 : i32
    %30 = tpu.assume_multiple %29, 16 : i32
    %c0_15 = arith.constant 0 : index
    %31 = arith.index_cast %30 : i32 to index
    %c0_16 = arith.constant 0 : index
    %32 = vector.load %arg2[%c0_15, %31, %c0_16] : memref<1x416x352xbf16, #tpu.memory_space<vmem>>, vector<1x128x352xbf16>
    %33 = vector.shape_cast %32 : vector<1x128x352xbf16> to vector<128x352xbf16>
    %c3 = arith.constant 3 : index
    %c0_17 = arith.constant 0 : index
    %c0_18 = arith.constant 0 : index
    %34 = vector.load %arg3[%c3, %c0_17, %c0_18] : memref<11x352x32xbf16, #tpu.memory_space<vmem>>, vector<1x352x32xbf16>
    %35 = vector.shape_cast %34 : vector<1x352x32xbf16> to vector<352x32xbf16>
    %cst_19 = arith.constant dense<0.000000e+00> : vector<128x32xf32>
    %36 = tpu.matmul %33, %35, %cst_19 {dimension_numbers = #tpu.dot_dimension_numbers<[1], [0], [0], [1], [0, 0, 1, 1], [], []>} : vector<128x352xbf16>, vector<352x32xbf16>, vector<128x32xf32> -> vector<128x32xf32>
    %37 = arith.addf %28, %36 : vector<128x32xf32>
    %c64_i32 = arith.constant 64 : i32
    %38 = arith.addi %0, %c64_i32 : i32
    %39 = tpu.assume_multiple %38, 16 : i32
    %c0_20 = arith.constant 0 : index
    %40 = arith.index_cast %39 : i32 to index
    %c0_21 = arith.constant 0 : index
    %41 = vector.load %arg2[%c0_20, %40, %c0_21] : memref<1x416x352xbf16, #tpu.memory_space<vmem>>, vector<1x128x352xbf16>
    %42 = vector.shape_cast %41 : vector<1x128x352xbf16> to vector<128x352xbf16>
    %c4 = arith.constant 4 : index
    %c0_22 = arith.constant 0 : index
    %c0_23 = arith.constant 0 : index
    %43 = vector.load %arg3[%c4, %c0_22, %c0_23] : memref<11x352x32xbf16, #tpu.memory_space<vmem>>, vector<1x352x32xbf16>
    %44 = vector.shape_cast %43 : vector<1x352x32xbf16> to vector<352x32xbf16>
    %cst_24 = arith.constant dense<0.000000e+00> : vector<128x32xf32>
    %45 = tpu.matmul %42, %44, %cst_24 {dimension_numbers = #tpu.dot_dimension_numbers<[1], [0], [0], [1], [0, 0, 1, 1], [], []>} : vector<128x352xbf16>, vector<352x32xbf16>, vector<128x32xf32> -> vector<128x32xf32>
    %46 = arith.addf %37, %45 : vector<128x32xf32>
    %c80_i32 = arith.constant 80 : i32
    %47 = arith.addi %0, %c80_i32 : i32
    %48 = tpu.assume_multiple %47, 16 : i32
    %c0_25 = arith.constant 0 : index
    %49 = arith.index_cast %48 : i32 to index
    %c0_26 = arith.constant 0 : index
    %50 = vector.load %arg2[%c0_25, %49, %c0_26] : memref<1x416x352xbf16, #tpu.memory_space<vmem>>, vector<1x128x352xbf16>
    %51 = vector.shape_cast %50 : vector<1x128x352xbf16> to vector<128x352xbf16>
    %c5 = arith.constant 5 : index
    %c0_27 = arith.constant 0 : index
    %c0_28 = arith.constant 0 : index
    %52 = vector.load %arg3[%c5, %c0_27, %c0_28] : memref<11x352x32xbf16, #tpu.memory_space<vmem>>, vector<1x352x32xbf16>
    %53 = vector.shape_cast %52 : vector<1x352x32xbf16> to vector<352x32xbf16>
    %cst_29 = arith.constant dense<0.000000e+00> : vector<128x32xf32>
    %54 = tpu.matmul %51, %53, %cst_29 {dimension_numbers = #tpu.dot_dimension_numbers<[1], [0], [0], [1], [0, 0, 1, 1], [], []>} : vector<128x352xbf16>, vector<352x32xbf16>, vector<128x32xf32> -> vector<128x32xf32>
    %55 = arith.addf %46, %54 : vector<128x32xf32>
    %c96_i32 = arith.constant 96 : i32
    %56 = arith.addi %0, %c96_i32 : i32
    %57 = tpu.assume_multiple %56, 16 : i32
    %c0_30 = arith.constant 0 : index
    %58 = arith.index_cast %57 : i32 to index
    %c0_31 = arith.constant 0 : index
    %59 = vector.load %arg2[%c0_30, %58, %c0_31] : memref<1x416x352xbf16, #tpu.memory_space<vmem>>, vector<1x128x352xbf16>
    %60 = vector.shape_cast %59 : vector<1x128x352xbf16> to vector<128x352xbf16>
    %c6 = arith.constant 6 : index
    %c0_32 = arith.constant 0 : index
    %c0_33 = arith.constant 0 : index
    %61 = vector.load %arg3[%c6, %c0_32, %c0_33] : memref<11x352x32xbf16, #tpu.memory_space<vmem>>, vector<1x352x32xbf16>
    %62 = vector.shape_cast %61 : vector<1x352x32xbf16> to vector<352x32xbf16>
    %cst_34 = arith.constant dense<0.000000e+00> : vector<128x32xf32>
    %63 = tpu.matmul %60, %62, %cst_34 {dimension_numbers = #tpu.dot_dimension_numbers<[1], [0], [0], [1], [0, 0, 1, 1], [], []>} : vector<128x352xbf16>, vector<352x32xbf16>, vector<128x32xf32> -> vector<128x32xf32>
    %64 = arith.addf %55, %63 : vector<128x32xf32>
    %c112_i32 = arith.constant 112 : i32
    %65 = arith.addi %0, %c112_i32 : i32
    %66 = tpu.assume_multiple %65, 16 : i32
    %c0_35 = arith.constant 0 : index
    %67 = arith.index_cast %66 : i32 to index
    %c0_36 = arith.constant 0 : index
    %68 = vector.load %arg2[%c0_35, %67, %c0_36] : memref<1x416x352xbf16, #tpu.memory_space<vmem>>, vector<1x128x352xbf16>
    %69 = vector.shape_cast %68 : vector<1x128x352xbf16> to vector<128x352xbf16>
    %c7 = arith.constant 7 : index
    %c0_37 = arith.constant 0 : index
    %c0_38 = arith.constant 0 : index
    %70 = vector.load %arg3[%c7, %c0_37, %c0_38] : memref<11x352x32xbf16, #tpu.memory_space<vmem>>, vector<1x352x32xbf16>
    %71 = vector.shape_cast %70 : vector<1x352x32xbf16> to vector<352x32xbf16>
    %cst_39 = arith.constant dense<0.000000e+00> : vector<128x32xf32>
    %72 = tpu.matmul %69, %71, %cst_39 {dimension_numbers = #tpu.dot_dimension_numbers<[1], [0], [0], [1], [0, 0, 1, 1], [], []>} : vector<128x352xbf16>, vector<352x32xbf16>, vector<128x32xf32> -> vector<128x32xf32>
    %73 = arith.addf %64, %72 : vector<128x32xf32>
    %c128_i32_40 = arith.constant 128 : i32
    %74 = arith.addi %0, %c128_i32_40 : i32
    %75 = tpu.assume_multiple %74, 16 : i32
    %c0_41 = arith.constant 0 : index
    %76 = arith.index_cast %75 : i32 to index
    %c0_42 = arith.constant 0 : index
    %77 = vector.load %arg2[%c0_41, %76, %c0_42] : memref<1x416x352xbf16, #tpu.memory_space<vmem>>, vector<1x128x352xbf16>
    %78 = vector.shape_cast %77 : vector<1x128x352xbf16> to vector<128x352xbf16>
    %c8 = arith.constant 8 : index
    %c0_43 = arith.constant 0 : index
    %c0_44 = arith.constant 0 : index
    %79 = vector.load %arg3[%c8, %c0_43, %c0_44] : memref<11x352x32xbf16, #tpu.memory_space<vmem>>, vector<1x352x32xbf16>
    %80 = vector.shape_cast %79 : vector<1x352x32xbf16> to vector<352x32xbf16>
    %cst_45 = arith.constant dense<0.000000e+00> : vector<128x32xf32>
    %81 = tpu.matmul %78, %80, %cst_45 {dimension_numbers = #tpu.dot_dimension_numbers<[1], [0], [0], [1], [0, 0, 1, 1], [], []>} : vector<128x352xbf16>, vector<352x32xbf16>, vector<128x32xf32> -> vector<128x32xf32>
    %82 = arith.addf %73, %81 : vector<128x32xf32>
    %c144_i32 = arith.constant 144 : i32
    %83 = arith.addi %0, %c144_i32 : i32
    %84 = tpu.assume_multiple %83, 16 : i32
    %c0_46 = arith.constant 0 : index
    %85 = arith.index_cast %84 : i32 to index
    %c0_47 = arith.constant 0 : index
    %86 = vector.load %arg2[%c0_46, %85, %c0_47] : memref<1x416x352xbf16, #tpu.memory_space<vmem>>, vector<1x128x352xbf16>
    %87 = vector.shape_cast %86 : vector<1x128x352xbf16> to vector<128x352xbf16>
    %c9 = arith.constant 9 : index
    %c0_48 = arith.constant 0 : index
    %c0_49 = arith.constant 0 : index
    %88 = vector.load %arg3[%c9, %c0_48, %c0_49] : memref<11x352x32xbf16, #tpu.memory_space<vmem>>, vector<1x352x32xbf16>
    %89 = vector.shape_cast %88 : vector<1x352x32xbf16> to vector<352x32xbf16>
    %cst_50 = arith.constant dense<0.000000e+00> : vector<128x32xf32>
    %90 = tpu.matmul %87, %89, %cst_50 {dimension_numbers = #tpu.dot_dimension_numbers<[1], [0], [0], [1], [0, 0, 1, 1], [], []>} : vector<128x352xbf16>, vector<352x32xbf16>, vector<128x32xf32> -> vector<128x32xf32>
    %91 = arith.addf %82, %90 : vector<128x32xf32>
    %c160_i32 = arith.constant 160 : i32
    %92 = arith.addi %0, %c160_i32 : i32
    %93 = tpu.assume_multiple %92, 16 : i32
    %c0_51 = arith.constant 0 : index
    %94 = arith.index_cast %93 : i32 to index
    %c0_52 = arith.constant 0 : index
    %95 = vector.load %arg2[%c0_51, %94, %c0_52] : memref<1x416x352xbf16, #tpu.memory_space<vmem>>, vector<1x128x352xbf16>
    %96 = vector.shape_cast %95 : vector<1x128x352xbf16> to vector<128x352xbf16>
    %c10 = arith.constant 10 : index
    %c0_53 = arith.constant 0 : index
    %c0_54 = arith.constant 0 : index
    %97 = vector.load %arg3[%c10, %c0_53, %c0_54] : memref<11x352x32xbf16, #tpu.memory_space<vmem>>, vector<1x352x32xbf16>
    %98 = vector.shape_cast %97 : vector<1x352x32xbf16> to vector<352x32xbf16>
    %cst_55 = arith.constant dense<0.000000e+00> : vector<128x32xf32>
    %99 = tpu.matmul %96, %98, %cst_55 {dimension_numbers = #tpu.dot_dimension_numbers<[1], [0], [0], [1], [0, 0, 1, 1], [], []>} : vector<128x352xbf16>, vector<352x32xbf16>, vector<128x32xf32> -> vector<128x32xf32>
    %100 = arith.addf %91, %99 : vector<128x32xf32>
    %c0_56 = arith.constant 0 : index
    %c0_57 = arith.constant 0 : index
    %101 = vector.load %arg4[%c0_56, %c0_57] : memref<1x32xf32, #tpu.memory_space<vmem>>, vector<1x32xf32>
    %102 = vector.broadcast %101 : vector<1x32xf32> to vector<128x32xf32>
    %103 = arith.addf %100, %102 : vector<128x32xf32>
    %c0_58 = arith.constant 0 : index
    %c0_59 = arith.constant 0 : index
    %c0_60 = arith.constant 0 : index
    %104 = vector.load %arg5[%c0_58, %c0_59, %c0_60] : memref<1x128x32xf32, #tpu.memory_space<vmem>>, vector<1x128x32xf32>
    %105 = vector.shape_cast %104 : vector<1x128x32xf32> to vector<128x32xf32>
    %106 = vector.shape_cast %103 : vector<128x32xf32> to vector<1x128x32xf32>
    tpu.vector_store %arg5[%c0_58, %c0_59, %c0_60], %106 {strides = array<i32>} : memref<1x128x32xf32, #tpu.memory_space<vmem>>, vector<1x128x32xf32>,
    return
  }
  func.func @transform_0(%arg0: i32, %arg1: i32) -> (i32, i32, i32) {
    %c0_i32 = arith.constant 0 : i32
    %c0_i32_0 = arith.constant 0 : i32
    %c0_i32_1 = arith.constant 0 : i32
    return %arg0, %c0_i32, %c0_i32_0 : i32, i32, i32
  }
  func.func @transform_1(%arg0: i32, %arg1: i32) -> (i32, i32, i32) {
    %c0_i32 = arith.constant 0 : i32
    %c0_i32_0 = arith.constant 0 : i32
    %c0_i32_1 = arith.constant 0 : i32
    %c0_i32_2 = arith.constant 0 : i32
    return %c0_i32, %c0_i32_0, %c0_i32_1 : i32, i32, i32
  }
  func.func @transform_2(%arg0: i32, %arg1: i32) -> (i32, i32) {
    %c0_i32 = arith.constant 0 : i32
    %c0_i32_0 = arith.constant 0 : i32
    %c0_i32_1 = arith.constant 0 : i32
    return %c0_i32, %c0_i32_0 : i32, i32
  }
  func.func @transform_3(%arg0: i32, %arg1: i32) -> (i32, i32, i32) {
    %c0_i32 = arith.constant 0 : i32
    %c0_i32_0 = arith.constant 0 : i32
    return %arg0, %arg1, %c0_i32 : i32, i32, i32
  }
}

</mosaic_0001>

<bundles_post_ra>
// kernel: tpu_custom_call.1
= control target key start
LH: loop header
LB: loop body
LE: loop exit
PB: predicated region body
PF: predicated region fallthrough
CT: control target
= control target key end

     0   :  { %s9846_s12 = smov 0   ;;  %s9848_s13 = smov 0   ;;  %s11529_s0 = inlined_call_operand.vmem [shape: bf16[2,416,352], index: 0, kind: input, shape index: {}]   ;;  %s11530_s1 = inlined_call_operand.vmem [shape: bf16[11,352,32], index: 1, kind: input, shape index: {}]   ;;  %s11531_s2 = inlined_call_operand.vmem [shape: f32[1,32], index: 2, kind: input, shape index: {}]   ;;  %s11532_s3 = inlined_call_operand.vmem [shape: f32[2,256,32], index: 3, kind: output, shape index: {}]  }
   0x1   :  { %s9850_s14 = smov 0   ;;  %s9852_s15 = smov 0  }
   0x2   :  { %s9854_s16 = smov 0  }
   0x3 LB: > { %s22_s17 = sadd.s32 1, %s9816_s14  ;;  %s25_s18 = sadd.s32 1, %s9820_s15  ;;  %s9824_s16 = sphi %s9854_s16, %s13_s16   ;;  %s9820_s15 = sphi %s9852_s15, %s11536_s15   ;;  %s9816_s14 = sphi %s9850_s14, %s11535_s14   ;;  %s9812_s13 = sphi %s9848_s13, %s11534_s13   ;;  %s9808_s12 = sphi %s9846_s12, %s11533_s12  }
   0x4   : > { %p23_p0 = scmp.ge.s32.totalorder %s22_s17, 2  ;;  %p6572_p1 = scmp.ge.s32.totalorder %s9824_s16, 1 }
   0x5   : > { %p151_p2 = scmp.lt.s32.totalorder %s9824_s16, 5 }
   0x6   : > { %s11538_s17 = smov (%p23_p0, %s22_s17), 0  ;;  %s11540_s18 = smov (!%p23_p0, %s25_s18), %s9820_s15 }
   0x7   : > { %p152_p3 = pnand %p6572_p1, %p151_p2  ;;  %p27_p4 = scmp.ge.s32.totalorder %s11540_s18, 2 }
   0x8   : > { %v9192_v0 = vld [vmem:[%s11530_s1 + $0xf0] sm:$0xff] (!%p152_p3)   ;;  %p179_p5 = scmp.lt.s32.totalorder (!%p152_p3), %s9812_s13, 1  ;;  %s9888_s25 = sshll.u32 (!%p152_p3), %s9808_s12, 7  ;;  %v9195_v3 = vld [vmem:[%s11530_s1 + $0xf8] sm:$0xff] (!%p152_p3)   ;;  %v9198_v6 = vld [vmem:[%s11530_s1 + $0x100] sm:$0xff] (!%p152_p3)   ;;  %vm612_vm0 = vcmask (!%p152_p3), 785408  }
   0x9   : > { %s11542_s18 = smov (%p27_p4, %s11540_s18), 0  ;;  %155 = sbr.rel (%p152_p3) target bundleno = 783 (0x30f), region = 32 }
   0xa   : > { %v9193_v1 = vld [vmem:[%s11530_s1 + $0x130] sm:$0xff] (!%p152_p3)   ;;  %7637 = vmatprep.subr.bf16.mxu0 (!%p152_p3), %v9192_v0  ;;  %v9196_v4 = vld [vmem:[%s11530_s1 + $0x138] sm:$0xff] (!%p152_p3)   ;;  %s277_s5 = sadd.s32 (!%p152_p3), 16, %s9888_s25  ;;  %v9199_v7 = vld [vmem:[%s11530_s1 + $0x140] sm:$0xff] (!%p152_p3)   ;;  %s3008_s23 = sadd.s32 (!%p152_p3), 80, %s9888_s25  ;;  %vm6445_vm1 = vcmask (!%p152_p3), 261120  }
   0xb   : > { %v9194_v2 = vld [vmem:[%s11530_s1 + $0xb0] sm:$0xff] (!%p152_p3)   ;;  %8495 = vmatprep.subr.bf16.mxu1 (!%p152_p3), %v9193_v1  ;;  %v9197_v5 = vld [vmem:[%s11530_s1 + $0xb8] sm:$0xff] (!%p152_p3)   ;;  %v9200_v8 = vld [vmem:[%s11530_s1 + $0xc0] sm:$0xff] (!%p152_p3)   ;;  %s278_s20 = sshra.s32 (!%p152_p3), %s277_s5, 3  ;;  %s3577_s24 = sadd.s32 (!%p152_p3), 96, %s9888_s25 }
   0xc   : > { %7638 = vmatpush3.bf16.msra.mxu0 (!%p152_p3), %v9194_v2  ;;  %8496 = vmatpush3.bf16.msra.mxu1 (!%p152_p3), %v9193_v1  ;;  %v9201_v9 = vld [vmem:[%s11530_s1 + $0x108] sm:$0xff] (!%p152_p3)   ;;  %s7627_s28 = smul.u32 (!%p152_p3), 12, %s278_s20  ;;  %v9204_v12 = vld [vmem:[%s11530_s1 + $0x110] sm:$0xff] (!%p152_p3)   ;;  %v9207_v15 = vld [vmem:[%s11530_s1 + $0x118] sm:$0xff] (!%p152_p3)   ;;  %s3578_s30 = sshra.s32 (!%p152_p3), %s3577_s24, 3 }
   0xd   : > { %7639 = vmatprep.subr.bf16.mxu0 (!%p152_p3), %v9195_v3  ;;  %8497 = vmatprep.subr.bf16.mxu1 (!%p152_p3), %v9196_v4  ;;  %v9202_v10 = vld [vmem:[%s11530_s1 + $0x148] sm:$0xff] (!%p152_p3)   ;;  %v9205_v13 = vld [vmem:[%s11530_s1 + $0x150] sm:$0xff] (!%p152_p3)   ;;  %v9208_v16 = vld [vmem:[%s11530_s1 + $0x158] sm:$0xff] (!%p152_p3)  }
   0xe   : > { %v9203_v11 = vld [vmem:[%s11530_s1 + $0xc8] sm:$0xff] (!%p152_p3)   ;;  %v9206_v14 = vld [vmem:[%s11530_s1 + $0xd0] sm:$0xff] (!%p152_p3)   ;;  %v9209_v18 = vld [vmem:[%s11530_s1 + $0xd8] sm:$0xff] (!%p152_p3)  }
   0xf   : > { %v9211_v19 = vld [vmem:[%s11530_s1 + $0x120] sm:$0xff] (!%p152_p3)   ;;  %v9216_v24 = vld [vmem:[%s11530_s1 + $0x128] sm:$0xff] (!%p152_p3)   ;;  %v9225_v32 = vld [vmem:[%s11530_s1 + $0x50] sm:$0xff] (!%p152_p3)  }
  0x10   : > { %s11544_s13 = smov (!%p179_p5, %s9812_s13), 1  ;;  %7640 = vmatpush3.bf16.msra.mxu0 %v9197_v5  ;;  %8498 = vmatpush3.bf16.msra.mxu1 %v9196_v4  ;;  %v9213_v21 = vld [vmem:[%s11530_s1 + $0x40] sm:$0xff]   ;;  %v9217_v25 = vld [vmem:[%s11530_s1 + $0x48] sm:$0xff]   ;;  %v9226_v33 = vld [vmem:[%s11530_s1 + $0x10] sm:$0xff]  }
  0x11   : > { %s9151_s10 = smul.u32 624, %s11544_s13  ;;  %7641 = vmatprep.subr.bf16.mxu0 %v9198_v6  ;;  %8499 = vmatprep.subr.bf16.mxu1 %v9199_v7  ;;  %v9214_v22 = vld [vmem:[%s11530_s1 + $0xe0] sm:$0xff]   ;;  %v9218_v26 = vld [vmem:[%s11530_s1 + $0xe8] sm:$0xff]   ;;  %v9227_v34 = vld [vmem:[%s11530_s1 + $0x58] sm:$0xff]  }
  0x12   : > { %v9215_v23 = vld [vmem:[%s11530_s1] sm:$0xff]   ;;  %v9219_v27 = vld [vmem:[%s11530_s1 + $0x8] sm:$0xff]   ;;  %v9228_v35 = vld [vmem:[%s11530_s1 + $0x18] sm:$0xff]  }
  0x13   : > { %s9927_s6 = scalar_lea.vmem %s11529_s0, %s9151_s10  ;;  %v9234_v40 = vld [vmem:[%s11530_s1 + $0x60] sm:$0xff]   ;;  %v9238_v44 = vld [vmem:[%s11530_s1 + $0x68] sm:$0xff]   ;;  %v9245_v50 = vld [vmem:[%s11530_s1 + $0x70] sm:$0xff]   ;;  %s7632_s10 = smul.u32 12, %s3578_s30 }
  0x14   : > { %7642 = vmatpush3.bf16.msra.mxu0 %v9200_v8  ;;  %8500 = vmatpush3.bf16.msra.mxu1 %v9199_v7  ;;  %s9936_s19 = scalar_lea.vmem %s9927_s6, %s7627_s28  ;;  %v9235_v41 = vld [vmem:[%s11530_s1 + $0x1a0] sm:$0xff]   ;;  %v9239_v45 = vld [vmem:[%s11530_s1 + $0x28] sm:$0xff]   ;;  %s196_s28 = sshra.s32 %s9888_s25, 3  ;;  %v9247_v52 = vld [vmem:[%s11530_s1 + $0x30] sm:$0xff]  }
  0x15   : > { %7643 = vmatprep.subr.bf16.mxu0 %v9201_v9  ;;  %8501 = vmatprep.subr.bf16.mxu1 %v9202_v10  ;;  %v9210_v17 = vld [vmem:[%s9936_s19 + $0x8] ss:$12 sps:$4 sm:$0xff]   ;;  %v9212_v20 = vld [vmem:[%s9936_s19 + $0x20] ss:$12 sps:$4 sm:$0xff]   ;;  %v9222_v29 = vld [vmem:[%s9936_s19 + $0x4] ss:$12 sps:$4 sm:$0xff]   ;;  %s10479_s26 = scalar_lea.vmem %s9927_s6, %s7632_s10 }
  0x16   : > { %8507 = vmatprep.mubr.msk.bf16.mxu1 %vm612_vm0, %v9210_v17  ;;  %v9220_v28 = vld [vmem:[%s9936_s19] ss:$12 sps:$4 sm:$0xff]   ;;  %v9223_v30 = vld [vmem:[%s9936_s19 + $0x38] ss:$12 sps:$4 sm:$0xff]   ;;  %669 = vmatprep.mubr.bf16.mxu0 %v9222_v29  ;;  %v9224_v31 = vld [vmem:[%s9936_s19 + $0x50] ss:$12 sps:$4 sm:$0xff]  }
  0x17   : > { %v9229_v36 = vld [vmem:[%s9936_s19 + $0x1c] ss:$12 sps:$4 sm:$0xff]   ;;  %v9232_v38 = vld [vmem:[%s9936_s19 + $0x18] ss:$12 sps:$4 sm:$0xff]   ;;  %v9233_v39 = vld [vmem:[%s9936_s19 + $0x80] ss:$12 sps:$4 sm:$0xff]  }
  0x18   : > { %7644 = vmatpush3.bf16.msra.mxu0 %v9203_v11  ;;  %8502 = vmatpush3.bf16.msra.mxu1 %v9202_v10  ;;  %v9231_v37 = vld [vmem:[%s9936_s19 + $0x68] ss:$12 sps:$4 sm:$0xff]   ;;  %v9236_v42 = vld [vmem:[%s11530_s1 + $0x20] sm:$0xff]   ;;  %v9243_v48 = vld [vmem:[%s9936_s19 + $0x30] ss:$12 sps:$4 sm:$0xff]   ;;  %s7626_s4 = smul.u32 12, %s196_s28 }
  0x19   : > { %7645 = vmatprep.subr.bf16.mxu0 %v9204_v12  ;;  %8503 = vmatprep.subr.bf16.mxu1 %v9205_v13  ;;  %v9237_v43 = vld [vmem:[%s11530_s1 + $0x160] sm:$0xff]   ;;  %v9244_v49 = vld [vmem:[%s9936_s19 + $0xb0] ss:$12 sps:$4 sm:$0xff]   ;;  %v9246_v51 = vld [vmem:[%s11530_s1 + $0x1a8] sm:$0xff]   ;;  %s1301_s28 = sadd.s32 32, %s9888_s25 }
  0x1a   : > { %v9240_v46 = vld [vmem:[%s9936_s19 + $0x34] ss:$12 sps:$4 sm:$0xff]   ;;  %v9242_v47 = vld [vmem:[%s9936_s19 + $0x98] ss:$12 sps:$4 sm:$0xff]   ;;  %v9248_v53 = vld [vmem:[%s11530_s1 + $0x168] sm:$0xff]   ;;  %s10040_s22 = scalar_lea.vmem %s9927_s6, %s7626_s4  ;;  %s1302_s7 = sshra.s32 %s1301_s28, 3 }
  0x1b   : > { %v9249_v54 = vld [vmem:[%s11530_s1 + $0x78] sm:$0xff]   ;;  %v9253_v57 = vld [vmem:[%s10040_s22] ss:$12 sps:$4 sm:$0xff]   ;;  %v9255_v58 = vld [vmem:[%s10040_s22 + $0x4] ss:$12 sps:$4 sm:$0xff]   ;;  %s7628_s11 = smul.u32 12, %s1302_s7 }
  0x1c   : > { %7646 = vmatpush3.bf16.msra.mxu0 %v9206_v14  ;;  %8504 = vmatpush3.bf16.msra.mxu1 %v9205_v13  ;;  %v9250_v55 = vld [vmem:[%s11530_s1 + $0x38] sm:$0xff]   ;;  %v9256_v59 = vld [vmem:[%s9936_s19 + $0x48] ss:$12 sps:$4 sm:$0xff]   ;;  %v9257_v60 = vld [vmem:[%s11530_s1 + $0x80] sm:$0xff]   ;;  %s1870_s28 = sadd.s32 48, %s9888_s25 }
  0x1d   : > { %7647 = vmatprep.subr.bf16.mxu0 %v9207_v15  ;;  %8505 = vmatprep.subr.bf16.mxu1 %v9208_v16  ;;  %v9251_v56 = vld [vmem:[%s9936_s19 + $0x4c] ss:$12 sps:$4 sm:$0xff]   ;;  %v9258_v61 = vld [vmem:[%s11530_s1 + $0x1b0] sm:$0xff]   ;;  %v9262_v0 = vld [vmem:[%s10040_s22 + $0x1c] ss:$12 sps:$4 sm:$0xff]   ;;  %s10110_s27 = scalar_lea.vmem %s9927_s6, %s7628_s11  ;;  %s1871_s5 = sshra.s32 %s1870_s28, 3 }
  0x1e   : > { %v9259_v62 = vld [vmem:[%s11530_s1 + $0x170] sm:$0xff]   ;;  %v9264_v1 = vld [vmem:[%s9936_s19 + $0x60] ss:$12 sps:$4 sm:$0xff]   ;;  %v9265_v2 = vld [vmem:[%s10040_s22 + $0x18] ss:$12 sps:$4 sm:$0xff]   ;;  %s7629_s21 = smul.u32 12, %s1871_s5 }
  0x1f   : > { %v9260_v63 = vld [vmem:[%s9936_s19 + $0x64] ss:$12 sps:$4 sm:$0xff]   ;;  %v9266_v3 = vld [vmem:[%s11530_s1 + $0x1b8] sm:$0xff]   ;;  %v9268_v5 = vld [vmem:[%s11530_s1 + $0x88] sm:$0xff]   ;;  %s4146_s28 = sadd.s32 112, %s9888_s25 }
  0x20   : > { %7648 = vmatpush3.bf16.msra.mxu0 %v9209_v18  ;;  %8506 = vmatpush3.bf16.msra.mxu1 %v9208_v16  ;;  %v9267_v4 = vld [vmem:[%s11530_s1 + $0x178] sm:$0xff]   ;;  %v9271_v7 = vld [vmem:[%s10040_s22 + $0x34] ss:$12 sps:$4 sm:$0xff]   ;;  %v9284_v15 = vld [vmem:[%s11530_s1 + $0x1c8] sm:$0xff]   ;;  %s10217_s4 = scalar_lea.vmem %s9927_s6, %s7629_s21  ;;  %s10567_s5 = sshra.s32 %s4146_s28, 3 }
  0x21   : > { %7649 = vmatprep.subr.bf16.mxu0 %v9211_v19  ;;  %7715 = vmatprep.subr.bf16.mxu1 %v9213_v21  ;;  %v9269_v6 = vld [vmem:[%s9936_s19 + $0x7c] ss:$12 sps:$4 sm:$0xff]   ;;  %v9275_v8 = vld [vmem:[%s11530_s1 + $0x1c0] sm:$0xff]   ;;  %v9277_v12 = vld [vmem:[%s11530_s1 + $0x90] sm:$0xff]  }
  0x22   : > { %v9273_v9 = vld [vmem:[%s9936_s19 + $0x78] ss:$12 sps:$4 sm:$0xff]   ;;  %v9274_v10 = vld [vmem:[%s10040_s22 + $0x30] ss:$12 sps:$4 sm:$0xff]   ;;  %v9278_v13 = vld [vmem:[%s9936_s19 + $0x94] ss:$12 sps:$4 sm:$0xff]  }
  0x23   : > { %8508 = vmatmul.mubr.msk.bf16.vlgmr.msra.gmra.mrb[0].mxu1 %vm612_vm0, %v9212_v20  ;;  %v9276_v11 = vld [vmem:[%s11530_s1 + $0x180] sm:$0xff]   ;;  %v9280_v14 = vld [vmem:[%s10040_s22 + $0x4c] ss:$12 sps:$4 sm:$0xff]   ;;  %v9282_v17 = vld [vmem:[%s9936_s19 + $0x90] ss:$12 sps:$4 sm:$0xff]  }
  0x24   : > { %7650 = vmatpush3.bf16.msra.mxu0 %v9214_v22  ;;  %7716 = vmatpush3.bf16.msra.mxu1 %v9215_v23  ;;  %v9285_v16 = vld [vmem:[%s11530_s1 + $0x188] sm:$0xff]   ;;  %v9288_v20 = vld [vmem:[%s10040_s22 + $0x64] ss:$12 sps:$4 sm:$0xff]   ;;  %v9292_v21 = vld [vmem:[%s11530_s1 + $0x98] sm:$0xff]  }
  0x25   : > { %7651 = vmatprep.subr.bf16.mxu0 %v9216_v24  ;;  %7717 = vmatprep.subr.bf16.mxu1 %v9217_v25  ;;  %v9283_v18 = vld [vmem:[%s10040_s22 + $0x48] ss:$12 sps:$4 sm:$0xff]   ;;  %v9286_v19 = vld [vmem:[%s9936_s19 + $0xac] ss:$12 sps:$4 sm:$0xff]  }
  0x26   : > { %8511 = vmatprep.mubr.msk.bf16.mxu1 %vm612_vm0, %v9223_v30  ;;  %v9293_v22 = vld [vmem:[%s11530_s1 + $0x1d0] sm:$0xff]   ;;  %v9295_v24 = vld [vmem:[%s11530_s1 + $0x1d8] sm:$0xff]  }
  0x27   : > { %v9294_v23 = vld [vmem:[%s11530_s1 + $0x190] sm:$0xff]   ;;  %v9297_v29 = vld [vmem:[%s10040_s22 + $0x7c] ss:$12 sps:$4 sm:$0xff]  }
  0x28   : > { %7652 = vmatpush3.bf16.msra.mxu0 %v9218_v26  ;;  %7718 = vmatpush3.bf16.msra.mxu1 %v9219_v27  ;;  %v9290_v25 = vld [vmem:[%s9936_s19 + $0xa8] ss:$12 sps:$4 sm:$0xff]   ;;  %v9291_v26 = vld [vmem:[%s10040_s22 + $0x60] ss:$12 sps:$4 sm:$0xff]   ;;  %v9296_v27 = vld [vmem:[%s11530_s1 + $0x198] sm:$0xff]   ;;  %s2439_s19 = sadd.s32 64, %s9888_s25 }
  0x29   : > { %7719 = vmatprep.subr.bf16.mxu1 %v9225_v32  ;;  %7793 = vmatprep.subr.bf16.mxu0 %v9235_v41  ;;  %v9301_v30 = vld [vmem:[%s10110_s27 + $0x4] ss:$12 sps:$4 sm:$0xff]   ;;  %v9312_v32 = vld [vmem:[%s11530_s1 + $0xa8] sm:$0xff]   ;;  %s2440_s9 = sshra.s32 %s2439_s19, 3 }
  0x2a   : > { %v9309_v41 = vld [vmem:[%s10110_s27 + $0x18] ss:$12 sps:$4 sm:$0xff]   ;;  %s7630_s20 = smul.u32 12, %s2440_s9  ;;  %s5284_s9 = sadd.s32 144, %s9888_s25 }
  0x2b   : > { %670 = vmatmul.mubr.bf16.vlgmr.msra.gmra.mrb[0].mxu0 %v9220_v28  ;;  %8512 = vmatmul.mubr.msk.bf16.gmra.mrb[4].mxu1 %vm612_vm0, %v9224_v31  ;;  %v9303_v28 = vld [vmem:[%s11530_s1 + $0xa0] sm:$0xff]   ;;  %v9310_v31 = vld [vmem:[%s11530_s1 + $0x250] sm:$0xff]  }
  0x2c   : > { %7720 = vmatpush3.bf16.msra.mxu1 %v9226_v33  ;;  %677 = vmatprep.mubr.bf16.mxu0 %v9229_v36  ;;  %v9299_v33 = vld [vmem:[%s10110_s27] ss:$12 sps:$4 sm:$0xff]   ;;  %v9306_v36 = vld [vmem:[%s10110_s27 + $0x1c] ss:$12 sps:$4 sm:$0xff]   ;;  %s10336_s8 = scalar_lea.vmem %s9927_s6, %s7630_s20 }
  0x2d   : > { %7721 = vmatprep.subr.bf16.mxu1 %v9227_v34  ;;  %8515 = vmatprep.mubr.msk.bf16.mxu1 %vm612_vm0, %v9231_v37  ;;  %v9302_v34 = vld [vmem:[%s10040_s22 + $0x78] ss:$12 sps:$4 sm:$0xff]   ;;  %v9311_v37 = vld [vmem:[%s11530_s1 + $0x210] sm:$0xff]  }
  0x2e   : > { %7794 = vmatpush3.bf16.msra.mxu0 %v9237_v43  ;;  %v9327_v43 = vld [vmem:[%s11530_s1 + $0x260] sm:$0xff]  }
  0x2f   : > { %7795 = vmatprep.subr.bf16.mxu0 %v9246_v51  ;;  %v9321_v51 = vld [vmem:[%s10040_s22 + $0x8] ss:$12 sps:$4 sm:$0xff]  }
  0x30   : > { %7722 = vmatpush3.bf16.msra.mxu1 %v9228_v35  ;;  %v9304_v35 = vld [vmem:[%s10040_s22 + $0x94] ss:$12 sps:$4 sm:$0xff]  }
  0x31   : > { %7723 = vmatprep.subr.bf16.mxu1 %v9234_v40  ;;  %v9308_v40 = vld [vmem:[%s10040_s22 + $0x90] ss:$12 sps:$4 sm:$0xff]  }
  0x32   : > { %7796 = vmatpush3.bf16.msra.mxu0 %v9248_v53  ;;  %v9344_v53 = vld [vmem:[%s11530_s1 + $0x270] sm:$0xff]  }
  0x33   : > { %678 = vmatmul.mubr.bf16.gmra.mrb[4].mxu0 %v9232_v38  ;;  %8516 = vmatmul.mubr.msk.bf16.gmra.mrb[8].mxu1 %vm612_vm0, %v9233_v39  ;;  %v9319_v38 = vld [vmem:[%s11530_s1 + $0x258] sm:$0xff]  }
  0x34   : > { %7724 = vmatpush3.bf16.msra.mxu1 %v9236_v42  ;;  %685 = vmatprep.mubr.bf16.mxu0 %v9240_v46  ;;  %v9320_v39 = vld [vmem:[%s11530_s1 + $0x218] sm:$0xff]   ;;  %v9326_v42 = vld [vmem:[%s11530_s1 + $0x1e0] sm:$0xff]  }
  0x35   : > { %7725 = vmatprep.subr.bf16.mxu1 %v9238_v44  ;;  %8519 = vmatprep.mubr.msk.bf16.mxu1 %vm612_vm0, %v9242_v47  ;;  %v9313_v44 = vld [vmem:[%s10040_s22 + $0xac] ss:$12 sps:$4 sm:$0xff]   ;;  %v9328_v46 = vld [vmem:[%s11530_s1 + $0x220] sm:$0xff]  }
  0x36   : > { %7797 = vmatprep.subr.bf16.mxu0 %v9258_v61  ;;  %v9335_v47 = vld [vmem:[%s11530_s1 + $0x268] sm:$0xff]   ;;  %v9353_v61 = vld [vmem:[%s11530_s1 + $0x238] sm:$0xff]  }
  0x37   : > { %7798 = vmatpush3.bf16.msra.mxu0 %v9259_v62  ;;  %v9333_v62 = vld [vmem:[%s10040_s22 + $0x50] ss:$12 sps:$4 sm:$0xff]  }
  0x38   : > { %7726 = vmatpush3.bf16.msra.mxu1 %v9239_v45  ;;  %7799 = vmatprep.subr.bf16.mxu0 %v9266_v3  ;;  %v9315_v45 = vld [vmem:[%s10110_s27 + $0x34] ss:$12 sps:$4 sm:$0xff]  }
  0x39   : > { %7727 = vmatprep.subr.bf16.mxu1 %v9245_v50  ;;  %v9318_v50 = vld [vmem:[%s10110_s27 + $0x30] ss:$12 sps:$4 sm:$0xff]   ;;  %v9360_v3 = vld [vmem:[%s11530_s1 + $0x280] sm:$0xff]  }
  0x3b   : > { %686 = vmatmul.mubr.bf16.gmra.mrb[8].mxu0 %v9243_v48  ;;  %8520 = vmatmul.mubr.msk.bf16.gmra.mrb[12].mxu1 %vm612_vm0, %v9244_v49  ;;  %v9317_v48 = vld [vmem:[%s10040_s22 + $0xa8] ss:$12 sps:$4 sm:$0xff]  }
  0x3c   : > { %7728 = vmatpush3.bf16.msra.mxu1 %v9247_v52  ;;  %693 = vmatprep.mubr.bf16.mxu0 %v9251_v56  ;;  %v9336_v49 = vld [vmem:[%s11530_s1 + $0x228] sm:$0xff]  }
  0x3d   : > { %7729 = vmatprep.subr.bf16.mxu1 %v9249_v54  ;;  %1139 = vmatprep.mubr.bf16.mxu1 %v9255_v58  ;;  %v9322_v52 = vld [vmem:[%s10110_s27 + $0x4c] ss:$12 sps:$4 sm:$0xff]   ;;  %v9345_v54 = vld [vmem:[%s11530_s1 + $0x230] sm:$0xff]  }
  0x3e   : > { %7800 = vmatpush3.bf16.msra.mxu0 %v9267_v4  ;;  %v9325_v56 = vld [vmem:[%s10110_s27 + $0x48] ss:$12 sps:$4 sm:$0xff]   ;;  %v9343_v4 = vld [vmem:[%s11530_s1 + $0x1f8] sm:$0xff]  }
  0x3f   : > { %7801 = vmatprep.subr.bf16.mxu0 %v9275_v8  ;;  %v9329_v58 = vld [vmem:[%s11530_s1 + $0x1e8] sm:$0xff]   ;;  %v9342_v8 = vld [vmem:[%s10110_s27 + $0x78] ss:$12 sps:$4 sm:$0xff]  }
  0x40   : > { %7730 = vmatpush3.bf16.msra.mxu1 %v9250_v55  ;;  %v9324_v55 = vld [vmem:[%s10040_s22 + $0x20] ss:$12 sps:$4 sm:$0xff]  }
  0x41   : > { %8523 = vmatprep.subr.bf16.mxu1 %v9257_v60 }
  0x42   : > { %7802 = vmatpush3.bf16.msra.mxu0 %v9276_v11  ;;  %v9347_v11 = vld [vmem:[%s10040_s22 + $0x98] ss:$12 sps:$4 sm:$0xff]  }
  0x43   : > { %694 = vmatmul.mubr.bf16.gmra.mrb[12].mxu0 %v9256_v59  ;;  %1140 = vmatmul.mubr.bf16.vlgmr.msra.gmra.mrb[16].mxu1 %v9253_v57  ;;  %v9330_v57 = vld [vmem:[%s10040_s22 + $0x38] ss:$12 sps:$4 sm:$0xff]  }
  0x44   : > { %8524 = vmatpush3.bf16.msra.mxu1 %v9257_v60  ;;  %701 = vmatprep.mubr.bf16.mxu0 %v9260_v63  ;;  %v9331_v59 = vld [vmem:[%s10110_s27 + $0x64] ss:$12 sps:$4 sm:$0xff]   ;;  %v9352_v60 = vld [vmem:[%s11530_s1 + $0x278] sm:$0xff]  }
  0x45   : > { %1147 = vmatprep.mubr.bf16.mxu1 %v9262_v0  ;;  %8525 = vmatprep.subr.bf16.mxu1 %v9268_v5  ;;  %v9337_v63 = vld [vmem:[%s11530_s1 + $0x1f0] sm:$0xff]   ;;  %v9334_v0 = vld [vmem:[%s10110_s27 + $0x60] ss:$12 sps:$4 sm:$0xff]  }
  0x46   : > { %7803 = vmatprep.subr.bf16.mxu0 %v9284_v15  ;;  %v9351_v15 = vld [vmem:[%s10110_s27 + $0x90] ss:$12 sps:$4 sm:$0xff]  }
  0x47   : > { %7804 = vmatpush3.bf16.msra.mxu0 %v9285_v16  ;;  %v9355_v16 = vld [vmem:[%s10110_s27 + $0xac] ss:$12 sps:$4 sm:$0xff]  }
  0x48   : > { %8526 = vmatpush3.bf16.msra.mxu1 %v9268_v5  ;;  %7805 = vmatprep.subr.bf16.mxu0 %v9293_v22  ;;  %v9362_v5 = vld [vmem:[%s11530_s1 + $0x240] sm:$0xff]   ;;  %v9365_v22 = vld [vmem:[%s11530_s1 + $0x298] sm:$0xff]  }
  0x49   : > { %8527 = vmatprep.subr.bf16.mxu1 %v9277_v12 }
  0x4b   : > { %702 = vmatmul.mubr.bf16.gmra.mrb[16].mxu0 %v9264_v1  ;;  %1148 = vmatmul.mubr.bf16.gmra.mrb[20].mxu1 %v9265_v2  ;;  %v9338_v1 = vld [vmem:[%s10040_s22 + $0x68] ss:$12 sps:$4 sm:$0xff]  }
  0x4c   : > { %709 = vmatprep.mubr.bf16.mxu0 %v9269_v6  ;;  %1155 = vmatprep.mubr.bf16.mxu1 %v9271_v7  ;;  %v9339_v2 = vld [vmem:[%s10110_s27 + $0x7c] ss:$12 sps:$4 sm:$0xff]   ;;  %v9341_v7 = vld [vmem:[%s10040_s22 + $0x80] ss:$12 sps:$4 sm:$0xff]  }
  0x4d   : > { %8528 = vmatpush3.bf16.msra.mxu1 %v9277_v12  ;;  %7806 = vmatpush3.bf16.msra.mxu0 %v9294_v23  ;;  %v9363_v6 = vld [vmem:[%s11530_s1 + $0x288] sm:$0xff]   ;;  %v9348_v12 = vld [vmem:[%s10110_s27 + $0x94] ss:$12 sps:$4 sm:$0xff]   ;;  %v9366_v23 = vld [vmem:[%s10110_s27 + $0x38] ss:$12 sps:$4 sm:$0xff]  }
  0x4e   : > { %8529 = vmatprep.subr.bf16.mxu1 %v9292_v21  ;;  %7807 = vmatprep.subr.bf16.mxu0 %v9295_v24  ;;  %v9369_v24 = vld [vmem:[%s10217_s4 + $0x4] ss:$12 sps:$4 sm:$0xff]  }
  0x51   : > { %8530 = vmatpush3.bf16.msra.mxu1 %v9292_v21  ;;  %7808 = vmatpush3.bf16.msra.mxu0 %v9296_v27  ;;  %v9359_v21 = vld [vmem:[%s10110_s27 + $0x20] ss:$12 sps:$4 sm:$0xff]   ;;  %v9370_v27 = vld [vmem:[%s10110_s27 + $0x50] ss:$12 sps:$4 sm:$0xff]  }
  0x52   : > { %8531 = vmatprep.subr.bf16.mxu1 %v9303_v28  ;;  %7871 = vmatprep.subr.bf16.mxu0 %v9310_v31  ;;  %v9379_v31 = vld [vmem:[%s11530_s1 + $0x370] sm:$0xff]  }
  0x53   : > { %710 = vmatmul.mubr.bf16.gmra.mrb[20].mxu0 %v9273_v9  ;;  %1156 = vmatmul.mubr.bf16.gmra.mrb[24].mxu1 %v9274_v10  ;;  %v9346_v9 = vld [vmem:[%s11530_s1 + $0x200] sm:$0xff]   ;;  %v9364_v10 = vld [vmem:[%s11530_s1 + $0x248] sm:$0xff]  }
  0x54   : > { %717 = vmatprep.mubr.bf16.mxu0 %v9278_v13  ;;  %1163 = vmatprep.mubr.bf16.mxu1 %v9280_v14  ;;  %v9354_v13 = vld [vmem:[%s11530_s1 + $0x208] sm:$0xff]   ;;  %v9350_v14 = vld [vmem:[%s10040_s22 + $0xb0] ss:$12 sps:$4 sm:$0xff]  }
  0x55   : > { %8532 = vmatpush3.bf16.msra.mxu1 %v9303_v28  ;;  %v9372_v28 = vld [vmem:[%s10110_s27 + $0x68] ss:$12 sps:$4 sm:$0xff]  }
  0x56   : > { %8533 = vmatprep.subr.bf16.mxu1 %v9312_v32 }
  0x59   : > { %8534 = vmatpush3.bf16.msra.mxu1 %v9312_v32  ;;  %v9386_v32 = vld [vmem:[%s11530_s1 + $0x3b8] sm:$0xff]  }
  0x5a   : > { %8551 = vmatprep.subr.bf16.mxu1 %v9326_v42 }
  0x5b   : > { %718 = vmatmul.mubr.bf16.gmra.mrb[24].mxu0 %v9282_v17  ;;  %1164 = vmatmul.mubr.bf16.gmra.mrb[28].mxu1 %v9283_v18  ;;  %v9361_v17 = vld [vmem:[%s11530_s1 + $0x290] sm:$0xff]  }
  0x5c   : > { %725 = vmatprep.mubr.bf16.mxu0 %v9286_v19  ;;  %1171 = vmatprep.mubr.bf16.mxu1 %v9288_v20  ;;  %v9378_v18 = vld [vmem:[%s11530_s1 + $0x3b0] sm:$0xff]  }
  0x5d   : > { %v9357_v19 = vld [vmem:[%s10110_s27 + $0x8] ss:$12 sps:$4 sm:$0xff]  }
  0x5e   : > { %v9358_v20 = vld [vmem:[%s10110_s27 + $0xa8] ss:$12 sps:$4 sm:$0xff]  }
  0x63   : > { %726 = vmatmul.mubr.bf16.gmra.mrb[28].mxu0 %v9290_v25  ;;  %1172 = vmatmul.mubr.bf16.gmra.mrb[32].mxu1 %v9291_v26  ;;  %v9367_v25 = vld [vmem:[%s10217_s4] ss:$12 sps:$4 sm:$0xff]  }
  0x64   : > { %1179 = vmatprep.mubr.bf16.mxu1 %v9297_v29  ;;  %1692 = vmatprep.mubr.bf16.mxu0 %v9301_v30  ;;  %v9371_v26 = vld [vmem:[%s11530_s1 + $0x2a0] sm:$0xff]   ;;  %v9373_v29 = vld [vmem:[%s10217_s4 + $0x1c] ss:$12 sps:$4 sm:$0xff]  }
  0x65   : > { %v9377_v30 = vld [vmem:[%s11530_s1 + $0x2a8] sm:$0xff]  }
  0x6b   : > { %1180 = vmatmul.mubr.bf16.gmra.mrb[36].mxu1 %v9302_v34  ;;  %1693 = vmatmul.mubr.bf16.vlgmr.msra.gmra.mrb[32].mxu0 %v9299_v33  ;;  %v9375_v33 = vld [vmem:[%s10110_s27 + $0x80] ss:$12 sps:$4 sm:$0xff]   ;;  %v9376_v34 = vld [vmem:[%s10217_s4 + $0x18] ss:$12 sps:$4 sm:$0xff]  }
  0x6c   : > { %1187 = vmatprep.mubr.bf16.mxu1 %v9304_v35  ;;  %1700 = vmatprep.mubr.bf16.mxu0 %v9306_v36  ;;  %v9380_v35 = vld [vmem:[%s11530_s1 + $0x2b0] sm:$0xff]   ;;  %v9381_v36 = vld [vmem:[%s10110_s27 + $0x98] ss:$12 sps:$4 sm:$0xff]  }
  0x6d   : > { %7872 = vmatpush3.bf16.msra.mxu0 %v9311_v37  ;;  %v9387_v37 = vld [vmem:[%s11530_s1 + $0x378] sm:$0xff]  }
  0x6e   : > { %7873 = vmatprep.subr.bf16.mxu0 %v9319_v38  ;;  %v9382_v38 = vld [vmem:[%s10217_s4 + $0x34] ss:$12 sps:$4 sm:$0xff]  }
  0x71   : > { %7874 = vmatpush3.bf16.msra.mxu0 %v9320_v39  ;;  %v9388_v39 = vld [vmem:[%s11530_s1 + $0x2b8] sm:$0xff]  }
  0x72   : > { %7875 = vmatprep.subr.bf16.mxu0 %v9327_v43  ;;  %v9384_v43 = vld [vmem:[%s10110_s27 + $0xb0] ss:$12 sps:$4 sm:$0xff]   ;;  %s10329_s27 = sshra.s32 %s3008_s23, 3  ;;  %s7633_s23 = smul.u32 12, %s10567_s5 }
  0x73   : > { %1188 = vmatmul.mubr.bf16.gmra.mrb[40].mxu1 %v9308_v40  ;;  %1701 = vmatmul.mubr.bf16.gmra.mrb[36].mxu0 %v9309_v41  ;;  %v9395_v40 = vld [vmem:[%s11530_s1 + $0x3c0] sm:$0xff]   ;;  %s7631_s21 = smul.u32 12, %s10329_s27 }
  0x74   : > { %1195 = vmatprep.mubr.bf16.mxu1 %v9313_v44  ;;  %1708 = vmatprep.mubr.bf16.mxu0 %v9315_v45  ;;  %v9397_v41 = vld [vmem:[%s11530_s1 + $0x380] sm:$0xff]   ;;  %v9385_v44 = vld [vmem:[%s10217_s4 + $0x30] ss:$12 sps:$4 sm:$0xff]   ;;  %s10606_s27 = scalar_lea.vmem %s9927_s6, %s7633_s23 }
  0x75   : > { %7876 = vmatpush3.bf16.msra.mxu0 %v9328_v46  ;;  %v9394_v45 = vld [vmem:[%s11530_s1 + $0x300] sm:$0xff]   ;;  %v9408_v46 = vld [vmem:[%s11530_s1 + $0x388] sm:$0xff]   ;;  %s10368_s7 = scalar_lea.vmem %s9927_s6, %s7631_s21 }
  0x76   : > { %7877 = vmatprep.subr.bf16.mxu0 %v9335_v47  ;;  %v9389_v47 = vld [vmem:[%s10217_s4 + $0x4c] ss:$12 sps:$4 sm:$0xff]  }
  0x79   : > { %7878 = vmatpush3.bf16.msra.mxu0 %v9336_v49  ;;  %v9417_v49 = vld [vmem:[%s11530_s1 + $0x3d0] sm:$0xff]  }
  0x7a   : > { %7879 = vmatprep.subr.bf16.mxu0 %v9344_v53  ;;  %v9396_v53 = vld [vmem:[%s11530_s1 + $0x2c0] sm:$0xff]  }
  0x7b   : > { %1196 = vmatmul.mubr.bf16.gmra.mrb[44].mxu1 %v9317_v48  ;;  %1709 = vmatmul.mubr.bf16.gmra.mrb[40].mxu0 %v9318_v50  ;;  %v9391_v48 = vld [vmem:[%s10217_s4 + $0x8] ss:$12 sps:$4 sm:$0xff]  }
  0x7c   : > { %8535 = vmatprep.mubr.msk.bf16.mxu1 %vm612_vm0, %v9321_v51  ;;  %1716 = vmatprep.mubr.bf16.mxu0 %v9322_v52  ;;  %v9419_v50 = vld [vmem:[%s11530_s1 + $0x390] sm:$0xff]   ;;  %v9393_v52 = vld [vmem:[%s10217_s4 + $0x20] ss:$12 sps:$4 sm:$0xff]  }
  0x7d   : > { %7880 = vmatpush3.bf16.msra.mxu0 %v9345_v54  ;;  %v9392_v51 = vld [vmem:[%s10217_s4 + $0x48] ss:$12 sps:$4 sm:$0xff]  }
  0x7e   : > { %7881 = vmatprep.subr.bf16.mxu0 %v9352_v60  ;;  %v9398_v54 = vld [vmem:[%s11530_s1 + $0x308] sm:$0xff]   ;;  %v9405_v60 = vld [vmem:[%s11530_s1 + $0x310] sm:$0xff]  }
  0x81   : > { %7882 = vmatpush3.bf16.msra.mxu0 %v9353_v61  ;;  %v9403_v61 = vld [vmem:[%s10217_s4 + $0x60] ss:$12 sps:$4 sm:$0xff]  }
  0x82   : > { %7883 = vmatprep.subr.bf16.mxu0 %v9360_v3  ;;  %v9410_v3 = vld [vmem:[%s11530_s1 + $0x2d8] sm:$0xff]  }
  0x83   : > { %8536 = vmatmul.mubr.msk.bf16.vlgmr.msra.gmra.mrb[0].mxu1 %vm612_vm0, %v9324_v55  ;;  %1717 = vmatmul.mubr.bf16.gmra.mrb[44].mxu0 %v9325_v56  ;;  %v9400_v55 = vld [vmem:[%s10217_s4 + $0x64] ss:$12 sps:$4 sm:$0xff]  }
  0x84   : > { %8552 = vmatpush3.bf16.msra.mxu1 %v9326_v42  ;;  %8539 = vmatprep.mubr.msk.bf16.mxu1 %vm612_vm0, %v9330_v57  ;;  %v9406_v42 = vld [vmem:[%s11530_s1 + $0x3c8] sm:$0xff]   ;;  %v9402_v56 = vld [vmem:[%s10217_s4 + $0x38] ss:$12 sps:$4 sm:$0xff]  }
  0x85   : > { %8553 = vmatprep.subr.bf16.mxu1 %v9329_v58  ;;  %1724 = vmatprep.mubr.bf16.mxu0 %v9331_v59  ;;  %v9428_v57 = vld [vmem:[%s11530_s1 + $0x3d8] sm:$0xff]   ;;  %v9399_v59 = vld [vmem:[%s11530_s1 + $0x2c8] sm:$0xff]  }
  0x86   : > { %7884 = vmatpush3.bf16.msra.mxu0 %v9362_v5  ;;  %v9441_v5 = vld [vmem:[%s11530_s1 + $0x3a0] sm:$0xff]  }
  0x87   : > { %7885 = vmatprep.subr.bf16.mxu0 %v9363_v6  ;;  %v9442_v6 = vld [vmem:[%s11530_s1 + $0x3e8] sm:$0xff]  }
  0x88   : > { %8554 = vmatpush3.bf16.msra.mxu1 %v9329_v58  ;;  %v9430_v58 = vld [vmem:[%s11530_s1 + $0x398] sm:$0xff]  }
  0x89   : > { %8555 = vmatprep.subr.bf16.mxu1 %v9337_v63 }
  0x8a   : > { %7886 = vmatpush3.bf16.msra.mxu0 %v9364_v10  ;;  %v9418_v10 = vld [vmem:[%s11530_s1 + $0x2e0] sm:$0xff]  }
  0x8b   : > { %8540 = vmatmul.mubr.msk.bf16.gmra.mrb[4].mxu1 %vm612_vm0, %v9333_v62  ;;  %1725 = vmatmul.mubr.bf16.gmra.mrb[48].mxu0 %v9334_v0  ;;  %v9404_v62 = vld [vmem:[%s10217_s4 + $0x50] ss:$12 sps:$4 sm:$0xff]  }
  0x8c   : > { %8556 = vmatpush3.bf16.msra.mxu1 %v9337_v63  ;;  %8543 = vmatprep.mubr.msk.bf16.mxu1 %vm612_vm0, %v9338_v1  ;;  %v9407_v63 = vld [vmem:[%s11530_s1 + $0x2d0] sm:$0xff]   ;;  %v9409_v0 = vld [vmem:[%s11530_s1 + $0x318] sm:$0xff]  }
  0x8d   : > { %1732 = vmatprep.mubr.bf16.mxu0 %v9339_v2  ;;  %8557 = vmatprep.subr.bf16.mxu1 %v9343_v4  ;;  %v9411_v1 = vld [vmem:[%s10217_s4 + $0x7c] ss:$12 sps:$4 sm:$0xff]  }
  0x8e   : > { %8027 = vmatprep.subr.bf16.mxu0 %v9378_v18  ;;  %v9413_v2 = vld [vmem:[%s10217_s4 + $0x68] ss:$12 sps:$4 sm:$0xff]   ;;  %v9425_v18 = vld [vmem:[%s10217_s4 + $0x90] ss:$12 sps:$4 sm:$0xff]  }
  0x90   : > { %8558 = vmatpush3.bf16.msra.mxu1 %v9343_v4  ;;  %v9440_v4 = vld [vmem:[%s11530_s1 + $0x3e0] sm:$0xff]  }
  0x91   : > { %8559 = vmatprep.subr.bf16.mxu1 %v9346_v9 }
  0x93   : > { %8544 = vmatmul.mubr.msk.bf16.gmra.mrb[8].mxu1 %vm612_vm0, %v9341_v7  ;;  %1733 = vmatmul.mubr.bf16.gmra.mrb[52].mxu0 %v9342_v8  ;;  %v9414_v7 = vld [vmem:[%s10217_s4 + $0x78] ss:$12 sps:$4 sm:$0xff]  }
  0x94   : > { %8547 = vmatprep.mubr.msk.bf16.mxu1 %vm612_vm0, %v9347_v11  ;;  %1740 = vmatprep.mubr.bf16.mxu0 %v9348_v12  ;;  %v9416_v8 = vld [vmem:[%s11530_s1 + $0x320] sm:$0xff]   ;;  %v9420_v11 = vld [vmem:[%s11530_s1 + $0x328] sm:$0xff]  }
  0x95   : > { %8560 = vmatpush3.bf16.msra.mxu1 %v9346_v9  ;;  %v9415_v9 = vld [vmem:[%s10217_s4 + $0x80] ss:$12 sps:$4 sm:$0xff]  }
  0x96   : > { %8561 = vmatprep.subr.bf16.mxu1 %v9354_v13  ;;  %v9422_v12 = vld [vmem:[%s10217_s4 + $0x94] ss:$12 sps:$4 sm:$0xff]  }
  0x99   : > { %8562 = vmatpush3.bf16.msra.mxu1 %v9354_v13  ;;  %v9424_v13 = vld [vmem:[%s10217_s4 + $0x98] ss:$12 sps:$4 sm:$0xff]  }
  0x9a   : > { %8579 = vmatprep.subr.bf16.mxu1 %v9361_v17 }
  0x9b   : > { %8548 = vmatmul.mubr.msk.bf16.gmra.mrb[12].mxu1 %vm612_vm0, %v9350_v14  ;;  %1741 = vmatmul.mubr.bf16.gmra.mrb[56].mxu0 %v9351_v15  ;;  %v9443_v14 = vld [vmem:[%s11530_s1 + $0x3a8] sm:$0xff]  }
  0x9c   : > { %1748 = vmatprep.mubr.bf16.mxu0 %v9355_v16  ;;  %8563 = vmatprep.mubr.msk.bf16.mxu1 %vm612_vm0, %v9357_v19  ;;  %v9421_v15 = vld [vmem:[%s11530_s1 + $0x2e8] sm:$0xff]   ;;  %v9457_v16 = vld [vmem:[%s11530_s1 + $0x460] sm:$0xff]   ;;  %v9426_v19 = vld [vmem:[%s10217_s4 + $0xb0] ss:$12 sps:$4 sm:$0xff]  }
  0xa3   : > { %1749 = vmatmul.mubr.bf16.gmra.mrb[60].mxu0 %v9358_v20  ;;  %8564 = vmatmul.mubr.msk.bf16.vlgmr.msra.gmra.mrb[0].mxu1 %vm612_vm0, %v9359_v21  ;;  %v9429_v20 = vld [vmem:[%s11530_s1 + $0x2f0] sm:$0xff]   ;;  %v9431_v21 = vld [vmem:[%s11530_s1 + $0x338] sm:$0xff]  }
  0xa4   : > { %8580 = vmatpush3.bf16.msra.mxu1 %v9361_v17  ;;  %8567 = vmatprep.mubr.msk.bf16.mxu1 %vm612_vm0, %v9366_v23  ;;  %v9427_v17 = vld [vmem:[%s11530_s1 + $0x330] sm:$0xff]  }
  0xa5   : > { %8581 = vmatprep.subr.bf16.mxu1 %v9365_v22  ;;  %2261 = vmatprep.mubr.bf16.mxu0 %v9369_v24  ;;  %v9437_v23 = vld [vmem:[%s10336_s8 + $0x4] ss:$12 sps:$4 sm:$0xff]   ;;  %v9432_v24 = vld [vmem:[%s11530_s1 + $0x2f8] sm:$0xff]  }
  0xa8   : > { %8582 = vmatpush3.bf16.msra.mxu1 %v9365_v22  ;;  %v9433_v22 = vld [vmem:[%s10217_s4 + $0xac] ss:$12 sps:$4 sm:$0xff]  }
  0xa9   : > { %8583 = vmatprep.subr.bf16.mxu1 %v9371_v26 }
  0xab   : > { %8568 = vmatmul.mubr.msk.bf16.gmra.mrb[4].mxu1 %vm612_vm0, %v9370_v27  ;;  %2262 = vmatmul.mubr.bf16.vlgmr.msra.gmra.mrb[64].mxu0 %v9367_v25  ;;  %v9439_v25 = vld [vmem:[%s11530_s1 + $0x340] sm:$0xff]   ;;  %v9438_v27 = vld [vmem:[%s10217_s4 + $0xa8] ss:$12 sps:$4 sm:$0xff]  }
  0xac   : > { %8584 = vmatpush3.bf16.msra.mxu1 %v9371_v26  ;;  %8571 = vmatprep.mubr.msk.bf16.mxu1 %vm612_vm0, %v9372_v28  ;;  %v9435_v26 = vld [vmem:[%s10336_s8] ss:$12 sps:$4 sm:$0xff]   ;;  %v9444_v28 = vld [vmem:[%s10336_s8 + $0x1c] ss:$12 sps:$4 sm:$0xff]  }
  0xad   : > { %2269 = vmatprep.mubr.bf16.mxu0 %v9373_v29  ;;  %8585 = vmatprep.subr.bf16.mxu1 %v9377_v30  ;;  %v9448_v29 = vld [vmem:[%s10368_s7 + $0x4] ss:$12 sps:$4 sm:$0xff]  }
  0xae   : > { %8028 = vmatpush3.bf16.msra.mxu0 %v9379_v31  ;;  %v9459_v31 = vld [vmem:[%s11530_s1 + $0x350] sm:$0xff]  }
  0xaf   : > { %8029 = vmatprep.subr.bf16.mxu0 %v9386_v32  ;;  %v9446_v32 = vld [vmem:[%s10368_s7] ss:$12 sps:$4 sm:$0xff]  }
  0xb0   : > { %8586 = vmatpush3.bf16.msra.mxu1 %v9377_v30  ;;  %v9450_v30 = vld [vmem:[%s11530_s1 + $0x348] sm:$0xff]  }
  0xb1   : > { %8587 = vmatprep.subr.bf16.mxu1 %v9380_v35 }
  0xb2   : > { %8030 = vmatpush3.bf16.msra.mxu0 %v9387_v37  ;;  %v9466_v37 = vld [vmem:[%s11530_s1 + $0x468] sm:$0xff]  }
  0xb3   : > { %8572 = vmatmul.mubr.msk.bf16.gmra.mrb[8].mxu1 %vm612_vm0, %v9375_v33  ;;  %2270 = vmatmul.mubr.bf16.gmra.mrb[68].mxu0 %v9376_v34  ;;  %v9449_v33 = vld [vmem:[%s10336_s8 + $0x18] ss:$12 sps:$4 sm:$0xff]   ;;  %v9451_v34 = vld [vmem:[%s10336_s8 + $0x34] ss:$12 sps:$4 sm:$0xff]  }
  0xb4   : > { %8575 = vmatprep.mubr.msk.bf16.mxu1 %vm612_vm0, %v9381_v36  ;;  %2277 = vmatprep.mubr.bf16.mxu0 %v9382_v38  ;;  %v9458_v36 = vld [vmem:[%s11530_s1 + $0x420] sm:$0xff]   ;;  %v9473_v38 = vld [vmem:[%s11530_s1 + $0x358] sm:$0xff]  }
  0xb5   : > { %8588 = vmatpush3.bf16.msra.mxu1 %v9380_v35  ;;  %8031 = vmatprep.subr.bf16.mxu0 %v9395_v40  ;;  %v9453_v35 = vld [vmem:[%s10368_s7 + $0x1c] ss:$12 sps:$4 sm:$0xff]   ;;  %v9456_v40 = vld [vmem:[%s10368_s7 + $0x18] ss:$12 sps:$4 sm:$0xff]  }
  0xb6   : > { %8589 = vmatprep.subr.bf16.mxu1 %v9388_v39  ;;  %8032 = vmatpush3.bf16.msra.mxu0 %v9397_v41  ;;  %v9467_v41 = vld [vmem:[%s11530_s1 + $0x428] sm:$0xff]  }
  0xb7   : > { %8033 = vmatprep.subr.bf16.mxu0 %v9406_v42  ;;  %v9460_v42 = vld [vmem:[%s10336_s8 + $0x4c] ss:$12 sps:$4 sm:$0xff]  }
  0xb9   : > { %8590 = vmatpush3.bf16.msra.mxu1 %v9388_v39  ;;  %v9455_v39 = vld [vmem:[%s10336_s8 + $0x30] ss:$12 sps:$4 sm:$0xff]  }
  0xba   : > { %7949 = vmatprep.subr.bf16.mxu1 %v9394_v45  ;;  %8034 = vmatpush3.bf16.msra.mxu0 %v9408_v46  ;;  %v9462_v45 = vld [vmem:[%s10368_s7 + $0x34] ss:$12 sps:$4 sm:$0xff]  }
  0xbb   : > { %8576 = vmatmul.mubr.msk.bf16.gmra.mrb[12].mxu1 %vm612_vm0, %v9384_v43  ;;  %2278 = vmatmul.mubr.bf16.gmra.mrb[72].mxu0 %v9385_v44  ;;  %v9475_v43 = vld [vmem:[%s11530_s1 + $0x470] sm:$0xff]   ;;  %v9485_v44 = vld [vmem:[%s11530_s1 + $0x360] sm:$0xff]  }
  0xbc   : > { %2285 = vmatprep.mubr.bf16.mxu0 %v9389_v47  ;;  %8591 = vmatprep.mubr.msk.bf16.mxu1 %vm612_vm0, %v9391_v48  ;;  %v9476_v46 = vld [vmem:[%s11530_s1 + $0x430] sm:$0xff]   ;;  %v9483_v47 = vld [vmem:[%s11530_s1 + $0x478] sm:$0xff]   ;;  %v9494_v48 = vld [vmem:[%s11530_s1 + $0x368] sm:$0xff]  }
  0xbd   : > { %8035 = vmatprep.subr.bf16.mxu0 %v9417_v49  ;;  %v9484_v49 = vld [vmem:[%s11530_s1 + $0x438] sm:$0xff]  }
  0xbe   : > { %8036 = vmatpush3.bf16.msra.mxu0 %v9419_v50  ;;  %v9464_v50 = vld [vmem:[%s10336_s8 + $0x48] ss:$12 sps:$4 sm:$0xff]  }
  0xbf   : > { %8037 = vmatprep.subr.bf16.mxu0 %v9428_v57  ;;  %v9501_v57 = vld [vmem:[%s11530_s1 + $0x488] sm:$0xff]  }
  0xc2   : > { %8038 = vmatpush3.bf16.msra.mxu0 %v9430_v58  ;;  %v9472_v58 = vld [vmem:[%s10336_s8 + $0x60] ss:$12 sps:$4 sm:$0xff]  }
  0xc3   : > { %2286 = vmatmul.mubr.bf16.gmra.mrb[76].mxu0 %v9392_v51  ;;  %8592 = vmatmul.mubr.msk.bf16.vlgmr.msra.gmra.mrb[0].mxu1 %vm612_vm0, %v9393_v52  ;;  %v9465_v51 = vld [vmem:[%s10368_s7 + $0x30] ss:$12 sps:$4 sm:$0xff]   ;;  %v9492_v52 = vld [vmem:[%s11530_s1 + $0x480] sm:$0xff]  }
  0xc4   : > { %7950 = vmatpush3.bf16.msra.mxu1 %v9396_v53  ;;  %2293 = vmatprep.mubr.bf16.mxu0 %v9400_v55  ;;  %v10467_v53 = vld [vmem:[%s11530_s1 + $0x3f0] sm:$0xff]   ;;  %v9470_v55 = vld [vmem:[%s10368_s7 + $0x4c] ss:$12 sps:$4 sm:$0xff]  }
  0xc5   : > { %7951 = vmatprep.subr.bf16.mxu1 %v9398_v54  ;;  %8595 = vmatprep.mubr.msk.bf16.mxu1 %vm612_vm0, %v9402_v56  ;;  %v9468_v54 = vld [vmem:[%s10336_s8 + $0x64] ss:$12 sps:$4 sm:$0xff]  }
  0xc6   : > { %8039 = vmatprep.subr.bf16.mxu0 %v9440_v4  ;;  %v9493_v56 = vld [vmem:[%s11530_s1 + $0x440] sm:$0xff]  }
  0xc7   : > { %8040 = vmatpush3.bf16.msra.mxu0 %v9441_v5  ;;  %v9510_v5 = vld [vmem:[%s11530_s1 + $0x450] sm:$0xff]  }
  0xc8   : > { %7952 = vmatpush3.bf16.msra.mxu1 %v9399_v59  ;;  %8041 = vmatprep.subr.bf16.mxu0 %v9442_v6  ;;  %v9474_v59 = vld [vmem:[%s10368_s7 + $0x48] ss:$12 sps:$4 sm:$0xff]  }
  0xc9   : > { %7953 = vmatprep.subr.bf16.mxu1 %v9405_v60  ;;  %v9502_v60 = vld [vmem:[%s11530_s1 + $0x448] sm:$0xff]  }
  0xcb   : > { %2294 = vmatmul.mubr.bf16.gmra.mrb[80].mxu0 %v9403_v61  ;;  %8596 = vmatmul.mubr.msk.bf16.gmra.mrb[4].mxu1 %vm612_vm0, %v9404_v62  ;;  %v9509_v62 = vld [vmem:[%s11530_s1 + $0x490] sm:$0xff]  }
  0xcc   : > { %7954 = vmatpush3.bf16.msra.mxu1 %v9407_v63  ;;  %2301 = vmatprep.mubr.bf16.mxu0 %v9411_v1 }
  0xcd   : > { %7955 = vmatprep.subr.bf16.mxu1 %v9409_v0  ;;  %8599 = vmatprep.mubr.msk.bf16.mxu1 %vm612_vm0, %v9413_v2  ;;  %v9477_v0 = vld [vmem:[%s10336_s8 + $0x7c] ss:$12 sps:$4 sm:$0xff]  }
  0xce   : > { %8042 = vmatpush3.bf16.msra.mxu0 %v9443_v14  ;;  %v9486_v14 = vld [vmem:[%s10336_s8 + $0x94] ss:$12 sps:$4 sm:$0xff]  }
  0xcf   : > { %8105 = vmatprep.subr.bf16.mxu0 %v9457_v16 }
  0xd0   : > { %7956 = vmatpush3.bf16.msra.mxu1 %v9410_v3  ;;  %v9479_v3 = vld [vmem:[%s10368_s7 + $0x64] ss:$12 sps:$4 sm:$0xff]  }
  0xd1   : > { %7957 = vmatprep.subr.bf16.mxu1 %v9416_v8  ;;  %v9481_v8 = vld [vmem:[%s10336_s8 + $0x78] ss:$12 sps:$4 sm:$0xff]  }
  0xd3   : > { %2302 = vmatmul.mubr.bf16.gmra.mrb[84].mxu0 %v9414_v7  ;;  %8600 = vmatmul.mubr.msk.bf16.gmra.mrb[8].mxu1 %vm612_vm0, %v9415_v9  ;;  %v9511_v7 = vld [vmem:[%s11530_s1 + $0x498] sm:$0xff]   ;;  %v9482_v9 = vld [vmem:[%s10368_s7 + $0x60] ss:$12 sps:$4 sm:$0xff]  }
  0xd4   : > { %7958 = vmatpush3.bf16.msra.mxu1 %v9418_v10  ;;  %2309 = vmatprep.mubr.bf16.mxu0 %v9422_v12  ;;  %v9512_v10 = vld [vmem:[%s11530_s1 + $0x458] sm:$0xff]   ;;  %v9526_v12 = vld [vmem:[%s11530_s1 + $0x510] sm:$0xff]  }
  0xd5   : > { %7959 = vmatprep.subr.bf16.mxu1 %v9420_v11  ;;  %8603 = vmatprep.mubr.msk.bf16.mxu1 %vm612_vm0, %v9424_v13 }
  0xd8   : > { %7960 = vmatpush3.bf16.msra.mxu1 %v9421_v15 }
  0xd9   : > { %7961 = vmatprep.subr.bf16.mxu1 %v9427_v17  ;;  %v9488_v17 = vld [vmem:[%s10368_s7 + $0x7c] ss:$12 sps:$4 sm:$0xff]  }
  0xdb   : > { %2310 = vmatmul.mubr.bf16.gmra.mrb[88].mxu0 %v9425_v18  ;;  %8604 = vmatmul.mubr.msk.bf16.gmra.mrb[12].mxu1 %vm612_vm0, %v9426_v19 }
  0xdc   : > { %7962 = vmatpush3.bf16.msra.mxu1 %v9429_v20  ;;  %2317 = vmatprep.mubr.bf16.mxu0 %v9433_v22  ;;  %v9490_v20 = vld [vmem:[%s10336_s8 + $0x90] ss:$12 sps:$4 sm:$0xff]  }
  0xdd   : > { %7963 = vmatprep.subr.bf16.mxu1 %v9431_v21  ;;  %2830 = vmatprep.mubr.bf16.mxu1 %v9437_v23  ;;  %v9491_v21 = vld [vmem:[%s10368_s7 + $0x78] ss:$12 sps:$4 sm:$0xff]  }
  0xe0   : > { %7964 = vmatpush3.bf16.msra.mxu1 %v9432_v24  ;;  %v9495_v24 = vld [vmem:[%s10336_s8 + $0xac] ss:$12 sps:$4 sm:$0xff]  }
  0xe1   : > { %8607 = vmatprep.subr.bf16.mxu1 %v9439_v25 }
  0xe3   : > { %2318 = vmatmul.mubr.bf16.gmra.mrb[92].mxu0 %v9438_v27  ;;  %2831 = vmatmul.mubr.bf16.vlgmr.msra.gmra.mrb[48].mxu1 %v9435_v26 }
  0xe4   : > { %8608 = vmatpush3.bf16.msra.mxu1 %v9439_v25  ;;  %2838 = vmatprep.mubr.bf16.mxu1 %v9444_v28  ;;  %v9497_v25 = vld [vmem:[%s10368_s7 + $0x94] ss:$12 sps:$4 sm:$0xff]  }
  0xe5   : > { %3399 = vmatprep.mubr.bf16.mxu0 %v9448_v29  ;;  %8609 = vmatprep.subr.bf16.mxu1 %v9450_v30 }
  0xe8   : > { %8610 = vmatpush3.bf16.msra.mxu1 %v9450_v30  ;;  %v9499_v30 = vld [vmem:[%s10336_s8 + $0xa8] ss:$12 sps:$4 sm:$0xff]  }
  0xe9   : > { %8611 = vmatprep.subr.bf16.mxu1 %v9459_v31 }
  0xeb   : > { %2839 = vmatmul.mubr.bf16.gmra.mrb[52].mxu1 %v9449_v33  ;;  %3400 = vmatmul.mubr.bf16.vlgmr.msra.gmra.mrb[96].mxu0 %v9446_v32  ;;  %v9500_v32 = vld [vmem:[%s10368_s7 + $0x90] ss:$12 sps:$4 sm:$0xff]  }
  0xec   : > { %2846 = vmatprep.mubr.bf16.mxu1 %v9451_v34  ;;  %3407 = vmatprep.mubr.bf16.mxu0 %v9453_v35  ;;  %v9503_v34 = vld [vmem:[%s10336_s8 + $0x8] ss:$12 sps:$4 sm:$0xff]  }
  0xed   : > { %8106 = vmatpush3.bf16.msra.mxu0 %v9458_v36  ;;  %8612 = vmatpush3.bf16.msra.mxu1 %v9459_v31 }
  0xee   : > { %8107 = vmatprep.subr.bf16.mxu0 %v9466_v37  ;;  %8613 = vmatprep.subr.bf16.mxu1 %v9473_v38 }
  0xf1   : > { %8108 = vmatpush3.bf16.msra.mxu0 %v9467_v41  ;;  %8614 = vmatpush3.bf16.msra.mxu1 %v9473_v38  ;;  %v9504_v41 = vld [vmem:[%s10368_s7 + $0xac] ss:$12 sps:$4 sm:$0xff]  }
  0xf2   : > { %8109 = vmatprep.subr.bf16.mxu0 %v9475_v43  ;;  %8615 = vmatprep.subr.bf16.mxu1 %v9485_v44 }
  0xf3   : > { %2847 = vmatmul.mubr.bf16.gmra.mrb[56].mxu1 %v9455_v39  ;;  %3408 = vmatmul.mubr.bf16.gmra.mrb[100].mxu0 %v9456_v40 }
  0xf4   : > { %2854 = vmatprep.mubr.bf16.mxu1 %v9460_v42  ;;  %3415 = vmatprep.mubr.bf16.mxu0 %v9462_v45 }
  0xf5   : > { %8110 = vmatpush3.bf16.msra.mxu0 %v9476_v46  ;;  %8616 = vmatpush3.bf16.msra.mxu1 %v9485_v44 }
  0xf6   : > { %8111 = vmatprep.subr.bf16.mxu0 %v9483_v47  ;;  %8617 = vmatprep.subr.bf16.mxu1 %v9494_v48 }
  0xf9   : > { %8112 = vmatpush3.bf16.msra.mxu0 %v9484_v49  ;;  %8618 = vmatpush3.bf16.msra.mxu1 %v9494_v48  ;;  %v9506_v48 = vld [vmem:[%s10336_s8 + $0x20] ss:$12 sps:$4 sm:$0xff]   ;;  %v9507_v49 = vld [vmem:[%s10368_s7 + $0xa8] ss:$12 sps:$4 sm:$0xff]  }
  0xfa   : > { %8113 = vmatprep.subr.bf16.mxu0 %v9492_v52  ;;  %8635 = vmatprep.subr.bf16.mxu1 %v10467_v53 }
  0xfb   : > { %2855 = vmatmul.mubr.bf16.gmra.mrb[60].mxu1 %v9464_v50  ;;  %3416 = vmatmul.mubr.bf16.gmra.mrb[104].mxu0 %v9465_v51 }
  0xfc   : > { %2862 = vmatprep.mubr.bf16.mxu1 %v9468_v54  ;;  %3423 = vmatprep.mubr.bf16.mxu0 %v9470_v55  ;;  %v9513_v55 = vld [vmem:[%s11530_s1 + $0x3f8] sm:$0xff]  }
  0xfd   : > { %8114 = vmatpush3.bf16.msra.mxu0 %v9493_v56  ;;  %v9514_v56 = vld [vmem:[%s10336_s8 + $0x38] ss:$12 sps:$4 sm:$0xff]  }
  0xfe   : > { %v7653_v61 = vpop.f32.mrb[0].mxu0  ;;  %8115 = vmatprep.subr.bf16.mxu0 %v9501_v57 }
  0xff   : > { %v7654_v63 = vpop.f32.mrb[1].mxu0 }
 0x100   : > { %v7655_v1 = vadd.f32 %v7654_v63, %v7653_v61  ;;  %v7656_v2 = vpop.f32.mrb[2].mxu0  ;;  %v9517_v63 = vld [vmem:[%s10479_s26 + $0x4] ss:$12 sps:$4 sm:$0xff]  }
 0x101   : > { %v7657_v4 = vpop.f32.mrb[3].mxu0  ;;  %8116 = vmatpush3.bf16.msra.mxu0 %v9502_v60 }
 0x102   : > { %v7658_v6 = vadd.f32 %v7657_v4, %v7656_v2  ;;  %8117 = vmatprep.subr.bf16.mxu0 %v9509_v62  ;;  %v9515_v4 = vld [vmem:[%s10479_s26] ss:$12 sps:$4 sm:$0xff]  }
 0x103   : > { %2863 = vmatmul.mubr.bf16.gmra.mrb[64].mxu1 %v9472_v58  ;;  %3424 = vmatmul.mubr.bf16.gmra.mrb[108].mxu0 %v9474_v59 }
 0x104   : > { %2870 = vmatprep.mubr.bf16.mxu1 %v9477_v0  ;;  %3431 = vmatprep.mubr.bf16.mxu0 %v9479_v3 }
 0x105   : > { %8118 = vmatpush3.bf16.msra.mxu0 %v9510_v5  ;;  %v9518_v5 = vld [vmem:[%s10336_s8 + $0x50] ss:$12 sps:$4 sm:$0xff]  }
 0x106   : > { %v7659_v11 = vpop.f32.mrb[4].mxu0  ;;  %8119 = vmatprep.subr.bf16.mxu0 %v9511_v7 }
 0x107   : > { %v7660_v13 = vpop.f32.mrb[5].mxu0 }
 0x108   : > { %v7661_v15 = vadd.f32 %v7660_v13, %v7659_v11  ;;  %v7662_v16 = vpop.f32.mrb[6].mxu0 }
 0x109   : > { %v7663_v18 = vpop.f32.mrb[7].mxu0  ;;  %8120 = vmatpush3.bf16.msra.mxu0 %v9512_v10 }
 0x10a   : > { %v7664_v19 = vadd.f32 %v7663_v18, %v7662_v16  ;;  %8183 = vmatprep.subr.bf16.mxu0 %v9526_v12  ;;  %v9521_v12 = vld [vmem:[%s10479_s26 + $0x1c] ss:$12 sps:$4 sm:$0xff]  }
 0x10b   : > { %2871 = vmatmul.mubr.bf16.gmra.mrb[68].mxu1 %v9481_v8  ;;  %3432 = vmatmul.mubr.bf16.gmra.mrb[112].mxu0 %v9482_v9  ;;  %v9520_v9 = vld [vmem:[%s10336_s8 + $0x68] ss:$12 sps:$4 sm:$0xff]  }
 0x10c   : > { %2878 = vmatprep.mubr.bf16.mxu1 %v9486_v14  ;;  %3439 = vmatprep.mubr.bf16.mxu0 %v9488_v17  ;;  %v9524_v18 = vld [vmem:[%s11530_s1 + $0x408] sm:$0xff]  }
 0x10e   : > { %v7665_v22 = vpop.f32.mrb[8].mxu0 }
 0x10f   : > { %v7666_v23 = vpop.f32.mrb[9].mxu0 }
 0x110   : > { %v10511_v26 = vadd.f32 %v7666_v23, %v7665_v22  ;;  %v7668_v27 = vpop.f32.mrb[10].mxu0  ;;  %v9527_v22 = vld [vmem:[%s11530_s1 + $0x4d0] sm:$0xff]   ;;  %v9534_v23 = vld [vmem:[%s11530_s1 + $0x518] sm:$0xff]  }
 0x111   : > { %v7669_v28 = vpop.f32.mrb[11].mxu0 }
 0x112   : > { %v10513_v29 = vadd.f32 %v7669_v28, %v7668_v27  ;;  %v9525_v27 = vld [vmem:[%s10479_s26 + $0x18] ss:$12 sps:$4 sm:$0xff]  }
 0x113   : > { %2879 = vmatmul.mubr.bf16.gmra.mrb[72].mxu1 %v9490_v20  ;;  %3440 = vmatmul.mubr.bf16.gmra.mrb[116].mxu0 %v9491_v21  ;;  %v9535_v28 = vld [vmem:[%s11530_s1 + $0x4d8] sm:$0xff]  }
 0x114   : > { %2886 = vmatprep.mubr.bf16.mxu1 %v9495_v24  ;;  %3447 = vmatprep.mubr.bf16.mxu0 %v9497_v25  ;;  %v9528_v25 = vld [vmem:[%s11530_s1 + $0x410] sm:$0xff]  }
 0x116   : > { %v7731_v31 = vpop.f32.mrb[16].mxu1  ;;  %v7671_v33 = vpop.f32.mrb[12].mxu0 }
 0x117   : > { %v7732_v35 = vpop.f32.mrb[17].mxu1  ;;  %v7672_v36 = vpop.f32.mrb[13].mxu0 }
 0x118   : > { %v7733_v37 = vadd.f32 %v7732_v35, %v7731_v31  ;;  %v7734_v38 = vpop.f32.mrb[18].mxu1  ;;  %v10518_v39 = vadd.f32 %v7672_v36, %v7671_v33  ;;  %v7674_v40 = vpop.f32.mrb[14].mxu0  ;;  %v9529_v31 = vld [vmem:[%s10336_s8 + $0x98] ss:$12 sps:$4 sm:$0xff]  }
 0x119   : > { %v7735_v42 = vpop.f32.mrb[19].mxu1  ;;  %v7675_v43 = vpop.f32.mrb[15].mxu0 }
 0x11a   : > { %v10521_v44 = vadd.f32 %v7733_v37, %v7655_v1  ;;  %v7736_v45 = vadd.f32 %v7735_v42, %v7734_v38  ;;  %v10523_v46 = vadd.f32 %v7675_v43, %v7674_v40  ;;  %v9536_v42 = vld [vmem:[%s11530_s1 + $0x418] sm:$0xff]   ;;  %v9543_v43 = vld [vmem:[%s11530_s1 + $0x520] sm:$0xff]  }
 0x11b   : > { %2887 = vmatmul.mubr.bf16.gmra.mrb[76].mxu1 %v9499_v30  ;;  %3448 = vmatmul.mubr.bf16.gmra.mrb[120].mxu0 %v9500_v32 }
 0x11c   : > { %v10525_v47 = vadd.f32 %v7736_v45, %v7658_v6  ;;  %8619 = vmatprep.mubr.msk.bf16.mxu1 %vm612_vm0, %v9503_v34  ;;  %3455 = vmatprep.mubr.bf16.mxu0 %v9504_v41  ;;  %v9519_v6 = vld [vmem:[%s11530_s1 + $0x400] sm:$0xff]  }
 0x11d   : > { %v9530_v34 = vld [vmem:[%s10479_s26 + $0x34] ss:$12 sps:$4 sm:$0xff]  }
 0x11e   : > { %v7737_v50 = vpop.f32.mrb[20].mxu1  ;;  %v7677_v51 = vpop.f32.mrb[16].mxu0 }
 0x11f   : > { %v7738_v52 = vpop.f32.mrb[21].mxu1  ;;  %v7678_v54 = vpop.f32.mrb[17].mxu0 }
 0x120   : > { %v7739_v57 = vadd.f32 %v7738_v52, %v7737_v50  ;;  %v7740_v58 = vpop.f32.mrb[22].mxu1  ;;  %v10534_v59 = vadd.f32 %v7678_v54, %v7677_v51  ;;  %v7680_v60 = vpop.f32.mrb[18].mxu0  ;;  %v9544_v50 = vld [vmem:[%s11530_s1 + $0x4e0] sm:$0xff]   ;;  %v9532_v52 = vld [vmem:[%s10336_s8 + $0xb0] ss:$12 sps:$4 sm:$0xff]  }
 0x121   : > { %v7741_v61 = vpop.f32.mrb[23].mxu1  ;;  %v7681_v62 = vpop.f32.mrb[19].mxu0  ;;  %v9533_v54 = vld [vmem:[%s10479_s26 + $0x30] ss:$12 sps:$4 sm:$0xff]  }
 0x122   : > { %v10537_v0 = vadd.f32 %v7739_v57, %v7661_v15  ;;  %v7742_v1 = vadd.f32 %v7741_v61, %v7740_v58  ;;  %v10539_v2 = vadd.f32 %v7681_v62, %v7680_v60  ;;  %v9537_v58 = vld [vmem:[%s10368_s7 + $0x8] ss:$12 sps:$4 sm:$0xff]   ;;  %v9538_v61 = vld [vmem:[%s10479_s26 + $0x4c] ss:$12 sps:$4 sm:$0xff]  }
 0x123   : > { %8620 = vmatmul.mubr.msk.bf16.vlgmr.msra.gmra.mrb[0].mxu1 %vm612_vm0, %v9506_v48  ;;  %3456 = vmatmul.mubr.bf16.gmra.mrb[124].mxu0 %v9507_v49 }
 0x124   : > { %v10542_v3 = vadd.f32 %v7742_v1, %v7664_v19  ;;  %8636 = vmatpush3.bf16.msra.mxu1 %v10467_v53  ;;  %8623 = vmatprep.mubr.msk.bf16.mxu1 %vm612_vm0, %v9514_v56 }
 0x125   : > { %8637 = vmatprep.subr.bf16.mxu1 %v9513_v55  ;;  %3968 = vmatprep.mubr.bf16.mxu0 %v9517_v63 }
 0x126   : > { %v7743_v7 = vpop.f32.mrb[24].mxu1  ;;  %v7683_v8 = vpop.f32.mrb[20].mxu0 }
 0x127   : > { %v7744_v10 = vpop.f32.mrb[25].mxu1  ;;  %v7684_v11 = vpop.f32.mrb[21].mxu0 }
 0x128   : > { %v7745_v13 = vadd.f32 %v7744_v10, %v7743_v7  ;;  %v7746_v14 = vpop.f32.mrb[26].mxu1  ;;  %8638 = vmatpush3.bf16.msra.mxu1 %v9513_v55  ;;  %v10554_v53 = vadd.f32 %v7684_v11, %v7683_v8  ;;  %v7686_v15 = vpop.f32.mrb[22].mxu0  ;;  %v9542_v55 = vld [vmem:[%s11530_s1 + $0x4a0] sm:$0xff]   ;;  %v9560_v11 = vld [vmem:[%s11530_s1 + $0x530] sm:$0xff]  }
 0x129   : > { %v7747_v16 = vpop.f32.mrb[27].mxu1  ;;  %8639 = vmatprep.subr.bf16.mxu1 %v9519_v6  ;;  %v7687_v17 = vpop.f32.mrb[23].mxu0 }
 0x12a   : > { %v10560_v19 = vadd.f32 %v7745_v13, %v10511_v26  ;;  %v7748_v20 = vadd.f32 %v7747_v16, %v7746_v14  ;;  %v10562_v21 = vadd.f32 %v7687_v17, %v7686_v15  ;;  %v9523_v26 = vld [vmem:[%s10336_s8 + $0x80] ss:$12 sps:$4 sm:$0xff]   ;;  %v9561_v14 = vld [vmem:[%s11530_s1 + $0x4f0] sm:$0xff]   ;;  %v9546_v17 = vld [vmem:[%s10368_s7 + $0x38] ss:$12 sps:$4 sm:$0xff]   ;;  %s5853_s8 = sadd.s32 160, %s9888_s25 }
 0x12b   : > { %8624 = vmatmul.mubr.msk.bf16.gmra.mrb[4].mxu1 %vm612_vm0, %v9518_v5  ;;  %3969 = vmatmul.mubr.bf16.vlgmr.msra.gmra.mrb[128].mxu0 %v9515_v4  ;;  %v9552_v5 = vld [vmem:[%s11530_s1 + $0x4e8] sm:$0xff]  }
 0x12c   : > { %v10574_v24 = vadd.f32 %v7748_v20, %v10513_v29  ;;  %8640 = vmatpush3.bf16.msra.mxu1 %v9519_v6  ;;  %8627 = vmatprep.mubr.msk.bf16.mxu1 %vm612_vm0, %v9520_v9  ;;  %v9540_v13 = vld [vmem:[%s10368_s7 + $0x20] ss:$12 sps:$4 sm:$0xff]  }
 0x12d   : > { %3976 = vmatprep.mubr.bf16.mxu0 %v9521_v12  ;;  %8641 = vmatprep.subr.bf16.mxu1 %v9524_v18 }
 0x12e   : > { %v7749_v30 = vpop.f32.mrb[28].mxu1  ;;  %v7689_v29 = vpop.f32.mrb[24].mxu0  ;;  %8184 = vmatpush3.bf16.msra.mxu0 %v9527_v22  ;;  %v9547_v22 = vld [vmem:[%s10479_s26 + $0x64] ss:$12 sps:$4 sm:$0xff]  }
 0x12f   : > { %v7750_v32 = vpop.f32.mrb[29].mxu1  ;;  %v7690_v33 = vpop.f32.mrb[25].mxu0  ;;  %8185 = vmatprep.subr.bf16.mxu0 %v9534_v23 }
 0x130   : > { %v7751_v35 = vadd.f32 %v7750_v32, %v7749_v30  ;;  %v7752_v36 = vpop.f32.mrb[30].mxu1  ;;  %8642 = vmatpush3.bf16.msra.mxu1 %v9524_v18  ;;  %v10588_v37 = vadd.f32 %v7690_v33, %v7689_v29  ;;  %v7692_v38 = vpop.f32.mrb[26].mxu0  ;;  %v9568_v18 = vld [vmem:[%s11530_s1 + $0x538] sm:$0xff]  }
 0x131   : > { %v7753_v40 = vpop.f32.mrb[31].mxu1  ;;  %v7693_v41 = vpop.f32.mrb[27].mxu0  ;;  %8643 = vmatprep.subr.bf16.mxu1 %v9528_v25 }
 0x132   : > { %v10597_v45 = vadd.f32 %v7751_v35, %v10518_v39  ;;  %v7754_v48 = vadd.f32 %v7753_v40, %v7752_v36  ;;  %v10599_v49 = vadd.f32 %v7693_v41, %v7692_v38  ;;  %8186 = vmatpush3.bf16.msra.mxu0 %v9535_v28  ;;  %v9551_v39 = vld [vmem:[%s11530_s1 + $0x528] sm:$0xff]   ;;  %v9569_v35 = vld [vmem:[%s11530_s1 + $0x4f8] sm:$0xff]   ;;  %v9553_v41 = vld [vmem:[%s11530_s1 + $0x4b0] sm:$0xff]  }
 0x133   : > { %8628 = vmatmul.mubr.msk.bf16.gmra.mrb[8].mxu1 %vm612_vm0, %v9523_v26  ;;  %3977 = vmatmul.mubr.bf16.gmra.mrb[132].mxu0 %v9525_v27  ;;  %v9545_v28 = vld [vmem:[%s11530_s1 + $0x4a8] sm:$0xff]   ;;  %v9549_v38 = vld [vmem:[%s10368_s7 + $0x50] ss:$12 sps:$4 sm:$0xff]  }
 0x134   : > { %v10609_v51 = vadd.f32 %v7754_v48, %v10523_v46  ;;  %8631 = vmatprep.mubr.msk.bf16.mxu1 %vm612_vm0, %v9529_v31  ;;  %8644 = vmatpush3.bf16.msra.mxu1 %v9528_v25  ;;  %v9550_v40 = vld [vmem:[%s10479_s26 + $0x60] ss:$12 sps:$4 sm:$0xff]   ;;  %v9554_v48 = vld [vmem:[%s10368_s7 + $0x68] ss:$12 sps:$4 sm:$0xff]  }
 0x135   : > { %3984 = vmatprep.mubr.bf16.mxu0 %v9530_v34  ;;  %8645 = vmatprep.subr.bf16.mxu1 %v9536_v42 }
 0x136   : > { %v7755_v56 = vpop.f32.mrb[32].mxu1  ;;  %v7695_v57 = vpop.f32.mrb[28].mxu0  ;;  %8187 = vmatprep.subr.bf16.mxu0 %v9543_v43 }
 0x137   : > { %v7756_v46 = vpop.f32.mrb[33].mxu1  ;;  %v7696_v60 = vpop.f32.mrb[29].mxu0  ;;  %8188 = vmatpush3.bf16.msra.mxu0 %v9544_v50 }
 0x138   : > { %v7757_v62 = vadd.f32 %v7756_v46, %v7755_v56  ;;  %v7758_v63 = vpop.f32.mrb[34].mxu1  ;;  %v10622_v1 = vadd.f32 %v7696_v60, %v7695_v57  ;;  %v7698_v4 = vpop.f32.mrb[30].mxu0  ;;  %8646 = vmatpush3.bf16.msra.mxu1 %v9536_v42  ;;  %8189 = vmatprep.subr.bf16.mxu0 %v9551_v39  ;;  %v9555_v56 = vld [vmem:[%s10479_s26 + $0x7c] ss:$12 sps:$4 sm:$0xff]  }
 0x139   : > { %v7759_v6 = vpop.f32.mrb[35].mxu1  ;;  %v7699_v7 = vpop.f32.mrb[31].mxu0  ;;  %8663 = vmatprep.subr.bf16.mxu1 %v9542_v55  ;;  %v9559_v46 = vld [vmem:[%s11530_s1 + $0x4b8] sm:$0xff]  }
 0x13a   : > { %v10628_v8 = vadd.f32 %v7757_v62, %v10534_v59  ;;  %v7760_v9 = vadd.f32 %v7759_v6, %v7758_v63  ;;  %v10630_v10 = vadd.f32 %v7699_v7, %v7698_v4  ;;  %v9541_v59 = vld [vmem:[%s10479_s26 + $0x48] ss:$12 sps:$4 sm:$0xff]   ;;  %v9557_v7 = vld [vmem:[%s10368_s7 + $0x80] ss:$12 sps:$4 sm:$0xff]  }
 0x13b   : > { %8632 = vmatmul.mubr.msk.bf16.gmra.mrb[12].mxu1 %vm612_vm0, %v9532_v52  ;;  %3985 = vmatmul.mubr.bf16.gmra.mrb[136].mxu0 %v9533_v54  ;;  %v9579_v4 = vld [vmem:[%s11530_s1 + $0x548] sm:$0xff]   ;;  %v9594_v6 = vld [vmem:[%s11530_s1 + $0x670] sm:$0xff]  }
 0x13c   : > { %v10637_v12 = vadd.f32 %v7760_v9, %v10539_v2  ;;  %8647 = vmatprep.mubr.msk.bf16.mxu1 %vm612_vm0, %v9537_v58  ;;  %3992 = vmatprep.mubr.bf16.mxu0 %v9538_v61  ;;  %v9558_v9 = vld [vmem:[%s10479_s26 + $0x78] ss:$12 sps:$4 sm:$0xff]  }
 0x13d   : > { %8190 = vmatpush3.bf16.msra.mxu0 %v9552_v5 }
 0x13e   : > { %v7761_v15 = vpop.f32.mrb[36].mxu1  ;;  %v7809_v16 = vpop.f32.mrb[32].mxu0  ;;  %8191 = vmatprep.subr.bf16.mxu0 %v9560_v11 }
 0x13f   : > { %v7762_v2 = vpop.f32.mrb[37].mxu1  ;;  %v7810_v20 = vpop.f32.mrb[33].mxu0 }
 0x140   : > { %v7763_v23 = vadd.f32 %v7762_v2, %v7761_v15  ;;  %v7811_v25 = vadd.f32 %v7810_v20, %v7809_v16  ;;  %v7764_v26 = vpop.f32.mrb[38].mxu1  ;;  %v7812_v27 = vpop.f32.mrb[34].mxu0  ;;  %v9564_v2 = vld [vmem:[%s10479_s26 + $0x94] ss:$12 sps:$4 sm:$0xff]  }
 0x141   : > { %v7765_v30 = vpop.f32.mrb[39].mxu1  ;;  %v7813_v29 = vpop.f32.mrb[35].mxu0  ;;  %8192 = vmatpush3.bf16.msra.mxu0 %v9561_v14 }
 0x142   : > { %v10654_v31 = vadd.f32 %v7763_v23, %v10554_v53  ;;  %v10657_v32 = vadd.f32 %v10521_v44, %v7811_v25  ;;  %v7766_v33 = vadd.f32 %v7765_v30, %v7764_v26  ;;  %v7814_v34 = vadd.f32 %v7813_v29, %v7812_v27  ;;  %8193 = vmatprep.subr.bf16.mxu0 %v9568_v18  ;;  %v9576_v53 = vld [vmem:[%s11530_s1 + $0x540] sm:$0xff]   ;;  %v9567_v29 = vld [vmem:[%s10479_s26 + $0x90] ss:$12 sps:$4 sm:$0xff]  }
 0x143   : > { %8648 = vmatmul.mubr.msk.bf16.vlgmr.msra.gmra.mrb[0].mxu1 %vm612_vm0, %v9540_v13  ;;  %3993 = vmatmul.mubr.bf16.gmra.mrb[140].mxu0 %v9541_v59 }
 0x144   : > { %v10667_v36 = vadd.f32 %v7766_v33, %v10562_v21  ;;  %v10670_v44 = vadd.f32 %v10525_v47, %v7814_v34  ;;  %8664 = vmatpush3.bf16.msra.mxu1 %v9542_v55  ;;  %8651 = vmatprep.mubr.msk.bf16.mxu1 %vm612_vm0, %v9546_v17  ;;  %v9578_v47 = vld [vmem:[%s11530_s1 + $0x500] sm:$0xff]   ;;  %v9571_v34 = vld [vmem:[%s10479_s26 + $0xac] ss:$12 sps:$4 sm:$0xff]  }
 0x145   : > { %8665 = vmatprep.subr.bf16.mxu1 %v9545_v28  ;;  %4000 = vmatprep.mubr.bf16.mxu0 %v9547_v22 }
 0x146   : > { %v7767_v42 = vpop.f32.mrb[40].mxu1  ;;  %v7815_v43 = vpop.f32.mrb[36].mxu0  ;;  %8194 = vmatpush3.bf16.msra.mxu0 %v9569_v35  ;;  %v9573_v35 = vld [vmem:[%s10479_s26 + $0x8] ss:$12 sps:$4 sm:$0xff]  }
 0x147   : > { %v7768_v21 = vpop.f32.mrb[41].mxu1  ;;  %v7816_v50 = vpop.f32.mrb[37].mxu0  ;;  %8195 = vmatprep.subr.bf16.mxu0 %v9576_v53 }
 0x148   : > { %v7769_v39 = vadd.f32 %v7768_v21, %v7767_v42  ;;  %v7817_v52 = vadd.f32 %v7816_v50, %v7815_v43  ;;  %v7770_v54 = vpop.f32.mrb[42].mxu1  ;;  %v7818_v55 = vpop.f32.mrb[38].mxu0  ;;  %8666 = vmatpush3.bf16.msra.mxu1 %v9545_v28  ;;  %v9570_v28 = vld [vmem:[%s11530_s1 + $0x4c8] sm:$0xff]   ;;  %v9582_v50 = vld [vmem:[%s10479_s26 + $0x38] ss:$12 sps:$4 sm:$0xff]  }
 0x149   : > { %v7771_v57 = vpop.f32.mrb[43].mxu1  ;;  %v7819_v58 = vpop.f32.mrb[39].mxu0  ;;  %8667 = vmatprep.subr.bf16.mxu1 %v9553_v41 }
 0x14a   : > { %v10687_v60 = vadd.f32 %v7769_v39, %v10588_v37  ;;  %v10690_v61 = vadd.f32 %v10537_v0, %v7817_v52  ;;  %v7772_v62 = vadd.f32 %v7771_v57, %v7770_v54  ;;  %v7820_v63 = vadd.f32 %v7819_v58, %v7818_v55  ;;  %8196 = vmatpush3.bf16.msra.mxu0 %v9578_v47  ;;  %v9580_v37 = vld [vmem:[%s11530_s1 + $0x508] sm:$0xff]  }
 0x14b   : > { %8652 = vmatmul.mubr.msk.bf16.gmra.mrb[4].mxu1 %vm612_vm0, %v9549_v38  ;;  %4001 = vmatmul.mubr.bf16.gmra.mrb[144].mxu0 %v9550_v40  ;;  %v9575_v47 = vld [vmem:[%s10479_s26 + $0x20] ss:$12 sps:$4 sm:$0xff]  }
 0x14c   : > { %v10700_v5 = vadd.f32 %v7772_v62, %v10599_v49  ;;  %v10703_v0 = vadd.f32 %v10542_v3, %v7820_v63  ;;  %8668 = vmatpush3.bf16.msra.mxu1 %v9553_v41  ;;  %8655 = vmatprep.mubr.msk.bf16.mxu1 %vm612_vm0, %v9554_v48  ;;  %v9562_v49 = vld [vmem:[%s11530_s1 + $0x4c0] sm:$0xff]   ;;  %v9574_v48 = vld [vmem:[%s10479_s26 + $0xa8] ss:$12 sps:$4 sm:$0xff]  }
 0x14d   : > { %4008 = vmatprep.mubr.bf16.mxu0 %v9555_v56  ;;  %8669 = vmatprep.subr.bf16.mxu1 %v9559_v46  ;;  %v9563_v3 = vld [vmem:[%s10368_s7 + $0x98] ss:$12 sps:$4 sm:$0xff]  }
 0x14e   : > { %v7773_v11 = vpop.f32.mrb[44].mxu1  ;;  %v7821_v13 = vpop.f32.mrb[40].mxu0  ;;  %8197 = vmatprep.subr.bf16.mxu0 %v9579_v4  ;;  %v9587_v62 = vld [vmem:[%s11530_s1 + $0x560] sm:$0xff]   ;;  %v9588_v4 = vld [vmem:[%s10479_s26 + $0x68] ss:$12 sps:$4 sm:$0xff]  }
 0x14f   : > { %v7774_v59 = vpop.f32.mrb[45].mxu1  ;;  %v7822_v14 = vpop.f32.mrb[41].mxu0  ;;  %8198 = vmatpush3.bf16.msra.mxu0 %v9580_v37 }
 0x150   : > { %v7775_v15 = vadd.f32 %v7774_v59, %v7773_v11  ;;  %v7823_v16 = vadd.f32 %v7822_v14, %v7821_v13  ;;  %v7776_v17 = vpop.f32.mrb[46].mxu1  ;;  %v7824_v18 = vpop.f32.mrb[42].mxu0  ;;  %8670 = vmatpush3.bf16.msra.mxu1 %v9559_v46  ;;  %8339 = vmatprep.subr.bf16.mxu0 %v9594_v6  ;;  %v9583_v46 = vld [vmem:[%s10606_s27] ss:$12 sps:$4 sm:$0xff]   ;;  %v9602_v13 = vld [vmem:[%s11530_s1 + $0x678] sm:$0xff]  }
 0x151   : > { %v7777_v20 = vpop.f32.mrb[47].mxu1  ;;  %v7825_v22 = vpop.f32.mrb[43].mxu0  ;;  %8671 = vmatprep.subr.bf16.mxu1 %v9562_v49 }
 0x152   : > { %v10717_v23 = vadd.f32 %v7775_v15, %v10622_v1  ;;  %v10720_v25 = vadd.f32 %v10560_v19, %v7823_v16  ;;  %v7778_v26 = vadd.f32 %v7777_v20, %v7776_v17  ;;  %v7826_v27 = vadd.f32 %v7825_v22, %v7824_v18  ;;  %v9566_v19 = vld [vmem:[%s10368_s7 + $0xb0] ss:$12 sps:$4 sm:$0xff]   ;;  %s4715_s7 = sadd.s32 128, %s9888_s25  ;;  %v9591_v15 = vld [vmem:[%s10479_s26 + $0x80] ss:$12 sps:$4 sm:$0xff]   ;;  %s5854_s25 = sshra.s32 %s5853_s8, 3 }
 0x153   : > { %8656 = vmatmul.mubr.msk.bf16.gmra.mrb[8].mxu1 %vm612_vm0, %v9557_v7  ;;  %4009 = vmatmul.mubr.bf16.gmra.mrb[148].mxu0 %v9558_v9  ;;  %s10764_s23 = sshra.s32 %s4715_s7, 3  ;;  %v9593_v9 = vld [vmem:[%s11530_s1 + $0x568] sm:$0xff]   ;;  %v9592_v16 = vld [vmem:[%s10606_s27 + $0x18] ss:$12 sps:$4 sm:$0xff]   ;;  %s10797_s7 = sshra.s32 %s5284_s9, 3 }
 0x154   : > { %v10727_v30 = vadd.f32 %v7778_v26, %v10630_v10  ;;  %v10730_v1 = vadd.f32 %v10574_v24, %v7826_v27  ;;  %8659 = vmatprep.mubr.msk.bf16.mxu1 %vm612_vm0, %v9563_v3  ;;  %4016 = vmatprep.mubr.bf16.mxu0 %v9564_v2  ;;  %v9577_v10 = vld [vmem:[%s11530_s1 + $0x550] sm:$0xff]   ;;  %s7634_s28 = smul.u32 12, %s10764_s23  ;;  %v9597_v2 = vld [vmem:[%s10479_s26 + $0x98] ss:$12 sps:$4 sm:$0xff]  }
 0x155   : > { %8672 = vmatpush3.bf16.msra.mxu1 %v9562_v49  ;;  %v9595_v49 = vld [vmem:[%s11530_s1 + $0x630] sm:$0xff]   ;;  %v9604_v27 = vld [vmem:[%s11530_s1 + $0x578] sm:$0xff]   ;;  %s7635_s19 = smul.u32 12, %s10797_s7 }
 0x156   : > { %v7827_v33 = vpop.f32.mrb[44].mxu0  ;;  %8673 = vmatprep.subr.bf16.mxu1 %v9570_v28  ;;  %s10803_s23 = scalar_lea.vmem %s9927_s6, %s7634_s28  ;;  %v9598_v26 = vld [vmem:[%s10606_s27 + $0x34] ss:$12 sps:$4 sm:$0xff]  }
 0x157   : > { %v7828_v53 = vpop.f32.mrb[45].mxu0  ;;  %s10833_s10 = scalar_lea.vmem %s9927_s6, %s7635_s19  ;;  %s7636_s19 = smul.u32 12, %s5854_s25 }
 0x158   : > { %v7829_v24 = vadd.f32 %v7828_v53, %v7827_v33  ;;  %v7830_v38 = vpop.f32.mrb[46].mxu0  ;;  %v9610_v53 = vld [vmem:[%s11530_s1 + $0x5c0] sm:$0xff]  }
 0x159   : > { %v7831_v40 = vpop.f32.mrb[47].mxu0  ;;  %8674 = vmatpush3.bf16.msra.mxu1 %v9570_v28  ;;  %v9611_v28 = vld [vmem:[%s11530_s1 + $0x680] sm:$0xff]  }
 0x15a   : > { %v10741_v41 = vadd.f32 %v10597_v45, %v7829_v24  ;;  %v7832_v42 = vadd.f32 %v7831_v40, %v7830_v38  ;;  %8691 = vmatprep.subr.bf16.mxu1 %v9577_v10  ;;  %v9585_v45 = vld [vmem:[%s10606_s27 + $0x4] ss:$12 sps:$4 sm:$0xff]  }
 0x15b   : > { %8660 = vmatmul.mubr.msk.bf16.gmra.mrb[12].mxu1 %vm612_vm0, %v9566_v19  ;;  %4017 = vmatmul.mubr.bf16.gmra.mrb[152].mxu0 %v9567_v29  ;;  %v9613_v29 = vld [vmem:[%s11530_s1 + $0x640] sm:$0xff]   ;;  %v9601_v40 = vld [vmem:[%s10606_s27 + $0x30] ss:$12 sps:$4 sm:$0xff]  }
 0x15c   : > { %v10745_v43 = vadd.f32 %v10609_v51, %v7832_v42  ;;  %4024 = vmatprep.mubr.bf16.mxu0 %v9571_v34  ;;  %8675 = vmatprep.mubr.msk.bf16.mxu1 %vm612_vm0, %v9573_v35  ;;  %v9581_v51 = vld [vmem:[%s11530_s1 + $0x558] sm:$0xff]   ;;  %v9622_v35 = vld [vmem:[%s11530_s1 + $0x688] sm:$0xff]  }
 0x15d   : > { %v9605_v42 = vld [vmem:[%s10606_s27 + $0x4c] ss:$12 sps:$4 sm:$0xff]  }
 0x15e   : > { %v7833_v21 = vpop.f32.mrb[48].mxu0 }
 0x15f   : > { %v7834_v39 = vpop.f32.mrb[49].mxu0 }
 0x160   : > { %v7835_v52 = vadd.f32 %v7834_v39, %v7833_v21  ;;  %v7836_v54 = vpop.f32.mrb[50].mxu0  ;;  %v9607_v21 = vld [vmem:[%s10606_s27 + $0x8] ss:$12 sps:$4 sm:$0xff]  }
 0x161   : > { %v7837_v55 = vpop.f32.mrb[51].mxu0 }
 0x162   : > { %v10757_v56 = vadd.f32 %v10628_v8, %v7835_v52  ;;  %v7838_v57 = vadd.f32 %v7837_v55, %v7836_v54  ;;  %v9586_v8 = vld [vmem:[%s10479_s26 + $0x50] ss:$12 sps:$4 sm:$0xff]  }
 0x163   : > { %4025 = vmatmul.mubr.bf16.gmra.mrb[156].mxu0 %v9574_v48  ;;  %8676 = vmatmul.mubr.msk.bf16.vlgmr.msra.gmra.mrb[0].mxu1 %vm612_vm0, %v9575_v47  ;;  %v9635_v54 = vld [vmem:[%s11530_s1 + $0x650] sm:$0xff]   ;;  %v9644_v55 = vld [vmem:[%s11530_s1 + $0x698] sm:$0xff]  }
 0x164   : > { %v10761_v58 = vadd.f32 %v10637_v12, %v7838_v57  ;;  %8692 = vmatpush3.bf16.msra.mxu1 %v9577_v10  ;;  %8679 = vmatprep.mubr.msk.bf16.mxu1 %vm612_vm0, %v9582_v50  ;;  %v9589_v12 = vld [vmem:[%s10606_s27 + $0x1c] ss:$12 sps:$4 sm:$0xff]   ;;  %v9633_v50 = vld [vmem:[%s11530_s1 + $0x690] sm:$0xff]   ;;  %v9609_v57 = vld [vmem:[%s10606_s27 + $0x20] ss:$12 sps:$4 sm:$0xff]  }
 0x165   : > { %8693 = vmatprep.subr.bf16.mxu1 %v9581_v51  ;;  %4537 = vmatprep.mubr.bf16.mxu0 %v9585_v45 }
 0x166   : > { %v7839_v63 = vpop.f32.mrb[52].mxu0 }
 0x167   : > { %v7840_v37 = vpop.f32.mrb[53].mxu0 }
 0x168   : > { %v7841_v6 = vadd.f32 %v7840_v37, %v7839_v63  ;;  %v7842_v7 = vpop.f32.mrb[54].mxu0  ;;  %8694 = vmatpush3.bf16.msra.mxu1 %v9581_v51  ;;  %v9612_v63 = vld [vmem:[%s11530_s1 + $0x580] sm:$0xff]  }
 0x169   : > { %v7843_v11 = vpop.f32.mrb[55].mxu0  ;;  %8695 = vmatprep.subr.bf16.mxu1 %v9587_v62  ;;  %v9616_v37 = vld [vmem:[%s10606_s27 + $0x64] ss:$12 sps:$4 sm:$0xff]  }
 0x16a   : > { %v10785_v3 = vadd.f32 %v10654_v31, %v7841_v6  ;;  %v7844_v59 = vadd.f32 %v7843_v11, %v7842_v7  ;;  %v9596_v31 = vld [vmem:[%s11530_s1 + $0x570] sm:$0xff]   ;;  %v9614_v6 = vld [vmem:[%s11530_s1 + $0x5c8] sm:$0xff]   ;;  %v9618_v7 = vld [vmem:[%s10606_s27 + $0x38] ss:$12 sps:$4 sm:$0xff]  }
 0x16b   : > { %8680 = vmatmul.mubr.msk.bf16.gmra.mrb[4].mxu1 %vm612_vm0, %v9586_v8  ;;  %4538 = vmatmul.mubr.bf16.vlgmr.msra.gmra.mrb[160].mxu0 %v9583_v46  ;;  %v9646_v8 = vld [vmem:[%s11530_s1 + $0x658] sm:$0xff]  }
 0x16c   : > { %v10789_v14 = vadd.f32 %v10667_v36, %v7844_v59  ;;  %8696 = vmatpush3.bf16.msra.mxu1 %v9587_v62  ;;  %8683 = vmatprep.mubr.msk.bf16.mxu1 %vm612_vm0, %v9588_v4  ;;  %v9603_v36 = vld [vmem:[%s11530_s1 + $0x638] sm:$0xff]   ;;  %v9657_v59 = vld [vmem:[%s11530_s1 + $0x660] sm:$0xff]  }
 0x16d   : > { %4545 = vmatprep.mubr.bf16.mxu0 %v9589_v12  ;;  %8697 = vmatprep.subr.bf16.mxu1 %v9593_v9 }
 0x16e   : > { %v7845_v17 = vpop.f32.mrb[56].mxu0  ;;  %8340 = vmatpush3.bf16.msra.mxu0 %v9595_v49 }
 0x16f   : > { %v7846_v18 = vpop.f32.mrb[57].mxu0  ;;  %8341 = vmatprep.subr.bf16.mxu0 %v9602_v13  ;;  %v9615_v13 = vld [vmem:[%s11530_s1 + $0x588] sm:$0xff]  }
 0x170   : > { %v7847_v20 = vadd.f32 %v7846_v18, %v7845_v17  ;;  %v7848_v22 = vpop.f32.mrb[58].mxu0  ;;  %8698 = vmatpush3.bf16.msra.mxu1 %v9593_v9  ;;  %v9656_v9 = vld [vmem:[%s11530_s1 + $0x6a0] sm:$0xff]   ;;  %v9621_v17 = vld [vmem:[%s11530_s1 + $0x5d0] sm:$0xff]   ;;  %v9627_v18 = vld [vmem:[%s10606_s27 + $0x7c] ss:$12 sps:$4 sm:$0xff]  }
 0x171   : > { %v7849_v19 = vpop.f32.mrb[59].mxu0  ;;  %8699 = vmatprep.subr.bf16.mxu1 %v9596_v31 }
 0x172   : > { %v10818_v33 = vadd.f32 %v10687_v60, %v7847_v20  ;;  %v7850_v34 = vadd.f32 %v7849_v19, %v7848_v22  ;;  %8342 = vmatpush3.bf16.msra.mxu0 %v9603_v36  ;;  %v9600_v60 = vld [vmem:[%s10479_s26 + $0xb0] ss:$12 sps:$4 sm:$0xff]   ;;  %v9629_v20 = vld [vmem:[%s10606_s27 + $0x68] ss:$12 sps:$4 sm:$0xff]  }
 0x173   : > { %8684 = vmatmul.mubr.msk.bf16.gmra.mrb[8].mxu1 %vm612_vm0, %v9591_v15  ;;  %4546 = vmatmul.mubr.bf16.gmra.mrb[164].mxu0 %v9592_v16  ;;  %v9619_v16 = vld [vmem:[%s10606_s27 + $0x60] ss:$12 sps:$4 sm:$0xff]  }
 0x174   : > { %v10825_v10 = vadd.f32 %v10700_v5, %v7850_v34  ;;  %8687 = vmatprep.mubr.msk.bf16.mxu1 %vm612_vm0, %v9597_v2  ;;  %4553 = vmatprep.mubr.bf16.mxu0 %v9598_v26  ;;  %v9624_v5 = vld [vmem:[%s11530_s1 + $0x648] sm:$0xff]   ;;  %v9623_v2 = vld [vmem:[%s11530_s1 + $0x590] sm:$0xff]  }
 0x175   : > { %8700 = vmatpush3.bf16.msra.mxu1 %v9596_v31  ;;  %8343 = vmatprep.subr.bf16.mxu0 %v9611_v28  ;;  %v9620_v31 = vld [vmem:[%s10606_s27 + $0x50] ss:$12 sps:$4 sm:$0xff]   ;;  %v9659_v34 = vld [vmem:[%s11530_s1 + $0x668] sm:$0xff]  }
 0x176   : > { %v7851_v24 = vpop.f32.mrb[60].mxu0  ;;  %8701 = vmatprep.subr.bf16.mxu1 %v9604_v27  ;;  %8344 = vmatpush3.bf16.msra.mxu0 %v9613_v29 }
 0x177   : > { %v7852_v38 = vpop.f32.mrb[61].mxu0  ;;  %8345 = vmatprep.subr.bf16.mxu0 %v9622_v35  ;;  %v9673_v35 = vld [vmem:[%s11530_s1 + $0x720] sm:$0xff]  }
 0x178   : > { %v7853_v48 = vadd.f32 %v7852_v38, %v7851_v24  ;;  %v7854_v47 = vpop.f32.mrb[62].mxu0  ;;  %v9631_v24 = vld [vmem:[%s10606_s27 + $0x80] ss:$12 sps:$4 sm:$0xff]  }
 0x179   : > { %v7855_v39 = vpop.f32.mrb[63].mxu0  ;;  %8702 = vmatpush3.bf16.msra.mxu1 %v9604_v27  ;;  %v9625_v27 = vld [vmem:[%s11530_s1 + $0x5d8] sm:$0xff]  }
 0x17a   : > { %v10845_v45 = vadd.f32 %v10717_v23, %v7853_v48  ;;  %v7856_v52 = vadd.f32 %v7855_v39, %v7854_v47  ;;  %8261 = vmatprep.subr.bf16.mxu1 %v9610_v53  ;;  %8346 = vmatpush3.bf16.msra.mxu0 %v9624_v5  ;;  %v9608_v23 = vld [vmem:[%s10606_s27 + $0x48] ss:$12 sps:$4 sm:$0xff]   ;;  %v9630_v53 = vld [vmem:[%s10606_s27 + $0x78] ss:$12 sps:$4 sm:$0xff]  }
 0x17b   : > { %8688 = vmatmul.mubr.msk.bf16.gmra.mrb[12].mxu1 %vm612_vm0, %v9600_v60  ;;  %4554 = vmatmul.mubr.bf16.gmra.mrb[168].mxu0 %v9601_v40  ;;  %v9632_v5 = vld [vmem:[%s11530_s1 + $0x5e0] sm:$0xff]  }
 0x17c   : > { %v10855_v51 = vadd.f32 %v10727_v30, %v7856_v52  ;;  %4561 = vmatprep.mubr.bf16.mxu0 %v9605_v42  ;;  %8703 = vmatprep.mubr.msk.bf16.mxu1 %vm612_vm0, %v9607_v21  ;;  %v9634_v40 = vld [vmem:[%s11530_s1 + $0x5a0] sm:$0xff]  }
 0x17d   : > { %8347 = vmatprep.subr.bf16.mxu0 %v9633_v50  ;;  %v9638_v47 = vld [vmem:[%s10606_s27 + $0x94] ss:$12 sps:$4 sm:$0xff]   ;;  %v9636_v50 = vld [vmem:[%s11530_s1 + $0x5e8] sm:$0xff]   ;;  %v9640_v39 = vld [vmem:[%s10606_s27 + $0x98] ss:$12 sps:$4 sm:$0xff]  }
 0x17e   : > { %v7887_v46 = vpop.f32.mrb[64].mxu0  ;;  %8348 = vmatpush3.bf16.msra.mxu0 %v9635_v54 }
 0x17f   : > { %v7888_v62 = vpop.f32.mrb[65].mxu0  ;;  %8349 = vmatprep.subr.bf16.mxu0 %v9644_v55  ;;  %v9637_v55 = vld [vmem:[%s11530_s1 + $0x5a8] sm:$0xff]  }
 0x180   : > { %v7889_v30 = vadd.f32 %v7888_v62, %v7887_v46  ;;  %v7890_v4 = vpop.f32.mrb[66].mxu0  ;;  %v9649_v62 = vld [vmem:[%s10606_s27 + $0xac] ss:$12 sps:$4 sm:$0xff]  }
 0x181   : > { %v7891_v12 = vpop.f32.mrb[67].mxu0 }
 0x182   : > { %v10875_v49 = vadd.f32 %v10657_v32, %v7889_v30  ;;  %v7892_v11 = vadd.f32 %v7891_v12, %v7890_v4  ;;  %8350 = vmatpush3.bf16.msra.mxu0 %v9646_v8  ;;  %v9658_v32 = vld [vmem:[%s11530_s1 + $0x6a8] sm:$0xff]   ;;  %v9642_v8 = vld [vmem:[%s10606_s27 + $0xb0] ss:$12 sps:$4 sm:$0xff]  }
 0x183   : > { %4562 = vmatmul.mubr.bf16.gmra.mrb[172].mxu0 %v9608_v23  ;;  %8704 = vmatmul.mubr.msk.bf16.vlgmr.msra.gmra.mrb[0].mxu1 %vm612_vm0, %v9609_v57  ;;  %v9643_v57 = vld [vmem:[%s11530_s1 + $0x5f0] sm:$0xff]   ;;  %v9647_v12 = vld [vmem:[%s11530_s1 + $0x5f8] sm:$0xff]  }
 0x184   : > { %v10885_v15 = vadd.f32 %v10670_v44, %v7892_v11  ;;  %8262 = vmatpush3.bf16.msra.mxu1 %v9612_v63  ;;  %4569 = vmatprep.mubr.bf16.mxu0 %v9616_v37  ;;  %v9653_v30 = vld [vmem:[%s10803_s23 + $0x4] ss:$12 sps:$4 sm:$0xff]  }
 0x185   : > { %8263 = vmatprep.subr.bf16.mxu1 %v9614_v6  ;;  %8707 = vmatprep.mubr.msk.bf16.mxu1 %vm612_vm0, %v9618_v7 }
 0x186   : > { %v7893_v36 = vpop.f32.mrb[68].mxu0  ;;  %8351 = vmatprep.subr.bf16.mxu0 %v9656_v9 }
 0x187   : > { %v7894_v44 = vpop.f32.mrb[69].mxu0  ;;  %8352 = vmatpush3.bf16.msra.mxu0 %v9657_v59  ;;  %v9651_v59 = vld [vmem:[%s10803_s23] ss:$12 sps:$4 sm:$0xff]  }
 0x188   : > { %v7895_v22 = vadd.f32 %v7894_v44, %v7893_v36  ;;  %v7896_v26 = vpop.f32.mrb[70].mxu0  ;;  %8264 = vmatpush3.bf16.msra.mxu1 %v9615_v13  ;;  %8353 = vmatprep.subr.bf16.mxu0 %v9658_v32  ;;  %v9648_v13 = vld [vmem:[%s11530_s1 + $0x5b8] sm:$0xff]   ;;  %v9655_v32 = vld [vmem:[%s11530_s1 + $0x600] sm:$0xff]  }
 0x189   : > { %v7897_v28 = vpop.f32.mrb[71].mxu0  ;;  %8265 = vmatprep.subr.bf16.mxu1 %v9621_v17  ;;  %v9664_v17 = vld [vmem:[%s10833_s10 + $0x4] ss:$12 sps:$4 sm:$0xff]  }
 0x18a   : > { %v10905_v19 = vadd.f32 %v10690_v61, %v7895_v22  ;;  %v7898_v29 = vadd.f32 %v7897_v28, %v7896_v26  ;;  %v9626_v61 = vld [vmem:[%s11530_s1 + $0x598] sm:$0xff]  }
 0x18b   : > { %4570 = vmatmul.mubr.bf16.gmra.mrb[176].mxu0 %v9619_v16  ;;  %8708 = vmatmul.mubr.msk.bf16.gmra.mrb[4].mxu1 %vm612_vm0, %v9620_v31  ;;  %v9660_v31 = vld [vmem:[%s10803_s23 + $0x1c] ss:$12 sps:$4 sm:$0xff]   ;;  %v9665_v28 = vld [vmem:[%s10803_s23 + $0x18] ss:$12 sps:$4 sm:$0xff]  }
 0x18c   : > { %v10915_v60 = vadd.f32 %v10703_v0, %v7898_v29  ;;  %8266 = vmatpush3.bf16.msra.mxu1 %v9623_v2  ;;  %4577 = vmatprep.mubr.bf16.mxu0 %v9627_v18  ;;  %v9666_v2 = vld [vmem:[%s11530_s1 + $0x608] sm:$0xff]  }
 0x18d   : > { %8267 = vmatprep.subr.bf16.mxu1 %v9625_v27  ;;  %8711 = vmatprep.mubr.msk.bf16.mxu1 %vm612_vm0, %v9629_v20  ;;  %v9662_v27 = vld [vmem:[%s10833_s10] ss:$12 sps:$4 sm:$0xff]  }
 0x18e   : > { %v7899_v38 = vpop.f32.mrb[72].mxu0  ;;  %8354 = vmatpush3.bf16.msra.mxu0 %v9659_v34  ;;  %v9667_v34 = vld [vmem:[%s10803_s23 + $0x34] ss:$12 sps:$4 sm:$0xff]  }
 0x18f   : > { %v7900_v0 = vpop.f32.mrb[73].mxu0  ;;  %8417 = vmatprep.subr.bf16.mxu0 %v9673_v35 }
 0x190   : > { %v7901_v42 = vadd.f32 %v7900_v0, %v7899_v38  ;;  %v7902_v48 = vpop.f32.mrb[74].mxu0  ;;  %8268 = vmatpush3.bf16.msra.mxu1 %v9626_v61  ;;  %v9682_v38 = vld [vmem:[%s11530_s1 + $0x728] sm:$0xff]  }
 0x191   : > { %v7903_v21 = vpop.f32.mrb[75].mxu0  ;;  %8269 = vmatprep.subr.bf16.mxu1 %v9632_v5 }
 0x192   : > { %v10935_v52 = vadd.f32 %v10720_v25, %v7901_v42  ;;  %v7904_v54 = vadd.f32 %v7903_v21, %v7902_v48  ;;  %v9641_v25 = vld [vmem:[%s10606_s27 + $0x90] ss:$12 sps:$4 sm:$0xff]  }
 0x193   : > { %4578 = vmatmul.mubr.bf16.gmra.mrb[180].mxu0 %v9630_v53  ;;  %8712 = vmatmul.mubr.msk.bf16.gmra.mrb[8].mxu1 %vm612_vm0, %v9631_v24  ;;  %v9674_v24 = vld [vmem:[%s11530_s1 + $0x6e0] sm:$0xff]   ;;  %v9689_v42 = vld [vmem:[%s11530_s1 + $0x618] sm:$0xff]  }
 0x194   : > { %v10942_v23 = vadd.f32 %v10730_v1, %v7904_v54  ;;  %8270 = vmatpush3.bf16.msra.mxu1 %v9634_v40  ;;  %4585 = vmatprep.mubr.bf16.mxu0 %v9638_v47  ;;  %v9645_v1 = vld [vmem:[%s11530_s1 + $0x5b0] sm:$0xff]   ;;  %v9683_v47 = vld [vmem:[%s11530_s1 + $0x6e8] sm:$0xff]  }
 0x195   : > { %8271 = vmatprep.subr.bf16.mxu1 %v9636_v50  ;;  %8715 = vmatprep.mubr.msk.bf16.mxu1 %vm612_vm0, %v9640_v39  ;;  %v9671_v21 = vld [vmem:[%s10803_s23 + $0x30] ss:$12 sps:$4 sm:$0xff]   ;;  %v9676_v54 = vld [vmem:[%s10803_s23 + $0x4c] ss:$12 sps:$4 sm:$0xff]  }
 0x196   : > { %v7905_v46 = vpop.f32.mrb[76].mxu0  ;;  %v9691_v50 = vld [vmem:[%s11530_s1 + $0x730] sm:$0xff]  }
 0x197   : > { %v7906_v63 = vpop.f32.mrb[77].mxu0 }
 0x198   : > { %v7907_v4 = vadd.f32 %v7906_v63, %v7905_v46  ;;  %v7908_v37 = vpop.f32.mrb[78].mxu0  ;;  %8272 = vmatpush3.bf16.msra.mxu1 %v9637_v55 }
 0x199   : > { %v7909_v6 = vpop.f32.mrb[79].mxu0  ;;  %8273 = vmatprep.subr.bf16.mxu1 %v9643_v57  ;;  %v9678_v57 = vld [vmem:[%s10833_s10 + $0x34] ss:$12 sps:$4 sm:$0xff]  }
 0x19a   : > { %v10960_v7 = vadd.f32 %v10741_v41, %v7907_v4  ;;  %v7910_v9 = vadd.f32 %v7909_v6, %v7908_v37  ;;  %v9654_v41 = vld [vmem:[%s10606_s27 + $0xa8] ss:$12 sps:$4 sm:$0xff]   ;;  %s10983_s27 = scalar_lea.vmem %s9927_s6, %s7636_s19  ;;  %v9681_v6 = vld [vmem:[%s10833_s10 + $0x30] ss:$12 sps:$4 sm:$0xff]  }
 0x19b   : > { %4586 = vmatmul.mubr.bf16.gmra.mrb[184].mxu0 %v9641_v25  ;;  %8716 = vmatmul.mubr.msk.bf16.gmra.mrb[12].mxu1 %vm612_vm0, %v9642_v8  ;;  %v9692_v8 = vld [vmem:[%s11530_s1 + $0x6f0] sm:$0xff]  }
 0x19c   : > { %v10964_v11 = vadd.f32 %v10745_v43, %v7910_v9  ;;  %8274 = vmatpush3.bf16.msra.mxu1 %v9645_v1  ;;  %4593 = vmatprep.mubr.bf16.mxu0 %v9649_v62  ;;  %v9699_v62 = vld [vmem:[%s11530_s1 + $0x738] sm:$0xff]   ;;  %v9710_v1 = vld [vmem:[%s11530_s1 + $0x628] sm:$0xff]   ;;  %v9708_v9 = vld [vmem:[%s11530_s1 + $0x740] sm:$0xff]  }
 0x19d   : > { %8275 = vmatprep.subr.bf16.mxu1 %v9647_v12  ;;  %5106 = vmatprep.mubr.bf16.mxu1 %v9653_v30  ;;  %v9680_v12 = vld [vmem:[%s10803_s23 + $0x48] ss:$12 sps:$4 sm:$0xff]  }
 0x19e   : > { %v7911_v16 = vpop.f32.mrb[80].mxu0 }
 0x19f   : > { %v7912_v43 = vpop.f32.mrb[81].mxu0 }
 0x1a0   : > { %v7913_v36 = vadd.f32 %v7912_v43, %v7911_v16  ;;  %v7914_v18 = vpop.f32.mrb[82].mxu0  ;;  %8276 = vmatpush3.bf16.msra.mxu1 %v9648_v13 }
 0x1a1   : > { %v7915_v44 = vpop.f32.mrb[83].mxu0  ;;  %8719 = vmatprep.subr.bf16.mxu1 %v9655_v32 }
 0x1a2   : > { %v10980_v20 = vadd.f32 %v10757_v56, %v7913_v36  ;;  %v7916_v22 = vadd.f32 %v7915_v44, %v7914_v18  ;;  %v9675_v56 = vld [vmem:[%s11530_s1 + $0x610] sm:$0xff]   ;;  %v9709_v18 = vld [vmem:[%s11530_s1 + $0x700] sm:$0xff]  }
 0x1a3   : > { %4594 = vmatmul.mubr.bf16.gmra.mrb[188].mxu0 %v9654_v41  ;;  %5107 = vmatmul.mubr.bf16.vlgmr.msra.gmra.mrb[80].mxu1 %v9651_v59  ;;  %v9684_v41 = vld [vmem:[%s10803_s23 + $0x64] ss:$12 sps:$4 sm:$0xff]  }
 0x1a4   : > { %v10986_v26 = vadd.f32 %v10761_v58, %v7916_v22  ;;  %8720 = vmatpush3.bf16.msra.mxu1 %v9655_v32  ;;  %5114 = vmatprep.mubr.bf16.mxu1 %v9660_v31  ;;  %v9669_v58 = vld [vmem:[%s10833_s10 + $0x1c] ss:$12 sps:$4 sm:$0xff]   ;;  %v9686_v32 = vld [vmem:[%s10833_s10 + $0x4c] ss:$12 sps:$4 sm:$0xff]   ;;  %v11054_v22 = vld [vmem:[%s11530_s1 + $0x6b0] sm:$0xff]  }
 0x1a5   : > { %5675 = vmatprep.mubr.bf16.mxu0 %v9664_v17  ;;  %8721 = vmatprep.subr.bf16.mxu1 %v9666_v2 }
 0x1a6   : > { %v7917_v29 = vpop.f32.mrb[84].mxu0 }
 0x1a7   : > { %v7918_v35 = vpop.f32.mrb[85].mxu0 }
 0x1a8   : > { %v7919_v61 = vadd.f32 %v7918_v35, %v7917_v29  ;;  %v7920_v53 = vpop.f32.mrb[86].mxu0  ;;  %8722 = vmatpush3.bf16.msra.mxu1 %v9666_v2 }
 0x1a9   : > { %v7921_v5 = vpop.f32.mrb[87].mxu0  ;;  %8723 = vmatprep.subr.bf16.mxu1 %v9675_v56 }
 0x1aa   : > { %v11002_v0 = vadd.f32 %v10785_v3, %v7919_v61  ;;  %v7922_v40 = vadd.f32 %v7921_v5, %v7920_v53  ;;  %v9672_v3 = vld [vmem:[%s10833_s10 + $0x18] ss:$12 sps:$4 sm:$0xff]   ;;  %v9718_v53 = vld [vmem:[%s11530_s1 + $0x708] sm:$0xff]  }
 0x1ab   : > { %5115 = vmatmul.mubr.bf16.gmra.mrb[84].mxu1 %v9665_v28  ;;  %5676 = vmatmul.mubr.bf16.vlgmr.msra.gmra.mrb[192].mxu0 %v9662_v27  ;;  %v9693_v5 = vld [vmem:[%s10803_s23 + $0x7c] ss:$12 sps:$4 sm:$0xff]  }
 0x1ac   : > { %v11008_v48 = vadd.f32 %v10789_v14, %v7922_v40  ;;  %5122 = vmatprep.mubr.bf16.mxu1 %v9667_v34  ;;  %5683 = vmatprep.mubr.bf16.mxu0 %v9669_v58  ;;  %v9701_v14 = vld [vmem:[%s11530_s1 + $0x620] sm:$0xff]   ;;  %v9717_v34 = vld [vmem:[%s11530_s1 + $0x748] sm:$0xff]  }
 0x1ad   : > { %8418 = vmatpush3.bf16.msra.mxu0 %v9674_v24  ;;  %8724 = vmatpush3.bf16.msra.mxu1 %v9675_v56 }
 0x1ae   : > { %v7923_v39 = vpop.f32.mrb[88].mxu0  ;;  %8419 = vmatprep.subr.bf16.mxu0 %v9682_v38  ;;  %8725 = vmatprep.subr.bf16.mxu1 %v9689_v42  ;;  %v9695_v38 = vld [vmem:[%s10833_s10 + $0x64] ss:$12 sps:$4 sm:$0xff]  }
 0x1af   : > { %v7924_v55 = vpop.f32.mrb[89].mxu0 }
 0x1b0   : > { %v7925_v25 = vadd.f32 %v7924_v55, %v7923_v39  ;;  %v7926_v46 = vpop.f32.mrb[90].mxu0 }
 0x1b1   : > { %v7927_v63 = vpop.f32.mrb[91].mxu0  ;;  %8420 = vmatpush3.bf16.msra.mxu0 %v9683_v47  ;;  %8726 = vmatpush3.bf16.msra.mxu1 %v9689_v42  ;;  %v9726_v42 = vld [vmem:[%s11530_s1 + $0x710] sm:$0xff]  }
 0x1b2   : > { %v11033_v30 = vadd.f32 %v10818_v33, %v7925_v25  ;;  %v7928_v4 = vadd.f32 %v7927_v63, %v7926_v46  ;;  %8421 = vmatprep.subr.bf16.mxu0 %v9691_v50  ;;  %8727 = vmatprep.subr.bf16.mxu1 %v9701_v14  ;;  %v9700_v33 = vld [vmem:[%s11530_s1 + $0x6f8] sm:$0xff]   ;;  %v9698_v63 = vld [vmem:[%s10833_s10 + $0x60] ss:$12 sps:$4 sm:$0xff]  }
 0x1b3   : > { %5123 = vmatmul.mubr.bf16.gmra.mrb[88].mxu1 %v9671_v21  ;;  %5684 = vmatmul.mubr.bf16.gmra.mrb[196].mxu0 %v9672_v3  ;;  %v9727_v46 = vld [vmem:[%s11530_s1 + $0x758] sm:$0xff]  }
 0x1b4   : > { %v11036_v37 = vadd.f32 %v10825_v10, %v7928_v4  ;;  %5130 = vmatprep.mubr.bf16.mxu1 %v9676_v54  ;;  %5691 = vmatprep.mubr.bf16.mxu0 %v9678_v57 }
 0x1b5   : > { %8422 = vmatpush3.bf16.msra.mxu0 %v9692_v8  ;;  %8728 = vmatpush3.bf16.msra.mxu1 %v9701_v14 }
 0x1b6   : > { %v7929_v13 = vpop.f32.mrb[92].mxu0  ;;  %v7965_v59 = vpop.f32.mrb[48].mxu1  ;;  %8423 = vmatprep.subr.bf16.mxu0 %v9699_v62  ;;  %8729 = vmatprep.subr.bf16.mxu1 %v9710_v1 }
 0x1b7   : > { %v7930_v10 = vpop.f32.mrb[93].mxu0  ;;  %v7966_v16 = vpop.f32.mrb[49].mxu1 }
 0x1b8   : > { %v7931_v31 = vadd.f32 %v7930_v10, %v7929_v13  ;;  %v7967_v43 = vadd.f32 %v7966_v16, %v7965_v59  ;;  %v7932_v17 = vpop.f32.mrb[94].mxu0  ;;  %v7968_v36 = vpop.f32.mrb[50].mxu1  ;;  %v11100_v10 = vld [vmem:[%s11530_s1 + $0x760] sm:$0xff]  }
 0x1b9   : > { %v7933_v44 = vpop.f32.mrb[95].mxu0  ;;  %v7969_v2 = vpop.f32.mrb[51].mxu1  ;;  %8424 = vmatpush3.bf16.msra.mxu0 %v9700_v33  ;;  %8730 = vmatpush3.bf16.msra.mxu1 %v9710_v1  ;;  %v9728_v1 = vld [vmem:[%s11530_s1 + $0x718] sm:$0xff]  }
 0x1ba   : > { %v11057_v27 = vadd.f32 %v10845_v45, %v7931_v31  ;;  %v8830_v28 = vadd.f32 %v10875_v49, %v7967_v43  ;;  %v7934_v56 = vadd.f32 %v7933_v44, %v7932_v17  ;;  %v7970_v29 = vadd.f32 %v7969_v2, %v7968_v36  ;;  %8425 = vmatprep.subr.bf16.mxu0 %v9708_v9  ;;  %v9688_v45 = vld [vmem:[%s10803_s23 + $0x60] ss:$12 sps:$4 sm:$0xff]   ;;  %v9690_v49 = vld [vmem:[%s10833_s10 + $0x48] ss:$12 sps:$4 sm:$0xff]  }
 0x1bb   : > { %5131 = vmatmul.mubr.bf16.gmra.mrb[92].mxu1 %v9680_v12  ;;  %5692 = vmatmul.mubr.bf16.gmra.mrb[200].mxu0 %v9681_v6  ;;  %v9702_v6 = vld [vmem:[%s10803_s23 + $0x94] ss:$12 sps:$4 sm:$0xff]  }
 0x1bc   : > { %v11064_v35 = vadd.f32 %v10855_v51, %v7934_v56  ;;  %v8854_v61 = vadd.f32 %v10885_v15, %v7970_v29  ;;  %5138 = vmatprep.mubr.bf16.mxu1 %v9684_v41  ;;  %5699 = vmatprep.mubr.bf16.mxu0 %v9686_v32  ;;  %v9725_v51 = vld [vmem:[%s11530_s1 + $0x750] sm:$0xff]   ;;  %v9704_v32 = vld [vmem:[%s10833_s10 + $0x7c] ss:$12 sps:$4 sm:$0xff]   ;;  %v9707_v56 = vld [vmem:[%s10833_s10 + $0x78] ss:$12 sps:$4 sm:$0xff]  }
 0x1bd   : > { %8426 = vmatpush3.bf16.msra.mxu0 %v9709_v18  ;;  %8747 = vmatprep.subr.bf16.mxu1 %v11054_v22 }
 0x1be   : > { %v7971_v58 = vpop.f32.mrb[52].mxu1  ;;  %v8043_v24 = vpop.f32.mrb[96].mxu0  ;;  %8427 = vmatprep.subr.bf16.mxu0 %v9717_v34 }
 0x1bf   : > { %v7972_v15 = vpop.f32.mrb[53].mxu1  ;;  %v8044_v40 = vpop.f32.mrb[97].mxu0 }
 0x1c0   : > { %v7973_v47 = vadd.f32 %v7972_v15, %v7971_v58  ;;  %v8045_v21 = vadd.f32 %v8044_v40, %v8043_v24  ;;  %v7974_v3 = vpop.f32.mrb[54].mxu1  ;;  %v8046_v50 = vpop.f32.mrb[98].mxu0 }
 0x1c1   : > { %v7975_v39 = vpop.f32.mrb[55].mxu1  ;;  %v8047_v54 = vpop.f32.mrb[99].mxu0  ;;  %8428 = vmatpush3.bf16.msra.mxu0 %v9718_v53 }
 0x1c2   : > { %v8818_v14 = vadd.f32 %v10905_v19, %v7973_v47  ;;  %v11082_v55 = vadd.f32 %v8830_v28, %v8045_v21  ;;  %v7976_v57 = vadd.f32 %v7975_v39, %v7974_v3  ;;  %v8048_v25 = vadd.f32 %v8047_v54, %v8046_v50  ;;  %8429 = vmatprep.subr.bf16.mxu0 %v9725_v51  ;;  %v9697_v19 = vld [vmem:[%s10803_s23 + $0x78] ss:$12 sps:$4 sm:$0xff]   ;;  %v9706_v28 = vld [vmem:[%s10803_s23 + $0x90] ss:$12 sps:$4 sm:$0xff]  }
 0x1c3   : > { %5139 = vmatmul.mubr.bf16.gmra.mrb[96].mxu1 %v9688_v45  ;;  %5700 = vmatmul.mubr.bf16.gmra.mrb[204].mxu0 %v9690_v49  ;;  %v9713_v49 = vld [vmem:[%s10833_s10 + $0x94] ss:$12 sps:$4 sm:$0xff]  }
 0x1c4   : > { %v8842_v8 = vadd.f32 %v10915_v60, %v7976_v57  ;;  %v11088_v62 = vadd.f32 %v8854_v61, %v8048_v25  ;;  %5146 = vmatprep.mubr.bf16.mxu1 %v9693_v5  ;;  %5707 = vmatprep.mubr.bf16.mxu0 %v9695_v38 }
 0x1c5   : > { %8430 = vmatpush3.bf16.msra.mxu0 %v9726_v42 }
 0x1c6   : > { %v7977_v4 = vpop.f32.mrb[56].mxu1  ;;  %v8049_v12 = vpop.f32.mrb[100].mxu0  ;;  %8431 = vmatprep.subr.bf16.mxu0 %v9727_v46 }
 0x1c7   : > { %v7978_v33 = vpop.f32.mrb[57].mxu1  ;;  %v8050_v9 = vpop.f32.mrb[101].mxu0 }
 0x1c8   : > { %v7979_v13 = vadd.f32 %v7978_v33, %v7977_v4  ;;  %v8051_v60 = vadd.f32 %v8050_v9, %v8049_v12  ;;  %v7980_v59 = vpop.f32.mrb[58].mxu1  ;;  %v8052_v41 = vpop.f32.mrb[102].mxu0 }
 0x1c9   : > { %v7981_v16 = vpop.f32.mrb[59].mxu1  ;;  %v8053_v31 = vpop.f32.mrb[103].mxu0  ;;  %8432 = vmatpush3.bf16.msra.mxu0 %v9728_v1 }
 0x1ca   : > { %v8877_v43 = vadd.f32 %v10935_v52, %v7979_v13  ;;  %v11103_v17 = vadd.f32 %v8818_v14, %v8051_v60  ;;  %v7982_v36 = vadd.f32 %v7981_v16, %v7980_v59  ;;  %v8054_v18 = vadd.f32 %v8053_v31, %v8052_v41  ;;  %8775 = vmatprep.subr.bf16.mxu0 %v11100_v10  ;;  %v9711_v52 = vld [vmem:[%s10803_s23 + $0xac] ss:$12 sps:$4 sm:$0xff]   ;;  %v9715_v14 = vld [vmem:[%s10803_s23 + $0xa8] ss:$12 sps:$4 sm:$0xff]  }
 0x1cb   : > { %5147 = vmatmul.mubr.bf16.gmra.mrb[100].mxu1 %v9697_v19  ;;  %5708 = vmatmul.mubr.bf16.gmra.mrb[208].mxu0 %v9698_v63  ;;  %v9719_v19 = vld [vmem:[%s10803_s23 + $0x8] ss:$12 sps:$4 sm:$0xff]   ;;  %v9720_v63 = vld [vmem:[%s10833_s10 + $0xac] ss:$12 sps:$4 sm:$0xff]  }
 0x1cc   : > { %v8899_v44 = vadd.f32 %v10942_v23, %v7982_v36  ;;  %v11107_v2 = vadd.f32 %v8842_v8, %v8054_v18  ;;  %5154 = vmatprep.mubr.bf16.mxu1 %v9702_v6  ;;  %5715 = vmatprep.mubr.bf16.mxu0 %v9704_v32  ;;  %v9723_v16 = vld [vmem:[%s10833_s10 + $0xa8] ss:$12 sps:$4 sm:$0xff]  }
 0x1ce   : > { %v7983_v29 = vpop.f32.mrb[60].mxu1  ;;  %v8055_v34 = vpop.f32.mrb[104].mxu0 }
 0x1cf   : > { %v7984_v61 = vpop.f32.mrb[61].mxu1  ;;  %v8056_v45 = vpop.f32.mrb[105].mxu0 }
 0x1d0   : > { %v7985_v53 = vadd.f32 %v7984_v61, %v7983_v29  ;;  %v8057_v58 = vadd.f32 %v8056_v45, %v8055_v34  ;;  %v7986_v24 = vpop.f32.mrb[62].mxu1  ;;  %v8058_v5 = vpop.f32.mrb[106].mxu0  ;;  %v9733_v29 = vld [vmem:[%s10983_s27 + $0x4] ss:$12 sps:$4 sm:$0xff]  }
 0x1d1   : > { %v7987_v38 = vpop.f32.mrb[63].mxu1  ;;  %v8059_v51 = vpop.f32.mrb[107].mxu0 }
 0x1d2   : > { %v8866_v23 = vadd.f32 %v10960_v7, %v7985_v53  ;;  %v11114_v15 = vadd.f32 %v8877_v43, %v8057_v58  ;;  %v7988_v40 = vadd.f32 %v7987_v38, %v7986_v24  ;;  %v8060_v42 = vadd.f32 %v8059_v51, %v8058_v5  ;;  %v9716_v7 = vld [vmem:[%s10833_s10 + $0x90] ss:$12 sps:$4 sm:$0xff]   ;;  %v9731_v51 = vld [vmem:[%s10983_s27] ss:$12 sps:$4 sm:$0xff]  }
 0x1d3   : > { %5155 = vmatmul.mubr.bf16.gmra.mrb[104].mxu1 %v9706_v28  ;;  %5716 = vmatmul.mubr.bf16.gmra.mrb[212].mxu0 %v9707_v56 }
 0x1d4   : > { %v8888_v47 = vadd.f32 %v10964_v11, %v7988_v40  ;;  %v11117_v21 = vadd.f32 %v8899_v44, %v8060_v42  ;;  %5162 = vmatprep.mubr.bf16.mxu1 %v9711_v52  ;;  %5723 = vmatprep.mubr.bf16.mxu0 %v9713_v49  ;;  %v9730_v44 = vld [vmem:[%s10803_s23 + $0x38] ss:$12 sps:$4 sm:$0xff]  }
 0x1d6   : > { %v7989_v3 = vpop.f32.mrb[64].mxu1  ;;  %v8061_v50 = vpop.f32.mrb[108].mxu0 }
 0x1d7   : > { %v7990_v39 = vpop.f32.mrb[65].mxu1  ;;  %v8062_v54 = vpop.f32.mrb[109].mxu0 }
 0x1d8   : > { %v7991_v57 = vadd.f32 %v7990_v39, %v7989_v3  ;;  %v8063_v25 = vadd.f32 %v8062_v54, %v8061_v50  ;;  %v7992_v46 = vpop.f32.mrb[66].mxu1  ;;  %v8064_v8 = vpop.f32.mrb[110].mxu0  ;;  %v9737_v39 = vld [vmem:[%s10983_s27 + $0x1c] ss:$12 sps:$4 sm:$0xff]  }
 0x1d9   : > { %v7993_v1 = vpop.f32.mrb[67].mxu1  ;;  %v8065_v4 = vpop.f32.mrb[111].mxu0  ;;  %v9740_v54 = vld [vmem:[%s11530_s1 + $0x6c8] sm:$0xff]  }
 0x1da   : > { %v8921_v11 = vadd.f32 %v10980_v20, %v7991_v57  ;;  %v11124_v12 = vadd.f32 %v8866_v23, %v8063_v25  ;;  %v7994_v6 = vadd.f32 %v7993_v1, %v7992_v46  ;;  %v8066_v33 = vadd.f32 %v8065_v4, %v8064_v8  ;;  %v9722_v20 = vld [vmem:[%s10803_s23 + $0x20] ss:$12 sps:$4 sm:$0xff]  }
 0x1db   : > { %5163 = vmatmul.mubr.bf16.gmra.mrb[108].mxu1 %v9715_v14  ;;  %5724 = vmatmul.mubr.bf16.gmra.mrb[216].mxu0 %v9716_v7 }
 0x1dc   : > { %v8943_v9 = vadd.f32 %v10986_v26, %v7994_v6  ;;  %v11127_v13 = vadd.f32 %v8888_v47, %v8066_v33  ;;  %8731 = vmatprep.mubr.msk.bf16.mxu1 %vm612_vm0, %v9719_v19  ;;  %5731 = vmatprep.mubr.bf16.mxu0 %v9720_v63  ;;  %v9729_v26 = vld [vmem:[%s11530_s1 + $0x6b8] sm:$0xff]   ;;  %v9736_v47 = vld [vmem:[%s10803_s23 + $0x68] ss:$12 sps:$4 sm:$0xff]  }
 0x1dd   : > { %v11170_v19 = vld [vmem:[%s11530_s1 + $0x768] sm:$0xff]   ;;  %v9741_v6 = vld [vmem:[%s10983_s27 + $0x18] ss:$12 sps:$4 sm:$0xff]  }
 0x1de   : > { %v7995_v60 = vpop.f32.mrb[68].mxu1  ;;  %v8067_v59 = vpop.f32.mrb[112].mxu0 }
 0x1df   : > { %v7996_v41 = vpop.f32.mrb[69].mxu1  ;;  %v8068_v32 = vpop.f32.mrb[113].mxu0 }
 0x1e0   : > { %v7997_v31 = vadd.f32 %v7996_v41, %v7995_v60  ;;  %v8069_v43 = vadd.f32 %v8068_v32, %v8067_v59  ;;  %v7998_v36 = vpop.f32.mrb[70].mxu1  ;;  %v8070_v18 = vpop.f32.mrb[114].mxu0  ;;  %v9744_v41 = vld [vmem:[%s10803_s23 + $0x98] ss:$12 sps:$4 sm:$0xff]  }
 0x1e1   : > { %v7999_v28 = vpop.f32.mrb[71].mxu1  ;;  %v8071_v56 = vpop.f32.mrb[115].mxu0 }
 0x1e2   : > { %v8910_v34 = vadd.f32 %v11002_v0, %v7997_v31  ;;  %v11138_v52 = vadd.f32 %v8921_v11, %v8069_v43  ;;  %v8000_v61 = vadd.f32 %v7999_v28, %v7998_v36  ;;  %v8072_v45 = vadd.f32 %v8071_v56, %v8070_v18  ;;  %v9735_v0 = vld [vmem:[%s11530_s1 + $0x6c0] sm:$0xff]   ;;  %v9749_v31 = vld [vmem:[%s11530_s1 + $0x6d8] sm:$0xff]  }
 0x1e3   : > { %8732 = vmatmul.mubr.msk.bf16.vlgmr.msra.gmra.mrb[0].mxu1 %vm612_vm0, %v9722_v20  ;;  %5732 = vmatmul.mubr.bf16.gmra.mrb[220].mxu0 %v9723_v16  ;;  %v9739_v11 = vld [vmem:[%s10803_s23 + $0x80] ss:$12 sps:$4 sm:$0xff]  }
 0x1e4   : > { %v8932_v49 = vadd.f32 %v11008_v48, %v8000_v61  ;;  %v11142_v53 = vadd.f32 %v8943_v9, %v8072_v45  ;;  %8748 = vmatpush3.bf16.msra.mxu1 %v11054_v22  ;;  %8735 = vmatprep.mubr.msk.bf16.mxu1 %vm612_vm0, %v9730_v44  ;;  %v9734_v48 = vld [vmem:[%s10803_s23 + $0x50] ss:$12 sps:$4 sm:$0xff]   ;;  %v9745_v16 = vld [vmem:[%s10983_s27 + $0x34] ss:$12 sps:$4 sm:$0xff]  }
 0x1e5   : > { %8749 = vmatprep.subr.bf16.mxu1 %v9729_v26  ;;  %6244 = vmatprep.mubr.bf16.mxu0 %v9733_v29  ;;  %v9748_v61 = vld [vmem:[%s10983_s27 + $0x30] ss:$12 sps:$4 sm:$0xff]  }
 0x1e6   : > { %v8001_v58 = vpop.f32.mrb[72].mxu1  ;;  %v8073_v24 = vpop.f32.mrb[116].mxu0 }
 0x1e7   : > { %v8002_v5 = vpop.f32.mrb[73].mxu1  ;;  %v8074_v38 = vpop.f32.mrb[117].mxu0 }
 0x1e8   : > { %v8003_v23 = vadd.f32 %v8002_v5, %v8001_v58  ;;  %v8075_v40 = vadd.f32 %v8074_v38, %v8073_v24  ;;  %v8004_v42 = vpop.f32.mrb[74].mxu1  ;;  %v8076_v22 = vpop.f32.mrb[118].mxu0  ;;  %8750 = vmatpush3.bf16.msra.mxu1 %v9729_v26  ;;  %v9752_v58 = vld [vmem:[%s10983_s27 + $0x4c] ss:$12 sps:$4 sm:$0xff]  }
 0x1e9   : > { %v8005_v3 = vpop.f32.mrb[75].mxu1  ;;  %v8077_v50 = vpop.f32.mrb[119].mxu0  ;;  %8751 = vmatprep.subr.bf16.mxu1 %v9735_v0 }
 0x1ea   : > { %v8965_v14 = vadd.f32 %v11033_v30, %v8003_v23  ;;  %v11157_v7 = vadd.f32 %v8910_v34, %v8075_v40  ;;  %v8006_v57 = vadd.f32 %v8005_v3, %v8004_v42  ;;  %v8078_v25 = vadd.f32 %v8077_v50, %v8076_v22  ;;  %v9743_v30 = vld [vmem:[%s11530_s1 + $0x6d0] sm:$0xff]   ;;  %v9754_v42 = vld [vmem:[%s10833_s10 + $0x20] ss:$12 sps:$4 sm:$0xff]   ;;  %v9757_v50 = vld [vmem:[%s10833_s10 + $0x38] ss:$12 sps:$4 sm:$0xff]  }
 0x1eb   : > { %8736 = vmatmul.mubr.msk.bf16.gmra.mrb[4].mxu1 %vm612_vm0, %v9734_v48  ;;  %6245 = vmatmul.mubr.bf16.vlgmr.msra.gmra.mrb[224].mxu0 %v9731_v51  ;;  %v9747_v34 = vld [vmem:[%s10803_s23 + $0xb0] ss:$12 sps:$4 sm:$0xff]   ;;  %v9768_v48 = vld [vmem:[%s11530_s1 + $0x780] sm:$0xff]   ;;  %v9755_v22 = vld [vmem:[%s10983_s27 + $0x48] ss:$12 sps:$4 sm:$0xff]  }
 0x1ec   : > { %v8987_v46 = vadd.f32 %v11036_v37, %v8006_v57  ;;  %v11161_v8 = vadd.f32 %v8932_v49, %v8078_v25  ;;  %8752 = vmatpush3.bf16.msra.mxu1 %v9735_v0  ;;  %8739 = vmatprep.mubr.msk.bf16.mxu1 %vm612_vm0, %v9736_v47  ;;  %v9751_v0 = vld [vmem:[%s10833_s10 + $0x8] ss:$12 sps:$4 sm:$0xff]  }
 0x1ed   : > { %6252 = vmatprep.mubr.bf16.mxu0 %v9737_v39  ;;  %8753 = vmatprep.subr.bf16.mxu1 %v9740_v54  ;;  %v11224_v39 = vld [vmem:[%s11530_s1 + $0x788] sm:$0xff]  }
 0x1ee   : > { %v8007_v63 = vpop.f32.mrb[76].mxu1  ;;  %v8079_v1 = vpop.f32.mrb[120].mxu0  ;;  %8776 = vmatpush3.bf16.msra.mxu0 %v11100_v10 }
 0x1ef   : > { %v8008_v37 = vpop.f32.mrb[77].mxu1  ;;  %v8080_v4 = vpop.f32.mrb[121].mxu0  ;;  %8777 = vmatprep.subr.bf16.mxu0 %v11170_v19 }
 0x1f0   : > { %v8009_v33 = vadd.f32 %v8008_v37, %v8007_v63  ;;  %v8081_v9 = vadd.f32 %v8080_v4, %v8079_v1  ;;  %v8010_v60 = vpop.f32.mrb[78].mxu1  ;;  %v8082_v59 = vpop.f32.mrb[122].mxu0  ;;  %8754 = vmatpush3.bf16.msra.mxu1 %v9740_v54  ;;  %v9760_v63 = vld [vmem:[%s10833_s10 + $0x50] ss:$12 sps:$4 sm:$0xff]   ;;  %v9761_v1 = vld [vmem:[%s10983_s27 + $0x60] ss:$12 sps:$4 sm:$0xff]  }
 0x1f1   : > { %v8011_v32 = vpop.f32.mrb[79].mxu1  ;;  %v8083_v20 = vpop.f32.mrb[123].mxu0  ;;  %8755 = vmatprep.subr.bf16.mxu1 %v9743_v30 }
 0x1f2   : > { %v8954_v43 = vadd.f32 %v11057_v27, %v8009_v33  ;;  %v11182_v36 = vadd.f32 %v8965_v14, %v8081_v9  ;;  %v8012_v18 = vadd.f32 %v8011_v32, %v8010_v60  ;;  %v8084_v44 = vadd.f32 %v8083_v20, %v8082_v59  ;;  %8778 = vmatpush3.bf16.msra.mxu0 %v11170_v19  ;;  %v11193_v27 = vld [vmem:[%s11530_s1 + $0x770] sm:$0xff]   ;;  %v9766_v59 = vld [vmem:[%s10983_s27 + $0x78] ss:$12 sps:$4 sm:$0xff]  }
 0x1f3   : > { %8740 = vmatmul.mubr.msk.bf16.gmra.mrb[8].mxu1 %vm612_vm0, %v9739_v11  ;;  %6253 = vmatmul.mubr.bf16.gmra.mrb[228].mxu0 %v9741_v6  ;;  %v9758_v14 = vld [vmem:[%s10983_s27 + $0x64] ss:$12 sps:$4 sm:$0xff]  }
 0x1f4   : > { %v8976_v28 = vadd.f32 %v11064_v35, %v8012_v18  ;;  %v11187_v56 = vadd.f32 %v8987_v46, %v8084_v44  ;;  %8743 = vmatprep.mubr.msk.bf16.mxu1 %vm612_vm0, %v9744_v41  ;;  %8756 = vmatpush3.bf16.msra.mxu1 %v9743_v30  ;;  %v11199_v35 = vld [vmem:[%s11530_s1 + $0x778] sm:$0xff]  }
 0x1f5   : > { %6260 = vmatprep.mubr.bf16.mxu0 %v9745_v16  ;;  %8757 = vmatprep.subr.bf16.mxu1 %v9749_v31  ;;  %v9769_v20 = vld [vmem:[%s10833_s10 + $0x98] ss:$12 sps:$4 sm:$0xff]  }
 0x1f6   : > { %v8085_v26 = vpop.f32.mrb[124].mxu0  ;;  %8779 = vmatprep.subr.bf16.mxu0 %v11193_v27 }
 0x1f7   : > { %v8086_v29 = vpop.f32.mrb[125].mxu0  ;;  %8780 = vmatpush3.bf16.msra.mxu0 %v11193_v27 }
 0x1f8   : > { %v8087_v45 = vadd.f32 %v8086_v29, %v8085_v26  ;;  %v8088_v49 = vpop.f32.mrb[126].mxu0  ;;  %8758 = vmatpush3.bf16.msra.mxu1 %v9749_v31  ;;  %8781 = vmatprep.subr.bf16.mxu0 %v11199_v35  ;;  %v9773_v26 = vld [vmem:[%s10983_s27 + $0x90] ss:$12 sps:$4 sm:$0xff]   ;;  %v9775_v29 = vld [vmem:[%s10983_s27 + $0xac] ss:$12 sps:$4 sm:$0xff]  }
 0x1f9   : > { %v8089_v24 = vpop.f32.mrb[127].mxu0  ;;  %8803 = vmatprep.subr.bf16.mxu1 %v11100_v10 }
 0x1fa   : > { %v11208_v5 = vadd.f32 %v8954_v43, %v8087_v45  ;;  %v8090_v38 = vadd.f32 %v8089_v24, %v8088_v49  ;;  %v9778_v24 = vld [vmem:[%s10983_s27 + $0xa8] ss:$12 sps:$4 sm:$0xff]  }
 0x1fb   : > { %8744 = vmatmul.mubr.msk.bf16.gmra.mrb[12].mxu1 %vm612_vm0, %v9747_v34  ;;  %6261 = vmatmul.mubr.bf16.gmra.mrb[232].mxu0 %v9748_v61  ;;  %v9777_v34 = vld [vmem:[%s10983_s27 + $0x38] ss:$12 sps:$4 sm:$0xff]  }
 0x1fc   : > { %v11211_v51 = vadd.f32 %v8976_v28, %v8090_v38  ;;  %8759 = vmatprep.mubr.msk.bf16.mxu1 %vm612_vm0, %v9751_v0  ;;  %6268 = vmatprep.mubr.bf16.mxu0 %v9752_v58  ;;  %v9779_v38 = vld [vmem:[%s10983_s27 + $0x50] ss:$12 sps:$4 sm:$0xff]  }
 0x1fd   : > { %8782 = vmatpush3.bf16.msra.mxu0 %v11199_v35 }
 0x1fe   : > { %v8121_v23 = vpop.f32.mrb[128].mxu0  ;;  %8783 = vmatprep.subr.bf16.mxu0 %v9768_v48 }
 0x1ff   : > { %v8122_v40 = vpop.f32.mrb[129].mxu0 }
 0x200   : > { %v8123_v47 = vadd.f32 %v8122_v40, %v8121_v23  ;;  %v8124_v3 = vpop.f32.mrb[130].mxu0  ;;  %v9781_v40 = vld [vmem:[%s10983_s27 + $0x68] ss:$12 sps:$4 sm:$0xff]  }
 0x201   : > { %v8125_v54 = vpop.f32.mrb[131].mxu0  ;;  %8784 = vmatpush3.bf16.msra.mxu0 %v9768_v48 }
 0x202   : > { %v11228_v57 = vadd.f32 %v11082_v55, %v8123_v47  ;;  %v8126_v25 = vadd.f32 %v8125_v54, %v8124_v3  ;;  %8785 = vmatprep.subr.bf16.mxu0 %v11224_v39  ;;  %v9783_v54 = vld [vmem:[%s10983_s27 + $0x80] ss:$12 sps:$4 sm:$0xff]  }
 0x203   : > { %8760 = vmatmul.mubr.msk.bf16.vlgmr.msra.gmra.mrb[0].mxu1 %vm612_vm0, %v9754_v42  ;;  %6269 = vmatmul.mubr.bf16.gmra.mrb[236].mxu0 %v9755_v22 }
 0x204   : > { %v11233_v46 = vadd.f32 %v11088_v62, %v8126_v25  ;;  %8809 = vmatpush3.bf16.msra.mxu1 %v11100_v10  ;;  %8763 = vmatprep.mubr.msk.bf16.mxu1 %vm612_vm0, %v9757_v50  ;;  %v9762_v62 = vld [vmem:[%s10833_s10 + $0x68] ss:$12 sps:$4 sm:$0xff]  }
 0x205   : > { %8804 = vmatprep.subr.bf16.mxu1 %v11170_v19  ;;  %6276 = vmatprep.mubr.bf16.mxu0 %v9758_v14  ;;  %v9763_v10 = vld [vmem:[%s10983_s27 + $0x7c] ss:$12 sps:$4 sm:$0xff]  }
 0x206   : > { %v8127_v55 = vpop.f32.mrb[132].mxu0  ;;  %8786 = vmatpush3.bf16.msra.mxu0 %v11224_v39 }
 0x207   : > { %v8128_v30 = vpop.f32.mrb[133].mxu0 }
 0x208   : > { %v8129_v37 = vadd.f32 %v8128_v30, %v8127_v55  ;;  %v8130_v4 = vpop.f32.mrb[134].mxu0  ;;  %8810 = vmatpush3.bf16.msra.mxu1 %v11170_v19 }
 0x209   : > { %v8131_v11 = vpop.f32.mrb[135].mxu0  ;;  %8805 = vmatprep.subr.bf16.mxu1 %v11193_v27 }
 0x20a   : > { %v11246_v6 = vadd.f32 %v11103_v17, %v8129_v37  ;;  %v8132_v33 = vadd.f32 %v8131_v11, %v8130_v4  ;;  %v9765_v17 = vld [vmem:[%s10833_s10 + $0x80] ss:$12 sps:$4 sm:$0xff]   ;;  %v9785_v4 = vld [vmem:[%s10983_s27 + $0xb0] ss:$12 sps:$4 sm:$0xff]  }
 0x20b   : > { %8764 = vmatmul.mubr.msk.bf16.gmra.mrb[4].mxu1 %vm612_vm0, %v9760_v63  ;;  %6277 = vmatmul.mubr.bf16.gmra.mrb[240].mxu0 %v9761_v1 }
 0x20c   : > { %v11250_v9 = vadd.f32 %v11107_v2, %v8132_v33  ;;  %8811 = vmatpush3.bf16.msra.mxu1 %v11193_v27  ;;  %8767 = vmatprep.mubr.msk.bf16.mxu1 %vm612_vm0, %v9762_v62  ;;  %v9770_v2 = vld [vmem:[%s10983_s27 + $0x94] ss:$12 sps:$4 sm:$0xff]   ;;  %v9772_v27 = vld [vmem:[%s10833_s10 + $0xb0] ss:$12 sps:$4 sm:$0xff]   ;;  %s6574_s10 = sshll.u32 %s9808_s12, 4 }
 0x20d   : > { %6284 = vmatprep.mubr.bf16.mxu0 %v9763_v10  ;;  %8806 = vmatprep.subr.bf16.mxu1 %v11199_v35  ;;  %p187_p6 = scmp.lt.s32.totalorder %s6574_s10, 31 }
 0x20e   : > { %v8133_v19 = vpop.f32.mrb[136].mxu0 }
 0x20f   : > { %v8134_v60 = vpop.f32.mrb[137].mxu0  ;;  %s11546_s10 = smov (!%p187_p6, %s6574_s10), 31 }
 0x210   : > { %v8135_v41 = vadd.f32 %v8134_v60, %v8133_v19  ;;  %v8136_v32 = vpop.f32.mrb[138].mxu0  ;;  %8812 = vmatpush3.bf16.msra.mxu1 %v11199_v35 }
 0x211   : > { %v8137_v16 = vpop.f32.mrb[139].mxu0  ;;  %8807 = vmatprep.subr.bf16.mxu1 %v9768_v48 }
 0x212   : > { %v11261_v31 = vadd.f32 %v11114_v15, %v8135_v41  ;;  %v8138_v43 = vadd.f32 %v8137_v16, %v8136_v32 }
 0x213   : > { %8768 = vmatmul.mubr.msk.bf16.gmra.mrb[8].mxu1 %vm612_vm0, %v9765_v17  ;;  %6285 = vmatmul.mubr.bf16.gmra.mrb[244].mxu0 %v9766_v59 }
 0x214   : > { %v11265_v18 = vadd.f32 %v11117_v21, %v8138_v43  ;;  %8771 = vmatprep.mubr.msk.bf16.mxu1 %vm612_vm0, %v9769_v20  ;;  %6292 = vmatprep.mubr.bf16.mxu0 %v9770_v2 }
 0x215   : > { %8813 = vmatpush3.bf16.msra.mxu1 %v9768_v48 }
 0x216   : > { %v8139_v44 = vpop.f32.mrb[140].mxu0  ;;  %8808 = vmatprep.subr.bf16.mxu1 %v11224_v39 }
 0x217   : > { %v8140_v28 = vpop.f32.mrb[141].mxu0 }
 0x218   : > { %v8141_v15 = vadd.f32 %v8140_v28, %v8139_v44  ;;  %v8142_v35 = vpop.f32.mrb[142].mxu0 }
 0x219   : > { %v8143_v61 = vpop.f32.mrb[143].mxu0  ;;  %8814 = vmatpush3.bf16.msra.mxu1 %v11224_v39  ;;  %v9782_v39 = vld [vmem:[%s10983_s27 + $0x20] ss:$12 sps:$4 sm:$0xff]  }
 0x21a   : > { %v11275_v21 = vadd.f32 %v11124_v12, %v8141_v15  ;;  %v8144_v45 = vadd.f32 %v8143_v61, %v8142_v35  ;;  %v9780_v12 = vld [vmem:[%s10983_s27 + $0x8] ss:$12 sps:$4 sm:$0xff]  }
 0x21b   : > { %8772 = vmatmul.mubr.msk.bf16.gmra.mrb[12].mxu1 %vm612_vm0, %v9772_v27  ;;  %6293 = vmatmul.mubr.bf16.gmra.mrb[248].mxu0 %v9773_v26 }
 0x21c   : > { %v11279_v49 = vadd.f32 %v11127_v13, %v8144_v45  ;;  %6300 = vmatprep.mubr.bf16.mxu0 %v9775_v29  ;;  %8791 = vmatprep.mubr.msk.bf16.mxu1 %vm612_vm0, %v9777_v34 }
 0x21e   : > { %v8145_v0 = vpop.f32.mrb[144].mxu0 }
 0x21f   : > { %v8146_v58 = vpop.f32.mrb[145].mxu0 }
 0x220   : > { %v8147_v48 = vadd.f32 %v8146_v58, %v8145_v0  ;;  %v8148_v23 = vpop.f32.mrb[146].mxu0 }
 0x221   : > { %v8149_v42 = vpop.f32.mrb[147].mxu0 }
 0x222   : > { %v11287_v22 = vadd.f32 %v11138_v52, %v8147_v48  ;;  %v8150_v13 = vadd.f32 %v8149_v42, %v8148_v23  ;;  %v9784_v52 = vld [vmem:[%s10983_s27 + $0x98] ss:$12 sps:$4 sm:$0xff]   ;;  %s6575_s27 = sshll.u32 %s11544_s13, 5 }
 0x223   : > { %6301 = vmatmul.mubr.bf16.gmra.mrb[252].mxu0 %v9778_v24  ;;  %8792 = vmatmul.mubr.msk.bf16.vlgmr.msra.gmra.mrb[4].mxu1 %vm612_vm0, %v9779_v38  ;;  %s190_s24 = sadd.s32 %s6575_s27, %s11546_s10 }
 0x224   : > { %v11291_v47 = vadd.f32 %v11142_v53, %v8150_v13  ;;  %8787 = vmatprep.mubr.msk.bf16.mxu0 %vm612_vm0, %v9780_v12  ;;  %8795 = vmatprep.mubr.msk.bf16.mxu1 %vm612_vm0, %v9781_v40  ;;  %s6576_s12 = sshll.u32 %s190_s24, 3 }
 0x225   : > { %s11454_s19 = scalar_lea.vmem %s11532_s3, %s6576_s12 }
 0x226   : > { %v8151_v3 = vpop.f32.mrb[148].mxu0 }
 0x227   : > { %v8152_v50 = vpop.f32.mrb[149].mxu0 }
 0x228   : > { %v8153_v14 = vadd.f32 %v8152_v50, %v8151_v3  ;;  %v8154_v25 = vpop.f32.mrb[150].mxu0 }
 0x229   : > { %v8155_v55 = vpop.f32.mrb[151].mxu0 }
 0x22a   : > { %v11299_v30 = vadd.f32 %v11157_v7, %v8153_v14  ;;  %v8156_v63 = vadd.f32 %v8155_v55, %v8154_v25 }
 0x22b   : > { %8788 = vmatmul.mubr.msk.bf16.vlgmr.msra.gmra.mrb[0].mxu0 %vm612_vm0, %v9782_v39  ;;  %8796 = vmatmul.mubr.msk.bf16.gmra.mrb[8].mxu1 %vm612_vm0, %v9783_v54 }
 0x22c   : > { %v11304_v53 = vadd.f32 %v11161_v8, %v8156_v63  ;;  %8799 = vmatprep.mubr.msk.bf16.mxu1 %vm612_vm0, %v9784_v52 }
 0x22e   : > { %v8157_v1 = vpop.f32.mrb[152].mxu0 }
 0x22f   : > { %v8158_v37 = vpop.f32.mrb[153].mxu0 }
 0x230   : > { %v8159_v62 = vadd.f32 %v8158_v37, %v8157_v1  ;;  %v8160_v11 = vpop.f32.mrb[154].mxu0 }
 0x231   : > { %v8161_v10 = vpop.f32.mrb[155].mxu0 }
 0x232   : > { %v11309_v33 = vadd.f32 %v11182_v36, %v8159_v62  ;;  %v8162_v7 = vadd.f32 %v8161_v10, %v8160_v11 }
 0x233   : > { %8800 = vmatmul.mubr.msk.bf16.gmra.mrb[12].mxu1 %vm612_vm0, %v9785_v4 }
 0x234   : > { %v11313_v19 = vadd.f32 %v11187_v56, %v8162_v7 }
 0x236   : > { %v8163_v60 = vpop.f32.mrb[156].mxu0 }
 0x237   : > { %v8164_v8 = vpop.f32.mrb[157].mxu0 }
 0x238   : > { %v8165_v17 = vadd.f32 %v8164_v8, %v8163_v60  ;;  %v8166_v59 = vpop.f32.mrb[158].mxu0 }
 0x239   : > { %v8167_v41 = vpop.f32.mrb[159].mxu0 }
 0x23a   : > { %v11316_v32 = vadd.f32 %v11208_v5, %v8165_v17  ;;  %v8168_v20 = vadd.f32 %v8167_v41, %v8166_v59 }
 0x23c   : > { %v11319_v2 = vadd.f32 %v11211_v51, %v8168_v20 }
 0x23e   : > { %v8199_v36 = vpop.f32.mrb[160].mxu0 }
 0x23f   : > { %v8200_v16 = vpop.f32.mrb[161].mxu0 }
 0x240   : > { %v8201_v43 = vadd.f32 %v8200_v16, %v8199_v36  ;;  %v8202_v44 = vpop.f32.mrb[162].mxu0 }
 0x241   : > { %v8203_v28 = vpop.f32.mrb[163].mxu0 }
 0x242   : > { %v8833_v56 = vadd.f32 %v11228_v57, %v8201_v43  ;;  %v8204_v27 = vadd.f32 %v8203_v28, %v8202_v44 }
 0x244   : > { %v11323_v26 = vadd.f32 %v11233_v46, %v8204_v27 }
 0x246   : > { %v8205_v15 = vpop.f32.mrb[164].mxu0 }
 0x247   : > { %v8206_v35 = vpop.f32.mrb[165].mxu0 }
 0x248   : > { %v8207_v29 = vadd.f32 %v8206_v35, %v8205_v15  ;;  %v8208_v5 = vpop.f32.mrb[166].mxu0 }
 0x249   : > { %v8209_v34 = vpop.f32.mrb[167].mxu0 }
 0x24a   : > { %v11326_v61 = vadd.f32 %v11246_v6, %v8207_v29  ;;  %v8210_v51 = vadd.f32 %v8209_v34, %v8208_v5 }
 0x24c   : > { %v11329_v45 = vadd.f32 %v11250_v9, %v8210_v51 }
 0x24e   : > { %v8211_v0 = vpop.f32.mrb[168].mxu0 }
 0x24f   : > { %v8212_v58 = vpop.f32.mrb[169].mxu0 }
 0x250   : > { %v8213_v24 = vadd.f32 %v8212_v58, %v8211_v0  ;;  %v8214_v57 = vpop.f32.mrb[170].mxu0 }
 0x251   : > { %v8215_v38 = vpop.f32.mrb[171].mxu0 }
 0x252   : > { %v11332_v46 = vadd.f32 %v11261_v31, %v8213_v24  ;;  %v8216_v48 = vadd.f32 %v8215_v38, %v8214_v57 }
 0x254   : > { %v11335_v23 = vadd.f32 %v11265_v18, %v8216_v48 }
 0x256   : > { %v8217_v12 = vpop.f32.mrb[172].mxu0 }
 0x257   : > { %v8218_v40 = vpop.f32.mrb[173].mxu0 }
 0x258   : > { %v8219_v6 = vadd.f32 %v8218_v40, %v8217_v12  ;;  %v8220_v42 = vpop.f32.mrb[174].mxu0 }
 0x259   : > { %v8221_v13 = vpop.f32.mrb[175].mxu0 }
 0x25a   : > { %v11338_v9 = vadd.f32 %v11275_v21, %v8219_v6  ;;  %v8222_v3 = vadd.f32 %v8221_v13, %v8220_v42 }
 0x25c   : > { %v11341_v50 = vadd.f32 %v11279_v49, %v8222_v3 }
 0x25e   : > { %v8223_v39 = vpop.f32.mrb[176].mxu0 }
 0x25f   : > { %v8224_v54 = vpop.f32.mrb[177].mxu0 }
 0x260   : > { %v8225_v31 = vadd.f32 %v8224_v54, %v8223_v39  ;;  %v8226_v14 = vpop.f32.mrb[178].mxu0 }
 0x261   : > { %v8227_v25 = vpop.f32.mrb[179].mxu0 }
 0x262   : > { %v11344_v18 = vadd.f32 %v11287_v22, %v8225_v31  ;;  %v8228_v52 = vadd.f32 %v8227_v25, %v8226_v14 }
 0x264   : > { %v11347_v55 = vadd.f32 %v11291_v47, %v8228_v52 }
 0x266   : > { %v8229_v63 = vpop.f32.mrb[180].mxu0 }
 0x267   : > { %v8230_v1 = vpop.f32.mrb[181].mxu0 }
 0x268   : > { %v8231_v21 = vadd.f32 %v8230_v1, %v8229_v63  ;;  %v8232_v37 = vpop.f32.mrb[182].mxu0 }
 0x269   : > { %v8233_v4 = vpop.f32.mrb[183].mxu0 }
 0x26a   : > { %v11350_v49 = vadd.f32 %v11299_v30, %v8231_v21  ;;  %v8234_v62 = vadd.f32 %v8233_v4, %v8232_v37 }
 0x26c   : > { %v11353_v11 = vadd.f32 %v11304_v53, %v8234_v62 }
 0x26e   : > { %v8235_v10 = vpop.f32.mrb[184].mxu0 }
 0x26f   : > { %v8236_v7 = vpop.f32.mrb[185].mxu0 }
 0x270   : > { %v8237_v22 = vadd.f32 %v8236_v7, %v8235_v10  ;;  %v8238_v60 = vpop.f32.mrb[186].mxu0 }
 0x271   : > { %v8239_v8 = vpop.f32.mrb[187].mxu0 }
 0x272   : > { %v11356_v47 = vadd.f32 %v11309_v33, %v8237_v22  ;;  %v8240_v17 = vadd.f32 %v8239_v8, %v8238_v60 }
 0x274   : > { %v11359_v59 = vadd.f32 %v11313_v19, %v8240_v17 }
 0x276   : > { %v8241_v41 = vpop.f32.mrb[188].mxu0  ;;  %v8277_v20 = vpop.f32.mrb[80].mxu1 }
 0x277   : > { %v8242_v30 = vpop.f32.mrb[189].mxu0  ;;  %v8278_v36 = vpop.f32.mrb[81].mxu1 }
 0x278   : > { %v8243_v16 = vadd.f32 %v8242_v30, %v8241_v41  ;;  %v8279_v43 = vadd.f32 %v8278_v36, %v8277_v20  ;;  %v8244_v53 = vpop.f32.mrb[190].mxu0  ;;  %v8280_v44 = vpop.f32.mrb[82].mxu1 }
 0x279   : > { %v8245_v28 = vpop.f32.mrb[191].mxu0  ;;  %v8281_v27 = vpop.f32.mrb[83].mxu1 }
 0x27a   : > { %v11362_v15 = vadd.f32 %v11316_v32, %v8243_v16  ;;  %v8834_v35 = vadd.f32 %v8833_v56, %v8279_v43  ;;  %v8246_v33 = vadd.f32 %v8245_v28, %v8244_v53  ;;  %v8282_v29 = vadd.f32 %v8281_v27, %v8280_v44 }
 0x27c   : > { %v11365_v5 = vadd.f32 %v11319_v2, %v8246_v33  ;;  %v8858_v19 = vadd.f32 %v11323_v26, %v8282_v29 }
 0x27e   : > { %v8283_v34 = vpop.f32.mrb[84].mxu1  ;;  %v8355_v51 = vpop.f32.mrb[192].mxu0 }
 0x27f   : > { %v8284_v0 = vpop.f32.mrb[85].mxu1  ;;  %v8356_v58 = vpop.f32.mrb[193].mxu0 }
 0x280   : > { %v8285_v24 = vadd.f32 %v8284_v0, %v8283_v34  ;;  %v8357_v57 = vadd.f32 %v8356_v58, %v8355_v51  ;;  %v8286_v38 = vpop.f32.mrb[86].mxu1  ;;  %v8358_v48 = vpop.f32.mrb[194].mxu0 }
 0x281   : > { %v8287_v12 = vpop.f32.mrb[87].mxu1  ;;  %v8359_v40 = vpop.f32.mrb[195].mxu0 }
 0x282   : > { %v8822_v32 = vadd.f32 %v11326_v61, %v8285_v24  ;;  %v8288_v56 = vadd.f32 %v8287_v12, %v8286_v38  ;;  %v8360_v6 = vadd.f32 %v8359_v40, %v8358_v48  ;;  %v11369_v42 = vadd.f32 %v8834_v35, %v8357_v57 }
 0x284   : > { %v8846_v2 = vadd.f32 %v11329_v45, %v8288_v56  ;;  %v11372_v13 = vadd.f32 %v8858_v19, %v8360_v6 }
 0x286   : > { %v8289_v26 = vpop.f32.mrb[88].mxu1  ;;  %v8361_v3 = vpop.f32.mrb[196].mxu0 }
 0x287   : > { %v8290_v39 = vpop.f32.mrb[89].mxu1  ;;  %v8362_v54 = vpop.f32.mrb[197].mxu0 }
 0x288   : > { %v8291_v31 = vadd.f32 %v8290_v39, %v8289_v26  ;;  %v8363_v14 = vadd.f32 %v8362_v54, %v8361_v3  ;;  %v8292_v25 = vpop.f32.mrb[90].mxu1  ;;  %v8364_v52 = vpop.f32.mrb[198].mxu0 }
 0x289   : > { %v8293_v63 = vpop.f32.mrb[91].mxu1  ;;  %v8365_v1 = vpop.f32.mrb[199].mxu0 }
 0x28a   : > { %v8881_v61 = vadd.f32 %v11332_v46, %v8291_v31  ;;  %v8294_v21 = vadd.f32 %v8293_v63, %v8292_v25  ;;  %v8366_v37 = vadd.f32 %v8365_v1, %v8364_v52  ;;  %v11375_v4 = vadd.f32 %v8822_v32, %v8363_v14 }
 0x28c   : > { %v8903_v45 = vadd.f32 %v11335_v23, %v8294_v21  ;;  %v11378_v62 = vadd.f32 %v8846_v2, %v8366_v37 }
 0x28e   : > { %v8295_v10 = vpop.f32.mrb[92].mxu1  ;;  %v8367_v7 = vpop.f32.mrb[200].mxu0 }
 0x28f   : > { %v8296_v22 = vpop.f32.mrb[93].mxu1  ;;  %v8368_v60 = vpop.f32.mrb[201].mxu0 }
 0x290   : > { %v8297_v8 = vadd.f32 %v8296_v22, %v8295_v10  ;;  %v8369_v17 = vadd.f32 %v8368_v60, %v8367_v7  ;;  %v8298_v41 = vpop.f32.mrb[94].mxu1  ;;  %v8370_v20 = vpop.f32.mrb[202].mxu0 }
 0x291   : > { %v8299_v30 = vpop.f32.mrb[95].mxu1  ;;  %v8371_v36 = vpop.f32.mrb[203].mxu0 }
 0x292   : > { %v8870_v46 = vadd.f32 %v11338_v9, %v8297_v8  ;;  %v11381_v16 = vadd.f32 %v8881_v61, %v8369_v17  ;;  %v8300_v43 = vadd.f32 %v8299_v30, %v8298_v41  ;;  %v8372_v53 = vadd.f32 %v8371_v36, %v8370_v20 }
 0x294   : > { %v8892_v23 = vadd.f32 %v11341_v50, %v8300_v43  ;;  %v11384_v44 = vadd.f32 %v8903_v45, %v8372_v53 }
 0x296   : > { %v8301_v28 = vpop.f32.mrb[96].mxu1  ;;  %v8373_v27 = vpop.f32.mrb[204].mxu0 }
 0x297   : > { %v8302_v35 = vpop.f32.mrb[97].mxu1  ;;  %v8374_v33 = vpop.f32.mrb[205].mxu0 }
 0x298   : > { %v8303_v29 = vadd.f32 %v8302_v35, %v8301_v28  ;;  %v8375_v19 = vadd.f32 %v8374_v33, %v8373_v27  ;;  %v8304_v34 = vpop.f32.mrb[98].mxu1  ;;  %v8376_v51 = vpop.f32.mrb[206].mxu0 }
 0x299   : > { %v8305_v0 = vpop.f32.mrb[99].mxu1  ;;  %v8377_v58 = vpop.f32.mrb[207].mxu0 }
 0x29a   : > { %v8925_v9 = vadd.f32 %v11344_v18, %v8303_v29  ;;  %v11387_v24 = vadd.f32 %v8870_v46, %v8375_v19  ;;  %v8306_v57 = vadd.f32 %v8305_v0, %v8304_v34  ;;  %v8378_v38 = vadd.f32 %v8377_v58, %v8376_v51 }
 0x29c   : > { %v8947_v50 = vadd.f32 %v11347_v55, %v8306_v57  ;;  %v11390_v48 = vadd.f32 %v8892_v23, %v8378_v38 }
 0x29e   : > { %v8307_v12 = vpop.f32.mrb[100].mxu1  ;;  %v8379_v40 = vpop.f32.mrb[208].mxu0 }
 0x29f   : > { %v8308_v32 = vpop.f32.mrb[101].mxu1  ;;  %v8380_v56 = vpop.f32.mrb[209].mxu0 }
 0x2a0   : > { %v8309_v6 = vadd.f32 %v8308_v32, %v8307_v12  ;;  %v8381_v2 = vadd.f32 %v8380_v56, %v8379_v40  ;;  %v8310_v26 = vpop.f32.mrb[102].mxu1  ;;  %v8382_v3 = vpop.f32.mrb[210].mxu0 }
 0x2a1   : > { %v8311_v39 = vpop.f32.mrb[103].mxu1  ;;  %v8383_v54 = vpop.f32.mrb[211].mxu0 }
 0x2a2   : > { %v8914_v18 = vadd.f32 %v11350_v49, %v8309_v6  ;;  %v11393_v31 = vadd.f32 %v8925_v9, %v8381_v2  ;;  %v8312_v14 = vadd.f32 %v8311_v39, %v8310_v26  ;;  %v8384_v25 = vadd.f32 %v8383_v54, %v8382_v3 }
 0x2a4   : > { %v8936_v55 = vadd.f32 %v11353_v11, %v8312_v14  ;;  %v11396_v52 = vadd.f32 %v8947_v50, %v8384_v25 }
 0x2a6   : > { %v8313_v63 = vpop.f32.mrb[104].mxu1  ;;  %v8385_v1 = vpop.f32.mrb[212].mxu0 }
 0x2a7   : > { %v8314_v61 = vpop.f32.mrb[105].mxu1  ;;  %v8386_v21 = vpop.f32.mrb[213].mxu0 }
 0x2a8   : > { %v8315_v37 = vadd.f32 %v8314_v61, %v8313_v63  ;;  %v8387_v45 = vadd.f32 %v8386_v21, %v8385_v1  ;;  %v8316_v10 = vpop.f32.mrb[106].mxu1  ;;  %v8388_v7 = vpop.f32.mrb[214].mxu0 }
 0x2a9   : > { %v8317_v22 = vpop.f32.mrb[107].mxu1  ;;  %v8389_v60 = vpop.f32.mrb[215].mxu0 }
 0x2aa   : > { %v8969_v49 = vadd.f32 %v11356_v47, %v8315_v37  ;;  %v11399_v8 = vadd.f32 %v8914_v18, %v8387_v45  ;;  %v8318_v17 = vadd.f32 %v8317_v22, %v8316_v10  ;;  %v8390_v41 = vadd.f32 %v8389_v60, %v8388_v7 }
 0x2ac   : > { %v8991_v11 = vadd.f32 %v11359_v59, %v8318_v17  ;;  %v11402_v20 = vadd.f32 %v8936_v55, %v8390_v41 }
 0x2ae   : > { %v8319_v30 = vpop.f32.mrb[108].mxu1  ;;  %v8391_v36 = vpop.f32.mrb[216].mxu0 }
 0x2af   : > { %v8320_v46 = vpop.f32.mrb[109].mxu1  ;;  %v8392_v43 = vpop.f32.mrb[217].mxu0 }
 0x2b0   : > { %v8321_v53 = vadd.f32 %v8320_v46, %v8319_v30  ;;  %v8393_v23 = vadd.f32 %v8392_v43, %v8391_v36  ;;  %v8322_v28 = vpop.f32.mrb[110].mxu1  ;;  %v8394_v27 = vpop.f32.mrb[218].mxu0 }
 0x2b1   : > { %v8323_v35 = vpop.f32.mrb[111].mxu1  ;;  %v8395_v33 = vpop.f32.mrb[219].mxu0 }
 0x2b2   : > { %v8958_v47 = vadd.f32 %v11362_v15, %v8321_v53  ;;  %v11405_v29 = vadd.f32 %v8969_v49, %v8393_v23  ;;  %v8324_v19 = vadd.f32 %v8323_v35, %v8322_v28  ;;  %v8396_v34 = vadd.f32 %v8395_v33, %v8394_v27 }
 0x2b4   : > { %v8980_v59 = vadd.f32 %v11365_v5, %v8324_v19  ;;  %v11408_v51 = vadd.f32 %v8991_v11, %v8396_v34 }
 0x2b6   : > { %v8397_v0 = vpop.f32.mrb[220].mxu0 }
 0x2b7   : > { %v8398_v58 = vpop.f32.mrb[221].mxu0 }
 0x2b8   : > { %v8399_v9 = vadd.f32 %v8398_v58, %v8397_v0  ;;  %v8400_v57 = vpop.f32.mrb[222].mxu0 }
 0x2b9   : > { %v8401_v38 = vpop.f32.mrb[223].mxu0 }
 0x2ba   : > { %v11410_v50 = vadd.f32 %v8958_v47, %v8399_v9  ;;  %v8402_v12 = vadd.f32 %v8401_v38, %v8400_v57 }
 0x2bc   : > { %v11412_v40 = vadd.f32 %v8980_v59, %v8402_v12 }
 0x2be   : > { %v8433_v32 = vpop.f32.mrb[224].mxu0 }
 0x2bf   : > { %v8434_v15 = vpop.f32.mrb[225].mxu0 }
 0x2c0   : > { %v8435_v56 = vadd.f32 %v8434_v15, %v8433_v32  ;;  %v8436_v6 = vpop.f32.mrb[226].mxu0 }
 0x2c1   : > { %v8437_v2 = vpop.f32.mrb[227].mxu0 }
 0x2c2   : > { %v8438_v26 = vadd.f32 %v8437_v2, %v8436_v6 }
 0x2c6   : > { %v8439_v3 = vpop.f32.mrb[228].mxu0 }
 0x2c7   : > { %v8440_v5 = vpop.f32.mrb[229].mxu0 }
 0x2c8   : > { %v8441_v39 = vadd.f32 %v8440_v5, %v8439_v3  ;;  %v8442_v54 = vpop.f32.mrb[230].mxu0 }
 0x2c9   : > { %v8443_v18 = vpop.f32.mrb[231].mxu0 }
 0x2ca   : > { %v8444_v14 = vadd.f32 %v8443_v18, %v8442_v54 }
 0x2ce   : > { %v8445_v25 = vpop.f32.mrb[232].mxu0 }
 0x2cf   : > { %v8446_v55 = vpop.f32.mrb[233].mxu0 }
 0x2d0   : > { %v8447_v63 = vadd.f32 %v8446_v55, %v8445_v25  ;;  %v8448_v1 = vpop.f32.mrb[234].mxu0 }
 0x2d1   : > { %v8449_v61 = vpop.f32.mrb[235].mxu0 }
 0x2d2   : > { %v8450_v21 = vadd.f32 %v8449_v61, %v8448_v1  ;;  %v8883_v37 = vadd.f32 %v11381_v16, %v8447_v63 }
 0x2d4   : > { %v11416_v45 = vadd.f32 %v11384_v44, %v8450_v21 }
 0x2d6   : > { %v8761_v10 = vpop.f32.mrb[0].mxu1  ;;  %v8451_v7 = vpop.f32.mrb[236].mxu0 }
 0x2d7   : > { %v8824_v22 = vadd.f32 %v11375_v4, %v8761_v10  ;;  %v5774_v60 = vpop.f32.mrb[1].mxu1  ;;  %v8452_v49 = vpop.f32.mrb[237].mxu0 }
 0x2d8   : > { %v8836_v17 = vadd.f32 %v11369_v42, %v5774_v60  ;;  %v8453_v41 = vadd.f32 %v8452_v49, %v8451_v7  ;;  %v8762_v11 = vpop.f32.mrb[2].mxu1  ;;  %v8454_v30 = vpop.f32.mrb[238].mxu0 }
 0x2d9   : > { %v8848_v36 = vadd.f32 %v11378_v62, %v8762_v11  ;;  %v5777_v46 = vpop.f32.mrb[3].mxu1  ;;  %v8455_v43 = vpop.f32.mrb[239].mxu0  ;;  %v11421_v53 = vadd.f32 %v8824_v22, %v8441_v39 }
 0x2da   : > { %v8860_v16 = vadd.f32 %v11372_v13, %v5777_v46  ;;  %v8456_v44 = vadd.f32 %v8455_v43, %v8454_v30  ;;  %v8872_v23 = vadd.f32 %v11387_v24, %v8453_v41  ;;  %v11425_v4 = vadd.f32 %v8836_v17, %v8435_v56 }
 0x2db   : > { %v11427_v28 = vadd.f32 %v8848_v36, %v8444_v14 }
 0x2dc   : > { %v8894_v42 = vadd.f32 %v11390_v48, %v8456_v44  ;;  %v11430_v27 = vadd.f32 %v8860_v16, %v8438_v26 }
 0x2de   : > { %v8457_v35 = vpop.f32.mrb[240].mxu0 }
 0x2df   : > { %v8458_v62 = vpop.f32.mrb[241].mxu0 }
 0x2e0   : > { %v8459_v33 = vadd.f32 %v8458_v62, %v8457_v35  ;;  %v8460_v47 = vpop.f32.mrb[242].mxu0 }
 0x2e1   : > { %v8461_v19 = vpop.f32.mrb[243].mxu0 }
 0x2e2   : > { %v8462_v34 = vadd.f32 %v8461_v19, %v8460_v47  ;;  %v8927_v13 = vadd.f32 %v11393_v31, %v8459_v33 }
 0x2e4   : > { %v11434_v59 = vadd.f32 %v11396_v52, %v8462_v34 }
 0x2e6   : > { %v8463_v24 = vpop.f32.mrb[244].mxu0 }
 0x2e7   : > { %v8464_v0 = vpop.f32.mrb[245].mxu0 }
 0x2e8   : > { %v8465_v58 = vadd.f32 %v8464_v0, %v8463_v24  ;;  %v8466_v9 = vpop.f32.mrb[246].mxu0 }
 0x2e9   : > { %v8467_v48 = vpop.f32.mrb[247].mxu0 }
 0x2ea   : > { %v8468_v57 = vadd.f32 %v8467_v48, %v8466_v9  ;;  %v8916_v38 = vadd.f32 %v11399_v8, %v8465_v58 }
 0x2ec   : > { %v8938_v12 = vadd.f32 %v11402_v20, %v8468_v57  ;;  %v11449_v20 = vld [vmem:[%s11531_s2] ss:$0 sm:$0xff] }
 0x2ee   : > { %v8469_v32 = vpop.f32.mrb[248].mxu0 }
 0x2ef   : > { %v8470_v15 = vpop.f32.mrb[249].mxu0 }
 0x2f0   : > { %v8471_v31 = vadd.f32 %v8470_v15, %v8469_v32  ;;  %v8472_v56 = vpop.f32.mrb[250].mxu0 }
 0x2f1   : > { %v8473_v52 = vpop.f32.mrb[251].mxu0 }
 0x2f2   : > { %v8474_v6 = vadd.f32 %v8473_v52, %v8472_v56  ;;  %v11441_v2 = vadd.f32 %v11405_v29, %v8471_v31 }
 0x2f4   : > { %v11444_v26 = vadd.f32 %v11408_v51, %v8474_v6 }
 0x2f6   : > { %v8475_v3 = vpop.f32.mrb[252].mxu0  ;;  %v8793_v8 = vpop.f32.mrb[4].mxu1 }
 0x2f7   : > { %v8873_v5 = vadd.f32 %v8872_v23, %v8793_v8  ;;  %v8476_v39 = vpop.f32.mrb[253].mxu0  ;;  %v6359_v54 = vpop.f32.mrb[5].mxu1 }
 0x2f8   : > { %v8477_v29 = vadd.f32 %v8476_v39, %v8475_v3  ;;  %v8884_v51 = vadd.f32 %v8883_v37, %v6359_v54  ;;  %v8478_v18 = vpop.f32.mrb[254].mxu0  ;;  %v8794_v14 = vpop.f32.mrb[6].mxu1 }
 0x2f9   : > { %v6435_v25 = vadd.f32 %v8873_v5, %v11449_v20  ;;  %v8895_v55 = vadd.f32 %v8894_v42, %v8794_v14  ;;  %v8479_v63 = vpop.f32.mrb[255].mxu0  ;;  %v6362_v1 = vpop.f32.mrb[7].mxu1 }
 0x2fa   : > { %v6433_v61 = vadd.f32 %v8884_v51, %v11449_v20  ;;  %v8480_v21 = vadd.f32 %v8479_v63, %v8478_v18  ;;  %v8906_v10 = vadd.f32 %v11416_v45, %v6362_v1  ;;  %v8960_v7 = vadd.f32 %v11410_v50, %v8477_v29 }
 0x2fb   : > { %6452 = vst.msk [vmem:[%s11454_s19 + $0x30] sm:$0xff] %vm6445_vm1, %v6435_v25  ;;  %v6436_v37 = vadd.f32 %v8895_v55, %v11449_v20 }
 0x2fc   : > { %6450 = vst.msk [vmem:[%s11454_s19 + $0x20] sm:$0xff] %vm6445_vm1, %v6433_v61  ;;  %v6434_v22 = vadd.f32 %v8906_v10, %v11449_v20  ;;  %v8982_v60 = vadd.f32 %v11412_v40, %v8480_v21 }
 0x2fd   : > { %6453 = vst.msk [vmem:[%s11454_s19 + $0x38] sm:$0xff] %vm6445_vm1, %v6436_v37 }
 0x2fe   : > { %6451 = vst.msk [vmem:[%s11454_s19 + $0x28] sm:$0xff] %vm6445_vm1, %v6434_v22  ;;  %v8789_v49 = vpop.f32.mrb[0].mxu0  ;;  %v8797_v17 = vpop.f32.mrb[8].mxu1 }
 0x2ff   : > { %v8826_v45 = vadd.f32 %v11421_v53, %v8789_v49  ;;  %v8917_v41 = vadd.f32 %v8916_v38, %v8797_v17  ;;  %v6343_v50 = vpop.f32.mrb[1].mxu0  ;;  %v6375_v11 = vpop.f32.mrb[9].mxu1 }
 0x300   : > { %v8838_v30 = vadd.f32 %v11425_v4, %v6343_v50  ;;  %v8928_v36 = vadd.f32 %v8927_v13, %v6375_v11  ;;  %v8790_v46 = vpop.f32.mrb[2].mxu0  ;;  %v8798_v43 = vpop.f32.mrb[10].mxu1 }
 0x301   : > { %v6431_v40 = vadd.f32 %v8826_v45, %v11449_v20  ;;  %v6439_v16 = vadd.f32 %v8917_v41, %v11449_v20  ;;  %v8850_v44 = vadd.f32 %v11427_v28, %v8790_v46  ;;  %v8939_v53 = vadd.f32 %v8938_v12, %v8798_v43  ;;  %v6346_v23 = vpop.f32.mrb[3].mxu0  ;;  %v6378_v42 = vpop.f32.mrb[11].mxu1 }
 0x302   : > { %v6429_v4 = vadd.f32 %v8838_v30, %v11449_v20  ;;  %v6437_v35 = vadd.f32 %v8928_v36, %v11449_v20  ;;  %v8862_v62 = vadd.f32 %v11430_v27, %v6346_v23  ;;  %v8950_v33 = vadd.f32 %v11434_v59, %v6378_v42 }
 0x303   : > { %6448 = vst.msk [vmem:[%s11454_s19 + $0x10] sm:$0xff] %vm6445_vm1, %v6431_v40  ;;  %6456 = vst.msk [vmem:[%s11454_s19 + $0x50] sm:$0xff] %vm6445_vm1, %v6439_v16  ;;  %v6432_v28 = vadd.f32 %v8850_v44, %v11449_v20  ;;  %v6440_v47 = vadd.f32 %v8939_v53, %v11449_v20 }
 0x304   : > { %6446 = vst.msk [vmem:[%s11454_s19] sm:$0xff] %vm6445_vm1, %v6429_v4  ;;  %6454 = vst.msk [vmem:[%s11454_s19 + $0x40] sm:$0xff] %vm6445_vm1, %v6437_v35  ;;  %v6430_v19 = vadd.f32 %v8862_v62, %v11449_v20  ;;  %v6438_v34 = vadd.f32 %v8950_v33, %v11449_v20 }
 0x305   : > { %6449 = vst.msk [vmem:[%s11454_s19 + $0x18] sm:$0xff] %vm6445_vm1, %v6432_v28  ;;  %6457 = vst.msk [vmem:[%s11454_s19 + $0x58] sm:$0xff] %vm6445_vm1, %v6440_v47 }
 0x306   : > { %6447 = vst.msk [vmem:[%s11454_s19 + $0x8] sm:$0xff] %vm6445_vm1, %v6430_v19  ;;  %6455 = vst.msk [vmem:[%s11454_s19 + $0x48] sm:$0xff] %vm6445_vm1, %v6438_v34  ;;  %v8801_v27 = vpop.f32.mrb[12].mxu1 }
 0x307   : > { %v8961_v13 = vadd.f32 %v8960_v7, %v8801_v27  ;;  %v6391_v59 = vpop.f32.mrb[13].mxu1 }
 0x308   : > { %v8972_v24 = vadd.f32 %v11441_v2, %v6391_v59  ;;  %v8802_v0 = vpop.f32.mrb[14].mxu1 }
 0x309   : > { %v6443_v58 = vadd.f32 %v8961_v13, %v11449_v20  ;;  %v8983_v9 = vadd.f32 %v8982_v60, %v8802_v0  ;;  %v6394_v48 = vpop.f32.mrb[15].mxu1 }
 0x30a   : > { %v6441_v57 = vadd.f32 %v8972_v24, %v11449_v20  ;;  %v8994_v38 = vadd.f32 %v11444_v26, %v6394_v48 }
 0x30b   : > { %6460 = vst.msk [vmem:[%s11454_s19 + $0x70] sm:$0xff] %vm6445_vm1, %v6443_v58  ;;  %v6444_v12 = vadd.f32 %v8983_v9, %v11449_v20 }
 0x30c   : > { %6458 = vst.msk [vmem:[%s11454_s19 + $0x60] sm:$0xff] %vm6445_vm1, %v6441_v57  ;;  %v6442_v32 = vadd.f32 %v8994_v38, %v11449_v20 }
 0x30d   : > { %6461 = vst.msk [vmem:[%s11454_s19 + $0x78] sm:$0xff] %vm6445_vm1, %v6444_v12 }
 0x30e   : > { %6459 = vst.msk [vmem:[%s11454_s19 + $0x68] sm:$0xff] %vm6445_vm1, %v6442_v32 }
 0x30f PF: > { %s13_s16 = sadd.s32 1, %s9824_s16   ;;  %s11533_s12 = smov %s9816_s14 }
 0x310   : > { %p10_p7 = scmp.ge.s32.totalorder %s13_s16, 6   ;;  %s11534_s13 = smov %s9820_s15 }
 0x311   : > { %s11535_s14 = smov %s11538_s17  ;;  %s11536_s15 = smov %s11542_s18 }
 0x312   :  { %12 = sbr.rel (!%p10_p7) target bundleno = 3 (0x3), region = 83 }

</bundles_post_ra>
